<compile_context>
chip_gen: v7x
topology: tpu7x:2x2x1
jax: 0.10.0
libtpu: 0.0.40
codegen_flags: <defaults>
</compile_context>

<pallas_src>
import numpy as np
import jax
import jax.numpy as jnp
from jax import lax
from jax.experimental import pallas as pl
from jax.experimental.pallas import tpu as pltpu

# --- module hyper-parameters (defaults of TorchMelSpectrogram.__init__) ------
FILTER_LENGTH = 1024          # n_fft
HOP_LENGTH = 256
WIN_LENGTH = 1024
N_MELS = 80
MEL_FMIN = 0.0
MEL_FMAX = 8000.0
SAMPLE_RATE = 22050
N_FREQS = FILTER_LENGTH // 2 + 1                  # 513 onesided rfft bins
N_FREQS_PAD = ((N_FREQS + 127) // 128) * 128      # 640, lane aligned
HOPS_PER_FRAME = FILTER_LENGTH // HOP_LENGTH      # 4 (n_fft = 4 * hop)
MAX_FRAME_TILE = 512                              # frames per grid step (cap)

assert FILTER_LENGTH == HOPS_PER_FRAME * HOP_LENGTH


# --- parameter construction (deterministic, in-script) ------------------------
def _hz_to_mel_htk(f):
    return 2595.0 * np.log10(1.0 + f / 700.0)


def _mel_to_hz_htk(m):
    return 700.0 * (10.0 ** (m / 2595.0) - 1.0)


def make_mel_filterbank_t():
    """torchaudio melscale_fbanks (mel_scale='htk', norm='slaney'), transposed
    and zero-padded along the frequency axis: (N_MELS, N_FREQS_PAD)."""
    all_freqs = np.linspace(0.0, SAMPLE_RATE / 2.0, N_FREQS)
    m_pts = np.linspace(_hz_to_mel_htk(MEL_FMIN), _hz_to_mel_htk(MEL_FMAX), N_MELS + 2)
    f_pts = _mel_to_hz_htk(m_pts)
    f_diff = f_pts[1:] - f_pts[:-1]                      # (n_mels+1,)
    slopes = f_pts[None, :] - all_freqs[:, None]         # (n_freqs, n_mels+2)
    down = -slopes[:, :-2] / f_diff[:-1]
    up = slopes[:, 2:] / f_diff[1:]
    fb = np.maximum(0.0, np.minimum(down, up))           # (n_freqs, n_mels)
    enorm = 2.0 / (f_pts[2:N_MELS + 2] - f_pts[:N_MELS]) # slaney area norm
    fb = fb * enorm[None, :]
    fb_t = np.zeros((N_MELS, N_FREQS_PAD), np.float32)
    fb_t[:, :N_FREQS] = fb.T
    return fb_t


def make_dft_basis_t():
    """Windowed real-DFT basis, transposed and stacked [cos | sin] along the
    output (lane) axis, each half zero-padded to N_FREQS_PAD columns:
    (n_fft, 2*N_FREQS_PAD).  frames @ basis_t -> [re | im] in one MXU matmul.
    (+sin vs -sin is irrelevant: only re^2 + im^2 is consumed.)"""
    n = np.arange(FILTER_LENGTH)
    k = np.arange(N_FREQS)
    window = 0.5 - 0.5 * np.cos(2.0 * np.pi * n / WIN_LENGTH)   # periodic Hann
    ang = 2.0 * np.pi * np.outer(n, k) / FILTER_LENGTH          # (n_fft, n_freqs)
    basis_t = np.zeros((FILTER_LENGTH, 2 * N_FREQS_PAD), np.float32)
    basis_t[:, :N_FREQS] = np.cos(ang) * window[:, None]
    basis_t[:, N_FREQS_PAD:N_FREQS_PAD + N_FREQS] = np.sin(ang) * window[:, None]
    return basis_t


_BASIS_T_NP = make_dft_basis_t()     # built once at import (hoisted)
_FB_T_NP = make_mel_filterbank_t()


# --- Pallas kernel -------------------------------------------------------------
def mel_kernel(hops_hbm, basis_ref, fb_ref, inv_norms_ref, out_ref,
               win_ref, sem_ref):
    b = pl.program_id(0)
    t = pl.program_id(1)
    n_tiles = pl.num_programs(1)
    ft = out_ref.shape[2]            # frame tile (static)
    win_hops = win_ref.shape[1]      # ft + 8 hops (static, covers ft + 3 needed)

    def window_copy(tile_idx, slot):
        # One contiguous (win_hops * 256)-sample audio window for frame tile.
        return pltpu.make_async_copy(
            hops_hbm.at[b, pl.ds(tile_idx * ft, win_hops), :],
            win_ref.at[slot],
            sem_ref.at[slot])

    slot = lax.rem(t, 2)

    # First tile of this clip on this core: nobody prefetched it -> fetch now.
    @pl.when(t == 0)
    def _():
        window_copy(0, 0).start()

    # Wait for this tile's audio window.
    window_copy(t, slot).wait()

    # Prefetch the next tile's window into the other slot (t axis is
    # "arbitrary" -> strictly sequential, so this is always the next step).
    @pl.when(t + 1 < n_tiles)
    def _():
        window_copy(t + 1, lax.rem(t + 1, 2)).start()

    # Assemble overlapping frames from 4 hop-shifted views of the window:
    # frame f = hops [f, f+1, f+2, f+3] lane-concatenated (n_fft = 4*hop).
    window = win_ref[slot]                                          # (ft+8, 256) f32
    frames = jnp.concatenate(
        [window[j:j + ft, :].astype(jnp.bfloat16)
         for j in range(HOPS_PER_FRAME)],
        axis=1)                                                     # (ft, 1024) bf16

    # Windowed real DFT: one bf16 MXU matmul yields [re | im], f32 accumulation.
    reim = jnp.dot(frames, basis_ref[...],
                   preferred_element_type=jnp.float32)              # (ft, 1280) f32
    re = reim[:, :N_FREQS_PAD]                                      # 128-aligned lane slices
    im = reim[:, N_FREQS_PAD:]
    power = (re * re + im * im).astype(jnp.bfloat16)                # (ft, 640) power=2

    # Mel projection directly in (mel, frame) orientation: contract the last
    # dim of both operands (the well-supported "NT" MXU pattern) -> (80, ft).
    mel = lax.dot_general(fb_ref[...], power,
                          dimension_numbers=(((1,), (1,)), ((), ())),
                          preferred_element_type=jnp.float32)       # (80, ft) f32

    # clamp/log/normalize, lane-dense store.
    out_ref[0] = jnp.log(jnp.maximum(mel, 1e-5)) * inv_norms_ref[...]


# --- wrapper -------------------------------------------------------------------
@jax.jit
def torch_mel_spectrogram(audio, mel_norms):
    """audio: (B, T) float32, mel_norms: (N_MELS,) float32
    returns (B, N_MELS, 1 + T // HOP_LENGTH) float32, matching the PyTorch module."""
    B, T = audio.shape
    pad = FILTER_LENGTH // 2
    padded = jnp.pad(audio, ((0, 0), (pad, pad)), mode="reflect")   # center=True

    n_frames = 1 + T // HOP_LENGTH
    frame_tile = min(MAX_FRAME_TILE, ((n_frames + 127) // 128) * 128)
    n_tiles = -(-n_frames // frame_tile)
    n_frames_pad = n_tiles * frame_tile
    win_hops = frame_tile + 8                  # sublane-aligned window (>= ft+3)
    n_hops = n_frames_pad + 8
    needed = n_hops * HOP_LENGTH               # always > T + n_fft
    padded = jnp.pad(padded, ((0, 0), (0, needed - padded.shape[1])))
    hops = padded.reshape(B, n_hops, HOP_LENGTH)   # free reshape, stays f32 in HBM

    basis_t = jnp.asarray(_BASIS_T_NP, dtype=jnp.bfloat16)          # (1024, 1280)
    fb_t = jnp.asarray(_FB_T_NP, dtype=jnp.bfloat16)                # (80, 640)
    inv_norms = (1.0 / mel_norms.astype(jnp.float32)).reshape(N_MELS, 1)

    out = pl.pallas_call(
        mel_kernel,
        out_shape=jax.ShapeDtypeStruct((B, N_MELS, n_frames_pad), jnp.float32),
        grid_spec=pltpu.PrefetchScalarGridSpec(
            num_scalar_prefetch=0,
            grid=(B, n_tiles),
            in_specs=[
                pl.BlockSpec(memory_space=pl.ANY),                      # raw HBM audio hops
                pl.BlockSpec((FILTER_LENGTH, 2 * N_FREQS_PAD), lambda b, t: (0, 0)),
                pl.BlockSpec((N_MELS, N_FREQS_PAD), lambda b, t: (0, 0)),
                pl.BlockSpec((N_MELS, 1), lambda b, t: (0, 0)),
            ],
            out_specs=pl.BlockSpec((1, N_MELS, frame_tile), lambda b, t: (b, 0, t)),
            scratch_shapes=[
                pltpu.VMEM((2, win_hops, HOP_LENGTH), jnp.float32),     # dbl-buffered window
                pltpu.SemaphoreType.DMA((2,)),
            ],
        ),
        compiler_params=pltpu.CompilerParams(
            dimension_semantics=("parallel", "arbitrary")),
    )(hops, basis_t, fb_t, inv_norms)

    # Output is already (B, n_mels, frames): just drop the padded frames.
    return out[:, :, :n_frames]


# --- pure numpy reference (float64, rfft based) --------------------------------
def reference_mel_np(audio, mel_norms):
    audio = np.asarray(audio, np.float64)
    pad = FILTER_LENGTH // 2
    padded = np.pad(audio, ((0, 0), (pad, pad)), mode="reflect")
    n_frames = 1 + audio.shape[1] // HOP_LENGTH
    idx = (np.arange(FILTER_LENGTH)[None, :]
           + HOP_LENGTH * np.arange(n_frames)[:, None])
    frames = padded[:, idx]                                    # (B, F, n_fft)
    n = np.arange(FILTER_LENGTH)
    window = 0.5 - 0.5 * np.cos(2.0 * np.pi * n / WIN_LENGTH)
    spec = np.fft.rfft(frames * window[None, None, :], axis=-1)
    power = np.abs(spec) ** 2                                  # (B, F, 513)
    fb = _FB_T_NP[:, :N_FREQS].astype(np.float64)              # (80, 513)
    mel = np.einsum("mk,btk->bmt", fb, power)
    mel = np.log(np.maximum(mel, 1e-5))
    return mel / np.asarray(mel_norms, np.float64)[None, :, None]


if __name__ == "__main__":
    key = jax.random.PRNGKey(0)
    k_audio, k_norm = jax.random.split(key)

    B, T = 2, 2048                       # small audio, full default STFT params
    audio = jax.random.normal(k_audio, (B, T), dtype=jnp.float32) * 0.1
    # TODO(synk): mel_norms come from ../data/mel_norms.pth in the original
    # module; replaced by a deterministic synthetic vector of the same shape.
    mel_norms = jax.random.uniform(k_norm, (N_MELS,), minval=0.5, maxval=2.0,
                                   dtype=jnp.float32)

    out = torch_mel_spectrogram(audio, mel_norms)
    out = jax.block_until_ready(out)

    expected_frames = 1 + T // HOP_LENGTH
    assert out.shape == (B, N_MELS, expected_frames), out.shape
    assert out.dtype == jnp.float32
    assert bool(jnp.all(jnp.isfinite(out)))

    # Numerical parity vs a float64 rfft reference (bf16 MXU path -> small diffs).
    ref = reference_mel_np(np.asarray(audio), np.asarray(mel_norms))
    mean_err = float(np.mean(np.abs(np.asarray(out, np.float64) - ref)))
    assert mean_err < 0.08, mean_err

    print("KERNEL_OK")
</pallas_src>

<mosaic_0001>
module attributes {stable_mosaic.version = 11 : i64} {
  func.func @mel_kernel(%arg0: i32, %arg1: i32, %arg2: memref<2x136x256xf32, #tpu.memory_space<any>>, %arg3: memref<1024x1280xbf16, #tpu.memory_space<vmem>>, %arg4: memref<80x640xbf16, #tpu.memory_space<vmem>>, %arg5: memref<80x1xf32, #tpu.memory_space<vmem>>, %arg6: memref<1x80x128xf32, #tpu.memory_space<vmem>>, %arg7: memref<2x136x256xf32, #tpu.memory_space<vmem>>, %arg8: memref<2x!tpu.dma_semaphore, #tpu.memory_space<semaphore_mem>>) attributes {dimension_semantics = [#tpu.dimension_semantics<parallel>, #tpu.dimension_semantics<arbitrary>], iteration_bounds = array<i64: 2, 1>, scalar_prefetch = 0 : i64, scratch_operands = 2 : i64, tpu.core_type = #tpu.core_type<tc>, window_params = [{}, {pipeline_mode = #tpu.pipeline_mode<synchronous>, transform_indices = @transform_1, window_bounds = array<i64: 1024, 1280>}, {pipeline_mode = #tpu.pipeline_mode<synchronous>, transform_indices = @transform_2, window_bounds = array<i64: 80, 640>}, {pipeline_mode = #tpu.pipeline_mode<synchronous>, transform_indices = @transform_3, window_bounds = array<i64: 80, 1>}, {transform_indices = @transform_4, window_bounds = array<i64: 1, 80, 128>}]} {
    %c2_i32 = arith.constant 2 : i32
    %0 = arith.remsi %arg1, %c2_i32 : i32
    %c0_i32 = arith.constant 0 : i32
    %1 = arith.cmpi eq, %arg1, %c0_i32 : i32
    %2 = arith.extui %1 : i1 to i32
    %c0_i32_0 = arith.constant 0 : i32
    %3 = arith.cmpi ne, %2, %c0_i32_0 : i32
    scf.if %3 {
      %c0_i32_18 = arith.constant 0 : i32
      %c0_i32_19 = arith.constant 0 : i32
      %c0_i32_20 = arith.constant 0 : i32
      %c0_i32_21 = arith.constant 0 : i32
      %46 = tpu.memref_slice %arg2[%arg0, %c0_i32_20, %c0_i32_21] : memref<2x136x256xf32, #tpu.memory_space<any>> -> memref<1x136x256xf32, #tpu.memory_space<any>>
      %47 = tpu.memref_squeeze %46 : memref<1x136x256xf32, #tpu.memory_space<any>> -> memref<136x256xf32, #tpu.memory_space<any>>
      %c0_i32_22 = arith.constant 0 : i32
      %c0_i32_23 = arith.constant 0 : i32
      %48 = tpu.memref_slice %arg7[%c0_i32_18, %c0_i32_22, %c0_i32_23] : memref<2x136x256xf32, #tpu.memory_space<vmem>> -> memref<1x136x256xf32, #tpu.memory_space<vmem>>
      %49 = tpu.memref_squeeze %48 : memref<1x136x256xf32, #tpu.memory_space<vmem>> -> memref<136x256xf32, #tpu.memory_space<vmem>>
      %50 = tpu.memref_slice %arg8[%c0_i32_19] : memref<2x!tpu.dma_semaphore, #tpu.memory_space<semaphore_mem>> -> memref<1x!tpu.dma_semaphore, #tpu.memory_space<semaphore_mem>>
      %51 = tpu.memref_squeeze %50 : memref<1x!tpu.dma_semaphore, #tpu.memory_space<semaphore_mem>> -> memref<!tpu.dma_semaphore, #tpu.memory_space<semaphore_mem>>
      tpu.enqueue_dma source(%47 : memref<136x256xf32, #tpu.memory_space<any>>) target(%49 : memref<136x256xf32, #tpu.memory_space<vmem>>) target_semaphore(%51 : memref<!tpu.dma_semaphore, #tpu.memory_space<semaphore_mem>>)
    } else {
    }
    %c128_i32 = arith.constant 128 : i32
    %4 = arith.muli %arg1, %c128_i32 : i32
    %c0_i32_1 = arith.constant 0 : i32
    %5 = tpu.memref_slice %arg2[%arg0, %4, %c0_i32_1] : memref<2x136x256xf32, #tpu.memory_space<any>> -> memref<1x136x256xf32, #tpu.memory_space<any>>
    %6 = tpu.memref_squeeze %5 : memref<1x136x256xf32, #tpu.memory_space<any>> -> memref<136x256xf32, #tpu.memory_space<any>>
    %c0_i32_2 = arith.constant 0 : i32
    %c0_i32_3 = arith.constant 0 : i32
    %7 = tpu.memref_slice %arg7[%0, %c0_i32_2, %c0_i32_3] : memref<2x136x256xf32, #tpu.memory_space<vmem>> -> memref<1x136x256xf32, #tpu.memory_space<vmem>>
    %8 = tpu.memref_squeeze %7 : memref<1x136x256xf32, #tpu.memory_space<vmem>> -> memref<136x256xf32, #tpu.memory_space<vmem>>
    %9 = tpu.memref_slice %arg8[%0] : memref<2x!tpu.dma_semaphore, #tpu.memory_space<semaphore_mem>> -> memref<1x!tpu.dma_semaphore, #tpu.memory_space<semaphore_mem>>
    %10 = tpu.memref_squeeze %9 : memref<1x!tpu.dma_semaphore, #tpu.memory_space<semaphore_mem>> -> memref<!tpu.dma_semaphore, #tpu.memory_space<semaphore_mem>>
    tpu.wait_dma2 semaphore(%10 : memref<!tpu.dma_semaphore, #tpu.memory_space<semaphore_mem>>) src(%6 : memref<136x256xf32, #tpu.memory_space<any>>) dst(%8 : memref<136x256xf32, #tpu.memory_space<vmem>>)
    %c1_i32 = arith.constant 1 : i32
    %11 = arith.addi %arg1, %c1_i32 : i32
    %c1_i32_4 = arith.constant 1 : i32
    %12 = arith.cmpi slt, %11, %c1_i32_4 : i32
    %13 = arith.extui %12 : i1 to i32
    %c0_i32_5 = arith.constant 0 : i32
    %14 = arith.cmpi ne, %13, %c0_i32_5 : i32
    scf.if %14 {
      %c1_i32_18 = arith.constant 1 : i32
      %46 = arith.addi %arg1, %c1_i32_18 : i32
      %c1_i32_19 = arith.constant 1 : i32
      %47 = arith.addi %arg1, %c1_i32_19 : i32
      %c2_i32_20 = arith.constant 2 : i32
      %48 = arith.remsi %47, %c2_i32_20 : i32
      %c128_i32_21 = arith.constant 128 : i32
      %49 = arith.muli %46, %c128_i32_21 : i32
      %c0_i32_22 = arith.constant 0 : i32
      %50 = tpu.memref_slice %arg2[%arg0, %49, %c0_i32_22] : memref<2x136x256xf32, #tpu.memory_space<any>> -> memref<1x136x256xf32, #tpu.memory_space<any>>
      %51 = tpu.memref_squeeze %50 : memref<1x136x256xf32, #tpu.memory_space<any>> -> memref<136x256xf32, #tpu.memory_space<any>>
      %c0_i32_23 = arith.constant 0 : i32
      %c0_i32_24 = arith.constant 0 : i32
      %52 = tpu.memref_slice %arg7[%48, %c0_i32_23, %c0_i32_24] : memref<2x136x256xf32, #tpu.memory_space<vmem>> -> memref<1x136x256xf32, #tpu.memory_space<vmem>>
      %53 = tpu.memref_squeeze %52 : memref<1x136x256xf32, #tpu.memory_space<vmem>> -> memref<136x256xf32, #tpu.memory_space<vmem>>
      %54 = tpu.memref_slice %arg8[%48] : memref<2x!tpu.dma_semaphore, #tpu.memory_space<semaphore_mem>> -> memref<1x!tpu.dma_semaphore, #tpu.memory_space<semaphore_mem>>
      %55 = tpu.memref_squeeze %54 : memref<1x!tpu.dma_semaphore, #tpu.memory_space<semaphore_mem>> -> memref<!tpu.dma_semaphore, #tpu.memory_space<semaphore_mem>>
      tpu.enqueue_dma source(%51 : memref<136x256xf32, #tpu.memory_space<any>>) target(%53 : memref<136x256xf32, #tpu.memory_space<vmem>>) target_semaphore(%55 : memref<!tpu.dma_semaphore, #tpu.memory_space<semaphore_mem>>)
    } else {
    }
    %15 = arith.index_cast %0 : i32 to index
    %c0 = arith.constant 0 : index
    %c0_6 = arith.constant 0 : index
    %16 = vector.load %arg7[%15, %c0, %c0_6] : memref<2x136x256xf32, #tpu.memory_space<vmem>>, vector<1x136x256xf32>
    %17 = vector.shape_cast %16 : vector<1x136x256xf32> to vector<136x256xf32>
    %18 = vector.extract_strided_slice %17 {offsets = [0, 0], sizes = [128, 256], strides = [1, 1]} : vector<136x256xf32> to vector<128x256xf32>
    %19 = arith.truncf %18 : vector<128x256xf32> to vector<128x256xbf16>
    %20 = vector.extract_strided_slice %17 {offsets = [1, 0], sizes = [128, 256], strides = [1, 1]} : vector<136x256xf32> to vector<128x256xf32>
    %21 = arith.truncf %20 : vector<128x256xf32> to vector<128x256xbf16>
    %22 = vector.extract_strided_slice %17 {offsets = [2, 0], sizes = [128, 256], strides = [1, 1]} : vector<136x256xf32> to vector<128x256xf32>
    %23 = arith.truncf %22 : vector<128x256xf32> to vector<128x256xbf16>
    %24 = vector.extract_strided_slice %17 {offsets = [3, 0], sizes = [128, 256], strides = [1, 1]} : vector<136x256xf32> to vector<128x256xf32>
    %25 = arith.truncf %24 : vector<128x256xf32> to vector<128x256xbf16>
    %26 = tpu.concatenate %19, %21, %23, %25 in 1 : vector<128x256xbf16>, vector<128x256xbf16>, vector<128x256xbf16>, vector<128x256xbf16> -> vector<128x1024xbf16>
    %c0_7 = arith.constant 0 : index
    %c0_8 = arith.constant 0 : index
    %27 = vector.load %arg3[%c0_7, %c0_8] : memref<1024x1280xbf16, #tpu.memory_space<vmem>>, vector<1024x1280xbf16>
    %cst = arith.constant dense<0.000000e+00> : vector<128x1280xf32>
    %28 = tpu.matmul %26, %27, %cst {dimension_numbers = #tpu.dot_dimension_numbers<[1], [0], [0], [1], [0, 0, 1, 1], [], []>} : vector<128x1024xbf16>, vector<1024x1280xbf16>, vector<128x1280xf32> -> vector<128x1280xf32>
    %29 = vector.extract_strided_slice %28 {offsets = [0, 0], sizes = [128, 640], strides = [1, 1]} : vector<128x1280xf32> to vector<128x640xf32>
    %30 = vector.extract_strided_slice %28 {offsets = [0, 640], sizes = [128, 640], strides = [1, 1]} : vector<128x1280xf32> to vector<128x640xf32>
    %31 = arith.mulf %29, %29 : vector<128x640xf32>
    %32 = arith.mulf %30, %30 : vector<128x640xf32>
    %33 = arith.addf %31, %32 : vector<128x640xf32>
    %34 = arith.truncf %33 : vector<128x640xf32> to vector<128x640xbf16>
    %c0_9 = arith.constant 0 : index
    %c0_10 = arith.constant 0 : index
    %35 = vector.load %arg4[%c0_9, %c0_10] : memref<80x640xbf16, #tpu.memory_space<vmem>>, vector<80x640xbf16>
    %cst_11 = arith.constant dense<0.000000e+00> : vector<80x128xf32>
    %36 = tpu.matmul %35, %34, %cst_11 {dimension_numbers = #tpu.dot_dimension_numbers<[1], [1], [0], [0], [0, 0, 1, 0], [], []>} : vector<80x640xbf16>, vector<128x640xbf16>, vector<80x128xf32> -> vector<80x128xf32>
    %cst_12 = arith.constant 9.99999974E-6 : f32
    %37 = vector.broadcast %cst_12 : f32 to vector<80x128xf32>
    %38 = arith.maximumf %36, %37 : vector<80x128xf32>
    %39 = math.log %38 : vector<80x128xf32>
    %c0_13 = arith.constant 0 : index
    %c0_14 = arith.constant 0 : index
    %40 = vector.load %arg5[%c0_13, %c0_14] : memref<80x1xf32, #tpu.memory_space<vmem>>, vector<80x1xf32>
    %41 = vector.broadcast %40 : vector<80x1xf32> to vector<80x128xf32>
    %42 = arith.mulf %39, %41 : vector<80x128xf32>
    %c0_15 = arith.constant 0 : index
    %c0_16 = arith.constant 0 : index
    %c0_17 = arith.constant 0 : index
    %43 = vector.load %arg6[%c0_15, %c0_16, %c0_17] : memref<1x80x128xf32, #tpu.memory_space<vmem>>, vector<1x80x128xf32>
    %44 = vector.shape_cast %43 : vector<1x80x128xf32> to vector<80x128xf32>
    %45 = vector.shape_cast %42 : vector<80x128xf32> to vector<1x80x128xf32>
    tpu.vector_store %arg6[%c0_15, %c0_16, %c0_17], %45 {strides = array<i32>} : memref<1x80x128xf32, #tpu.memory_space<vmem>>, vector<1x80x128xf32>,
    return
  }
  func.func @transform_1(%arg0: i32, %arg1: i32) -> (i32, i32) {
    %c0_i32 = arith.constant 0 : i32
    %c0_i32_0 = arith.constant 0 : i32
    %c0_i32_1 = arith.constant 0 : i32
    return %c0_i32, %c0_i32_0 : i32, i32
  }
  func.func @transform_2(%arg0: i32, %arg1: i32) -> (i32, i32) {
    %c0_i32 = arith.constant 0 : i32
    %c0_i32_0 = arith.constant 0 : i32
    %c0_i32_1 = arith.constant 0 : i32
    return %c0_i32, %c0_i32_0 : i32, i32
  }
  func.func @transform_3(%arg0: i32, %arg1: i32) -> (i32, i32) {
    %c0_i32 = arith.constant 0 : i32
    %c0_i32_0 = arith.constant 0 : i32
    %c0_i32_1 = arith.constant 0 : i32
    return %c0_i32, %c0_i32_0 : i32, i32
  }
  func.func @transform_4(%arg0: i32, %arg1: i32) -> (i32, i32, i32) {
    %c0_i32 = arith.constant 0 : i32
    %c0_i32_0 = arith.constant 0 : i32
    return %arg0, %c0_i32, %arg1 : i32, i32, i32
  }
}

</mosaic_0001>

<bundles_post_ra>
// kernel: torch_mel_spectrogram.1
= control target key start
LH: loop header
LB: loop body
LE: loop exit
PB: predicated region body
PF: predicated region fallthrough
CT: control target
= control target key end

     0   :  { %s10168_s15 = smov 0   ;;  %s10170_s16 = smov 0   ;;  %s13668_s0 = inlined_call_operand.vmem [shape: f32[2,136,256], index: 0, kind: input, shape index: {}]   ;;  %s13669_s1 = inlined_call_operand.vmem [shape: bf16[1024,1280], index: 1, kind: input, shape index: {}]   ;;  %s13670_s2 = inlined_call_operand.vmem [shape: bf16[80,640], index: 2, kind: input, shape index: {}]   ;;  %s13671_s3 = inlined_call_operand.vmem [shape: f32[80,1], index: 3, kind: input, shape index: {}]   ;;  %s13672_s4 = inlined_call_operand.vmem [shape: f32[2,80,128], index: 4, kind: output, shape index: {}]  }
   0x1   :  { %s10172_s17 = smov 0  }
   0x2 LB: > { %s26_s18 = sadd.s32 1, %s10134_s16  ;;  %p7777_p0 = scmp.ge.s32.totalorder %s10138_s17, 1  ;;  %s10138_s17 = sphi %s10172_s17, %s14_s17   ;;  %s10134_s16 = sphi %s10170_s16, %s14027_s16   ;;  %s10130_s15 = sphi %s10168_s15, %s14026_s15  }
   0x3   : > { %p28_p1 = scmp.ge.s32.totalorder %s26_s18, 2  ;;  %p142_p2 = scmp.lt.s32.totalorder %s10138_s17, 3 }
   0x5   : > { %s14029_s18 = smov (%p28_p1, %s26_s18), 0  ;;  %p143_p3 = pnand %p7777_p0, %p142_p2 }
   0x7   : > { %146 = sbr.rel (%p143_p3) target bundleno = 1333 (0x535), region = 32 }
   0xe   : > { %p164_p4 = scmp.lt.s32.totalorder %s10130_s15, 1  ;;  %s8485_s19 = smul.u32 272, %s10130_s15 }
  0x10   : > { %s14031_s15 = smov (!%p164_p4, %s10130_s15), 1  ;;  %s10189_s22 = scalar_lea.vmem %s13668_s0, %s8485_s19 }
  0x11   : > { %s9069_s23 = smul.u32 80, %s14031_s15  ;;  %v10192_v0 = vld [vmem:[%s10189_s22] sm:$0xff]  ;;  %v220_v1 = vld [vmem:[%s10189_s22 + $0x8] sm:$0xff]  ;;  %v10196_v2 = vld [vmem:[%s10189_s22 + $0x10] sm:$0xff] }
  0x12   : > { %v224_v3 = vld [vmem:[%s10189_s22 + $0x18] sm:$0xff]  ;;  %v10200_v4 = vld [vmem:[%s10189_s22 + $0x20] sm:$0xff]  ;;  %v228_v5 = vld [vmem:[%s10189_s22 + $0x28] sm:$0xff] }
  0x13   : > { %s10206_s26 = scalar_lea.vmem %s13672_s4, %s9069_s23  ;;  %v10209_v6 = vld [vmem:[%s10189_s22 + $0x30] sm:$0xff]  ;;  %v232_v7 = vld [vmem:[%s10189_s22 + $0x38] sm:$0xff]  ;;  %v10213_v8 = vld [vmem:[%s10189_s22 + $0x40] sm:$0xff] }
  0x14   : > { %v236_v9 = vld [vmem:[%s10189_s22 + $0x48] sm:$0xff]  ;;  %v10217_v10 = vld [vmem:[%s10189_s22 + $0x50] sm:$0xff]  ;;  %v240_v11 = vld [vmem:[%s10189_s22 + $0x58] sm:$0xff] }
  0x15   : > { %v10221_v12 = vld [vmem:[%s10189_s22 + $0x60] sm:$0xff]  ;;  %v10224_v13 = vld [vmem:[%s10189_s22 + $0x68] sm:$0xff]  ;;  %v10227_v14 = vld [vmem:[%s10189_s22 + $0x70] sm:$0xff] }
  0x16   : > { %v10230_v15 = vld [vmem:[%s10189_s22 + $0x78] sm:$0xff]  ;;  %v10233_v16 = vld [vmem:[%s10189_s22 + $0x80] sm:$0xff]  ;;  %v10236_v17 = vld [vmem:[%s10189_s22 + $0x88] sm:$0xff] }
  0x17   : > { %v10239_v18 = vld [vmem:[%s10189_s22 + $0x90] sm:$0xff]  ;;  %v10242_v19 = vld [vmem:[%s10189_s22 + $0x98] sm:$0xff]  ;;  %v10245_v20 = vld [vmem:[%s10189_s22 + $0xa0] sm:$0xff] }
  0x18   : > { %v10248_v21 = vld [vmem:[%s10189_s22 + $0xa8] sm:$0xff]  ;;  %v10251_v22 = vld [vmem:[%s10189_s22 + $0xb0] sm:$0xff]  ;;  %v10254_v23 = vld [vmem:[%s10189_s22 + $0xb8] sm:$0xff] }
  0x19   : > { %v10257_v24 = vld [vmem:[%s10189_s22 + $0xc0] sm:$0xff]  ;;  %v10260_v25 = vld [vmem:[%s10189_s22 + $0xc8] sm:$0xff]  ;;  %v10263_v26 = vld [vmem:[%s10189_s22 + $0xd0] sm:$0xff] }
  0x1a   : > { %v10266_v27 = vld [vmem:[%s10189_s22 + $0xd8] sm:$0xff]  ;;  %v10269_v28 = vld [vmem:[%s10189_s22 + $0xe0] sm:$0xff]  ;;  %v10272_v29 = vld [vmem:[%s10189_s22 + $0xe8] sm:$0xff] }
  0x1b   : > { %v10275_v30 = vld [vmem:[%s10189_s22 + $0xf0] sm:$0xff]  ;;  %v10278_v31 = vld [vmem:[%s10189_s22 + $0xf8] sm:$0xff]  ;;  %v10281_v32 = vld [vmem:[%s10189_s22 + $0x100] sm:$0xff] }
  0x1c   : > { %v10284_v33 = vld [vmem:[%s10189_s22 + $0x108] sm:$0xff] }
  0x1d   : > { %293 = vsyncadd [#allocation3], 4352 }
  0x1e   : > { %10126 = dma.done.wait [#allocation3], 4352 }
  0x1f   : > { %10127 = vsyncadd [#allocation3], 4294962944  ;;  %v10286_v34 = vpack.c.bf16 %v224_v3, %v220_v1  ;;  %v10288_v35 = vpack.c.bf16 %v232_v7, %v228_v5  ;;  %v10290_v36 = vpack.c.bf16 %v240_v11, %v236_v9  ;;  %vm485_vm0 = vsmask.f32 7424  ;;  %v9099_v47 = vld [vmem:[%s13669_s1 + $0x4] ss:$40 sps:$4 sm:$0xff]  }
  0x20   : > { %v9101_v48 = vld [vmem:[%s13669_s1 + $0x504] ss:$40 sps:$4 sm:$0xff]   ;;  %4638 = vmatprep.subr.bf16.mxu1 %v9099_v47  ;;  %v9103_v51 = vld [vmem:[%s13669_s1] ss:$40 sps:$4 sm:$0xff]   ;;  %v9105_v53 = vld [vmem:[%s13669_s1 + $0x54] ss:$40 sps:$4 sm:$0xff]  }
  0x21   : > { %4670 = vmatprep.mubr.bf16.mxu1 %v10286_v34  ;;  %v499_v37 = vshrl.u32 %v10286_v34, 16  ;;  %v501_v38 = vshll.u32 %v10286_v34, 16  ;;  %v506_v39 = vshll.u32 %v10288_v35, 16  ;;  %v518_v40 = vshrl.u32 %v10288_v35, 16  ;;  %v9104_v52 = vld [vmem:[%s13669_s1 + $0x500] ss:$40 sps:$4 sm:$0xff]   ;;  %4751 = vmatprep.subr.bf16.mxu0 %v9101_v48 }
  0x22   : > { %v13697_v41 = vshll.u32 %v10290_v36, 16  ;;  %4639 = vmatpush1.bf16.msra.mxu1 %v9103_v51  ;;  %4752 = vmatpush1.bf16.msra.mxu0 %v9104_v52  ;;  %v9107_v54 = vld [vmem:[%s13669_s1 + $0x554] ss:$40 sps:$4 sm:$0xff]   ;;  %v9109_v55 = vld [vmem:[%s13669_s1 + $0x50] ss:$40 sps:$4 sm:$0xff]   ;;  %vm656_vm2 = vcmask 1046528  }
  0x23   : > { %v503_v42 = vrot.slane %v501_v38, 1  ;;  %v508_v43 = vrot.slane %v506_v39, 1  ;;  %4640 = vmatprep.subr.bf16.mxu1 %v9105_v53  ;;  %v9110_v56 = vld [vmem:[%s13669_s1 + $0x550] ss:$40 sps:$4 sm:$0xff]   ;;  %4753 = vmatprep.subr.bf16.mxu0 %v9107_v54  ;;  %v9111_v57 = vld [vmem:[%s13669_s1 + $0xa4] ss:$40 sps:$4 sm:$0xff]  }
  0x24   : > { %v10304_v44 = vrot.slane %v13697_v41, 1  ;;  %v9113_v58 = vld [vmem:[%s13669_s1 + $0x5a4] ss:$40 sps:$4 sm:$0xff]   ;;  %v9115_v59 = vld [vmem:[%s13669_s1 + $0xa0] ss:$40 sps:$4 sm:$0xff]   ;;  %vm10141_vm3 = vmmov 0  }
  0x25   : > { %v504_v45 = vor.u32 %v503_v42, %v499_v37  ;;  %v520_v46 = vor.u32 %v518_v40, %v508_v43  ;;  %v9116_v60 = vld [vmem:[%s13669_s1 + $0x5a0] ss:$40 sps:$4 sm:$0xff]   ;;  %v9117_v61 = vld [vmem:[%s13669_s1 + $0xf4] ss:$40 sps:$4 sm:$0xff]   ;;  %v9121_v63 = vld [vmem:[%s13669_s1 + $0xf0] ss:$40 sps:$4 sm:$0xff]  }
  0x26   : > { %4641 = vmatpush1.bf16.msra.mxu1 %v9109_v55  ;;  %4754 = vmatpush1.bf16.msra.mxu0 %v9110_v56  ;;  %v9119_v62 = vld [vmem:[%s13669_s1 + $0x5f4] ss:$40 sps:$4 sm:$0xff]   ;;  %v9122_v1 = vld [vmem:[%s13669_s1 + $0x5f0] ss:$40 sps:$4 sm:$0xff]   ;;  %v9123_v3 = vld [vmem:[%s13669_s1 + $0x144] ss:$40 sps:$4 sm:$0xff]  }
  0x27   : > { %v10317_v49 = vsel %vm485_vm0, %v504_v45, %v508_v43  ;;  %v10321_v50 = vsel %vm485_vm0, %v520_v46, %v10304_v44  ;;  %4642 = vmatprep.subr.bf16.mxu1 %v9111_v57  ;;  %4755 = vmatprep.subr.bf16.mxu0 %v9113_v58  ;;  %v9125_v5 = vld [vmem:[%s13669_s1 + $0x644] ss:$40 sps:$4 sm:$0xff]   ;;  %v9127_v7 = vld [vmem:[%s13669_s1 + $0x140] ss:$40 sps:$4 sm:$0xff]   ;;  %v9129_v11 = vld [vmem:[%s13669_s1 + $0x194] ss:$40 sps:$4 sm:$0xff]  }
  0x28   : > { %13774 = vst [vmem:[#allocation7_spill] sm:$0xff] %v10317_v49  ;;  %13775 = vst [vmem:[#allocation8_spill] sm:$0xff] %v10321_v50  ;;  %4783 = vmatprep.mubr.bf16.mxu0 %v10317_v49  ;;  %v9128_v9 = vld [vmem:[%s13669_s1 + $0x640] ss:$40 sps:$4 sm:$0xff]   ;;  %v9131_v42 = vld [vmem:[%s13669_s1 + $0x694] ss:$40 sps:$4 sm:$0xff]  }
  0x29   : > { %v9133_v43 = vld [vmem:[%s13669_s1 + $0x190] ss:$40 sps:$4 sm:$0xff]   ;;  %v9135_v46 = vld [vmem:[%s13669_s1 + $0x1e4] ss:$40 sps:$4 sm:$0xff]   ;;  %v9139_v48 = vld [vmem:[%s13669_s1 + $0x1e0] ss:$40 sps:$4 sm:$0xff]  }
  0x2a   : > { %4643 = vmatpush1.bf16.msra.mxu1 %v9115_v59  ;;  %4756 = vmatpush1.bf16.msra.mxu0 %v9116_v60  ;;  %v9134_v45 = vld [vmem:[%s13669_s1 + $0x690] ss:$40 sps:$4 sm:$0xff]   ;;  %v9137_v47 = vld [vmem:[%s13669_s1 + $0x6e4] ss:$40 sps:$4 sm:$0xff]   ;;  %v9140_v51 = vld [vmem:[%s13669_s1 + $0x6e0] ss:$40 sps:$4 sm:$0xff]  }
  0x2b   : > { %4644 = vmatprep.subr.bf16.mxu1 %v9117_v61  ;;  %4757 = vmatprep.subr.bf16.mxu0 %v9119_v62  ;;  %v9141_v52 = vld [vmem:[%s13669_s1 + $0x234] ss:$40 sps:$4 sm:$0xff]   ;;  %v9145_v54 = vld [vmem:[%s13669_s1 + $0x230] ss:$40 sps:$4 sm:$0xff]   ;;  %v9147_v56 = vld [vmem:[%s13669_s1 + $0x284] ss:$40 sps:$4 sm:$0xff]  }
  0x2c   : > { %v9143_v53 = vld [vmem:[%s13669_s1 + $0x734] ss:$40 sps:$4 sm:$0xff]   ;;  %v9146_v55 = vld [vmem:[%s13669_s1 + $0x730] ss:$40 sps:$4 sm:$0xff]   ;;  %v9149_v57 = vld [vmem:[%s13669_s1 + $0x784] ss:$40 sps:$4 sm:$0xff]  }
  0x2d   : > { %v9151_v58 = vld [vmem:[%s13669_s1 + $0x280] ss:$40 sps:$4 sm:$0xff]   ;;  %v9153_v60 = vld [vmem:[%s13669_s1 + $0x2d4] ss:$40 sps:$4 sm:$0xff]   ;;  %v9157_v62 = vld [vmem:[%s13669_s1 + $0x2d0] ss:$40 sps:$4 sm:$0xff]  }
  0x2e   : > { %4645 = vmatpush1.bf16.msra.mxu1 %v9121_v63  ;;  %4758 = vmatpush1.bf16.msra.mxu0 %v9122_v1  ;;  %v9152_v59 = vld [vmem:[%s13669_s1 + $0x780] ss:$40 sps:$4 sm:$0xff]   ;;  %v9155_v61 = vld [vmem:[%s13669_s1 + $0x7d4] ss:$40 sps:$4 sm:$0xff]   ;;  %v9158_v63 = vld [vmem:[%s13669_s1 + $0x7d0] ss:$40 sps:$4 sm:$0xff]  }
  0x2f   : > { %4646 = vmatprep.subr.bf16.mxu1 %v9123_v3  ;;  %4759 = vmatprep.subr.bf16.mxu0 %v9125_v5  ;;  %v9159_v1 = vld [vmem:[%s13669_s1 + $0x324] ss:$40 sps:$4 sm:$0xff]   ;;  %v9163_v5 = vld [vmem:[%s13669_s1 + $0x320] ss:$40 sps:$4 sm:$0xff]   ;;  %vm707_vm1 = vsmask.f32 6400 }
  0x30   : > { %v9161_v3 = vld [vmem:[%s13669_s1 + $0x824] ss:$40 sps:$4 sm:$0xff]  }
  0x31   : > { %v9356_v41 = vld [vmem:[%s13669_s1 + $0x82c] ss:$40 sps:$4 sm:$0xff]  }
  0x32   : > { %4647 = vmatpush1.bf16.msra.mxu1 %v9127_v7  ;;  %4760 = vmatpush1.bf16.msra.mxu0 %v9128_v9  ;;  %v9164_v7 = vld [vmem:[%s13669_s1 + $0x820] ss:$40 sps:$4 sm:$0xff]   ;;  %v9165_v9 = vld [vmem:[%s13669_s1 + $0x374] ss:$40 sps:$4 sm:$0xff]  }
  0x33   : > { %4648 = vmatprep.subr.bf16.mxu1 %v9129_v11  ;;  %4761 = vmatprep.subr.bf16.mxu0 %v9131_v42  ;;  %v9167_v11 = vld [vmem:[%s13669_s1 + $0x874] ss:$40 sps:$4 sm:$0xff]   ;;  %v9169_v42 = vld [vmem:[%s13669_s1 + $0x370] ss:$40 sps:$4 sm:$0xff]  }
  0x36   : > { %4649 = vmatpush1.bf16.msra.mxu1 %v9133_v43  ;;  %4762 = vmatpush1.bf16.msra.mxu0 %v9134_v45  ;;  %v9170_v43 = vld [vmem:[%s13669_s1 + $0x870] ss:$40 sps:$4 sm:$0xff]   ;;  %v9171_v45 = vld [vmem:[%s13669_s1 + $0x3c4] ss:$40 sps:$4 sm:$0xff]  }
  0x37   : > { %4650 = vmatprep.subr.bf16.mxu1 %v9135_v46  ;;  %4763 = vmatprep.subr.bf16.mxu0 %v9137_v47  ;;  %v9173_v46 = vld [vmem:[%s13669_s1 + $0x8c4] ss:$40 sps:$4 sm:$0xff]   ;;  %v9175_v47 = vld [vmem:[%s13669_s1 + $0x3c0] ss:$40 sps:$4 sm:$0xff]  }
  0x3a   : > { %4651 = vmatpush1.bf16.msra.mxu1 %v9139_v48  ;;  %4764 = vmatpush1.bf16.msra.mxu0 %v9140_v51  ;;  %v9176_v48 = vld [vmem:[%s13669_s1 + $0x8c0] ss:$40 sps:$4 sm:$0xff]   ;;  %v9177_v51 = vld [vmem:[%s13669_s1 + $0x414] ss:$40 sps:$4 sm:$0xff]  }
  0x3b   : > { %4652 = vmatprep.subr.bf16.mxu1 %v9141_v52  ;;  %4765 = vmatprep.subr.bf16.mxu0 %v9143_v53  ;;  %v10479_v52 = vpack.c.bf16 %v10196_v2, %v10192_v0  ;;  %v9179_v53 = vld [vmem:[%s13669_s1 + $0x914] ss:$40 sps:$4 sm:$0xff]   ;;  %v9183_v0 = vld [vmem:[%s13669_s1 + $0x464] ss:$40 sps:$4 sm:$0xff]   ;;  %v10495_v2 = vpack.c.bf16 %v10209_v6, %v10200_v4 }
  0x3c   : > { %v9189_v4 = vld [vmem:[%s13669_s1 + $0x4b4] ss:$40 sps:$4 sm:$0xff]  }
  0x3e   : > { %4653 = vmatpush1.bf16.msra.mxu1 %v9145_v54  ;;  %4766 = vmatpush1.bf16.msra.mxu0 %v9146_v55  ;;  %v9181_v54 = vld [vmem:[%s13669_s1 + $0x410] ss:$40 sps:$4 sm:$0xff]  }
  0x3f   : > { %4654 = vmatprep.subr.bf16.mxu1 %v9147_v56  ;;  %4767 = vmatprep.subr.bf16.mxu0 %v9149_v57  ;;  %v9182_v55 = vld [vmem:[%s13669_s1 + $0x910] ss:$40 sps:$4 sm:$0xff]   ;;  %v13701_v56 = vshll.u32 %v10479_v52, 16  ;;  %v9185_v57 = vld [vmem:[%s13669_s1 + $0x964] ss:$40 sps:$4 sm:$0xff]  }
  0x41   : > { %v491_v6 = vrot.slane %v13701_v56, 1  ;;  %v9380_v56 = vld [vmem:[%s13669_s1 + $0x96c] ss:$40 sps:$4 sm:$0xff]  }
  0x42   : > { %4655 = vmatpush1.bf16.msra.mxu1 %v9151_v58  ;;  %4768 = vmatpush1.bf16.msra.mxu0 %v9152_v59  ;;  %v9187_v58 = vld [vmem:[%s13669_s1 + $0x460] ss:$40 sps:$4 sm:$0xff]  }
  0x43   : > { %4656 = vmatprep.subr.bf16.mxu1 %v9153_v60  ;;  %4769 = vmatprep.subr.bf16.mxu0 %v9155_v61  ;;  %v9188_v59 = vld [vmem:[%s13669_s1 + $0x960] ss:$40 sps:$4 sm:$0xff]   ;;  %v487_v60 = vshrl.u32 %v10479_v52, 16  ;;  %v13699_v61 = vshll.u32 %v10495_v2, 16 }
  0x46   : > { %4657 = vmatpush1.bf16.msra.mxu1 %v9157_v62  ;;  %4770 = vmatpush1.bf16.msra.mxu0 %v9158_v63  ;;  %v9191_v62 = vld [vmem:[%s13669_s1 + $0x9b4] ss:$40 sps:$4 sm:$0xff]   ;;  %v10519_v63 = vpack.c.bf16 %v10217_v10, %v10213_v8  ;;  %v9197_v8 = vld [vmem:[%s13669_s1 + $0xa04] ss:$40 sps:$4 sm:$0xff]  }
  0x47   : > { %4658 = vmatprep.subr.bf16.mxu1 %v9159_v1  ;;  %4771 = vmatprep.subr.bf16.mxu0 %v9161_v3  ;;  %v9193_v1 = vld [vmem:[%s13669_s1 + $0x4b0] ss:$40 sps:$4 sm:$0xff]   ;;  %v9200_v10 = vld [vmem:[%s13669_s1 + $0xc] ss:$40 sps:$4 sm:$0xff]  }
  0x48   : > { %13776 = vst [vmem:[#allocation9_spill] sm:$0xff] %v10519_v63  ;;  %v9194_v3 = vld [vmem:[%s13669_s1 + $0x9b0] ss:$40 sps:$4 sm:$0xff]  }
  0x4a   : > { %4659 = vmatpush1.bf16.msra.mxu1 %v9163_v5  ;;  %4772 = vmatpush1.bf16.msra.mxu0 %v9164_v7  ;;  %v492_v5 = vor.u32 %v491_v6, %v487_v60  ;;  %v496_v7 = vrot.slane %v13699_v61, 1  ;;  %v9212_v6 = vld [vmem:[%s13669_s1 + $0xac] ss:$40 sps:$4 sm:$0xff]  }
  0x4b   : > { %4660 = vmatprep.subr.bf16.mxu1 %v9165_v9  ;;  %4773 = vmatprep.subr.bf16.mxu0 %v9167_v11  ;;  %v715_v9 = vrot.slane %v499_v37, 1  ;;  %v716_v11 = vrot.slane %v501_v38, 2  ;;  %v10553_v37 = vpack.c.bf16 %v10230_v15, %v10224_v13  ;;  %v9206_v13 = vld [vmem:[%s13669_s1 + $0x5c] ss:$40 sps:$4 sm:$0xff]   ;;  %v9368_v61 = vld [vmem:[%s13669_s1 + $0x8cc] ss:$40 sps:$4 sm:$0xff]  }
  0x4d   : > { %13777 = vst [vmem:[#allocation10_spill] sm:$0xff] %v10553_v37  ;;  %v717_v38 = vor.u32 %v716_v11, %v715_v9  ;;  %v9216_v9 = vld [vmem:[%s13669_s1 + $0xf8] ss:$40 sps:$4 sm:$0xff]  }
  0x4e   : > { %4661 = vmatpush1.bf16.msra.mxu1 %v9169_v42  ;;  %4774 = vmatpush1.bf16.msra.mxu0 %v9170_v43  ;;  %v13700_v42 = vshrl.u32 %v10495_v2, 16  ;;  %v13695_v43 = vshll.u32 %v10519_v63, 16 }
  0x4f   : > { %4662 = vmatprep.subr.bf16.mxu1 %v9171_v45  ;;  %4775 = vmatprep.subr.bf16.mxu0 %v9173_v46  ;;  %v718_v45 = vrot.slane %v518_v40, 1  ;;  %v9195_v46 = vld [vmem:[%s13669_s1 + $0xa00] ss:$40 sps:$4 sm:$0xff]   ;;  %v10558_v40 = vsel %vm485_vm0, %v492_v5, %v496_v7 }
  0x50   : > { %13778 = vst [vmem:[#allocation11_spill] sm:$0xff] %v10558_v40 }
  0x52   : > { %4663 = vmatpush1.bf16.msra.mxu1 %v9175_v47  ;;  %4776 = vmatpush1.bf16.msra.mxu0 %v9176_v48  ;;  %v9198_v47 = vld [vmem:[%s13669_s1 + $0x8] ss:$40 sps:$4 sm:$0xff]   ;;  %v719_v48 = vrot.slane %v506_v39, 2  ;;  %v13698_v39 = vshrl.u32 %v10290_v36, 16 }
  0x53   : > { %4664 = vmatprep.subr.bf16.mxu1 %v9177_v51  ;;  %4777 = vmatprep.subr.bf16.mxu0 %v9179_v53  ;;  %v9203_v51 = vld [vmem:[%s13669_s1 + $0xa54] ss:$40 sps:$4 sm:$0xff]   ;;  %v9201_v53 = vld [vmem:[%s13669_s1 + $0xa50] ss:$40 sps:$4 sm:$0xff]  }
  0x54   : > { %v10566_v15 = vor.u32 %v719_v48, %v718_v45  ;;  %v10646_v48 = vpack.c.bf16 %v10239_v18, %v10233_v16 }
  0x56   : > { %4665 = vmatpush1.bf16.msra.mxu1 %v9181_v54  ;;  %4778 = vmatpush1.bf16.msra.mxu0 %v9182_v55  ;;  %v9204_v54 = vld [vmem:[%s13669_s1 + $0x58] ss:$40 sps:$4 sm:$0xff]   ;;  %v13693_v55 = vshll.u32 %v10553_v37, 16  ;;  %13782 = vst [vmem:[#allocation15_spill] sm:$0xff] %v10646_v48 }
  0x57   : > { %4666 = vmatprep.subr.bf16.mxu1 %v9183_v0  ;;  %4779 = vmatprep.subr.bf16.mxu0 %v9185_v57  ;;  %v10580_v0 = vsel %vm707_vm1, %v717_v38, %v10566_v15  ;;  %v512_v57 = vor.u32 %v13700_v42, %v496_v7  ;;  %v9215_v7 = vld [vmem:[%s13669_s1 + $0xaf4] ss:$40 sps:$4 sm:$0xff]   ;;  %v9221_v38 = vld [vmem:[%s13669_s1 + $0xb44] ss:$40 sps:$4 sm:$0xff]  }
  0x58   : > { %13779 = vst [vmem:[#allocation12_spill] sm:$0xff] %v10580_v0  ;;  %v9374_v42 = vld [vmem:[%s13669_s1 + $0x91c] ss:$40 sps:$4 sm:$0xff]  }
  0x5a   : > { %4667 = vmatpush1.bf16.msra.mxu1 %v9187_v58  ;;  %4780 = vmatpush1.bf16.msra.mxu0 %v9188_v59  ;;  %v516_v58 = vrot.slane %v13695_v43, 1  ;;  %v9209_v59 = vld [vmem:[%s13669_s1 + $0xaa4] ss:$40 sps:$4 sm:$0xff]  }
  0x5b   : > { %4668 = vmatprep.subr.bf16.mxu1 %v9189_v4  ;;  %4781 = vmatprep.subr.bf16.mxu0 %v9191_v62  ;;  %v10591_v4 = vpack.c.bf16 %v10227_v14, %v10221_v12  ;;  %v9207_v62 = vld [vmem:[%s13669_s1 + $0xaa0] ss:$40 sps:$4 sm:$0xff]   ;;  %v536_v12 = vor.u32 %v13698_v39, %v10304_v44  ;;  %v540_v14 = vrot.slane %v13693_v55, 1  ;;  %v9332_v55 = vld [vmem:[%s13669_s1 + $0x6ec] ss:$40 sps:$4 sm:$0xff]  }
  0x5c   : > { %v10614_v5 = vsel %vm485_vm0, %v512_v57, %v516_v58  ;;  %v9344_v43 = vld [vmem:[%s13669_s1 + $0x78c] ss:$40 sps:$4 sm:$0xff]   ;;  %v9362_v39 = vld [vmem:[%s13669_s1 + $0x87c] ss:$40 sps:$4 sm:$0xff]  }
  0x5d   : > { %13780 = vst [vmem:[#allocation13_spill] sm:$0xff] %v10614_v5  ;;  %v13691_v44 = vshll.u32 %v10591_v4, 16  ;;  %v10634_v11 = vsel %vm485_vm0, %v536_v12, %v540_v14 }
  0x5e   : > { %4669 = vmatpush1.bf16.msra.mxu1 %v9193_v1  ;;  %4782 = vmatpush1.bf16.msra.mxu0 %v9194_v3  ;;  %v9210_v1 = vld [vmem:[%s13669_s1 + $0xa8] ss:$40 sps:$4 sm:$0xff]   ;;  %v10611_v3 = vpack.c.bf16 %v10242_v19, %v10236_v17  ;;  %v9218_v17 = vld [vmem:[%s13669_s1 + $0xfc] ss:$40 sps:$4 sm:$0xff]   ;;  %v13694_v19 = vshrl.u32 %v10553_v37, 16  ;;  %13781 = vst [vmem:[#allocation14_spill] sm:$0xff] %v10634_v11 }
  0x5f   : > { %4864 = vmatprep.subr.bf16.mxu0 %v9197_v8  ;;  %5090 = vmatprep.subr.bf16.mxu1 %v9200_v10  ;;  %v13696_v8 = vshrl.u32 %v10519_v63, 16  ;;  %v9213_v10 = vld [vmem:[%s13669_s1 + $0xaf0] ss:$40 sps:$4 sm:$0xff]  }
  0x60   : > { %v13689_v45 = vshll.u32 %v10611_v3, 16  ;;  %v552_v16 = vor.u32 %v13694_v19, %v540_v14  ;;  %v9338_v19 = vld [vmem:[%s13669_s1 + $0x73c] ss:$40 sps:$4 sm:$0xff]  }
  0x61   : > { %4671 = vmatmul.mubr.bf16.vlgmr.msra.gmra.mrb[0].mxu1 %v10479_v52  ;;  %4784 = vmatmul.mubr.bf16.vlgmr.msra.gmra.mrb[0].mxu0 %v10558_v40 }
  0x62   : > { %4865 = vmatpush1.bf16.msra.mxu0 %v9195_v46  ;;  %5091 = vmatpush1.bf16.msra.mxu1 %v9198_v47  ;;  %v528_v46 = vor.u32 %v13696_v8, %v516_v58  ;;  %v532_v47 = vrot.slane %v13691_v44, 1  ;;  %v556_v18 = vrot.slane %v13689_v45, 1  ;;  %v9227_v58 = vld [vmem:[%s13669_s1 + $0xb94] ss:$40 sps:$4 sm:$0xff]  }
  0x63   : > { %4866 = vmatprep.subr.bf16.mxu0 %v9203_v51  ;;  %5092 = vmatprep.subr.bf16.mxu1 %v9206_v13  ;;  %v9224_v51 = vld [vmem:[%s13669_s1 + $0x14c] ss:$40 sps:$4 sm:$0xff]   ;;  %v9219_v13 = vld [vmem:[%s13669_s1 + $0xb40] ss:$40 sps:$4 sm:$0xff]   ;;  %v9350_v8 = vld [vmem:[%s13669_s1 + $0x7dc] ss:$40 sps:$4 sm:$0xff]  }
  0x64   : > { %4680 = vmatprep.mubr.bf16.mxu1 %v10288_v35  ;;  %4793 = vmatprep.mubr.bf16.mxu0 %v10321_v50  ;;  %v10668_v57 = vsel %vm485_vm0, %v528_v46, %v532_v47  ;;  %v10688_v12 = vsel %vm485_vm0, %v552_v16, %v556_v18  ;;  %v9236_v46 = vld [vmem:[%s13669_s1 + $0x1ec] ss:$40 sps:$4 sm:$0xff]   ;;  %v13682_v16 = vshrl.u32 %v10646_v48, 16 }
  0x65   : > { %13784 = vst [vmem:[#allocation17_spill] sm:$0xff] %v10668_v57  ;;  %13785 = vst [vmem:[#allocation18_spill] sm:$0xff] %v10688_v12  ;;  %v9308_v45 = vld [vmem:[%s13669_s1 + $0x5ac] ss:$40 sps:$4 sm:$0xff]  }
  0x66   : > { %4867 = vmatpush1.bf16.msra.mxu0 %v9201_v53  ;;  %5093 = vmatpush1.bf16.msra.mxu1 %v9204_v54  ;;  %v9222_v53 = vld [vmem:[%s13669_s1 + $0x148] ss:$40 sps:$4 sm:$0xff]   ;;  %v10665_v54 = vpack.c.bf16 %v10254_v23, %v10248_v21  ;;  %v9230_v21 = vld [vmem:[%s13669_s1 + $0x19c] ss:$40 sps:$4 sm:$0xff]   ;;  %v13690_v23 = vshrl.u32 %v10611_v3, 16 }
  0x67   : > { %4868 = vmatprep.subr.bf16.mxu0 %v9209_v59  ;;  %5094 = vmatprep.subr.bf16.mxu1 %v9212_v6  ;;  %v13692_v59 = vshrl.u32 %v10591_v4, 16  ;;  %v13677_v6 = vshll.u32 %v10646_v48, 16  ;;  %v9320_v44 = vld [vmem:[%s13669_s1 + $0x64c] ss:$40 sps:$4 sm:$0xff]  }
  0x68   : > { %13783 = vst [vmem:[#allocation16_spill] sm:$0xff] %v10665_v54  ;;  %v13673_v14 = vshll.u32 %v10665_v54, 16 }
  0x69   : > { %4681 = vmatmul.mubr.bf16.gmra.mrb[4].mxu1 %v10495_v2  ;;  %4794 = vmatmul.mubr.bf16.gmra.mrb[4].mxu0 %v10614_v5 }
  0x6a   : > { %4869 = vmatpush1.bf16.msra.mxu0 %v9207_v62  ;;  %5095 = vmatpush1.bf16.msra.mxu1 %v9210_v1  ;;  %v9225_v62 = vld [vmem:[%s13669_s1 + $0xb90] ss:$40 sps:$4 sm:$0xff]  }
  0x6b   : > { %4870 = vmatprep.subr.bf16.mxu0 %v9215_v7  ;;  %5096 = vmatprep.subr.bf16.mxu1 %v9218_v17  ;;  %v9228_v1 = vld [vmem:[%s13669_s1 + $0x198] ss:$40 sps:$4 sm:$0xff]   ;;  %v544_v7 = vor.u32 %v13692_v59, %v532_v47  ;;  %v548_v17 = vrot.slane %v13677_v6, 1  ;;  %v10808_v6 = vpack.c.bf16 %v10275_v30, %v10269_v28  ;;  %v9326_v59 = vld [vmem:[%s13669_s1 + $0x69c] ss:$40 sps:$4 sm:$0xff]  }
  0x6c   : > { %4690 = vmatprep.mubr.bf16.mxu1 %v10290_v36  ;;  %4803 = vmatprep.mubr.bf16.mxu0 %v10634_v11  ;;  %v9231_v47 = vld [vmem:[%s13669_s1 + $0xbe0] ss:$40 sps:$4 sm:$0xff]  }
  0x6d   : > { %13794 = vst [vmem:[#allocation27_spill] sm:$0xff] %v10808_v6 }
  0x6e   : > { %4871 = vmatpush1.bf16.msra.mxu0 %v9213_v10  ;;  %5097 = vmatpush1.bf16.msra.mxu1 %v9216_v9  ;;  %v9233_v10 = vld [vmem:[%s13669_s1 + $0xbe4] ss:$40 sps:$4 sm:$0xff]   ;;  %v10700_v9 = vpack.c.bf16 %v10251_v22, %v10245_v20  ;;  %v568_v20 = vor.u32 %v13690_v23, %v556_v18  ;;  %v572_v22 = vrot.slane %v13673_v14, 1  ;;  %v10754_v14 = vpack.c.bf16 %v10263_v26, %v10257_v24 }
  0x6f   : > { %4872 = vmatprep.subr.bf16.mxu0 %v9221_v38  ;;  %5098 = vmatprep.subr.bf16.mxu1 %v9224_v51  ;;  %v9234_v38 = vld [vmem:[%s13669_s1 + $0x1e8] ss:$40 sps:$4 sm:$0xff]   ;;  %v10719_v51 = vpack.c.bf16 %v10266_v27, %v10260_v25  ;;  %v9242_v25 = vld [vmem:[%s13669_s1 + $0x23c] ss:$40 sps:$4 sm:$0xff]   ;;  %v13676_v27 = vshrl.u32 %v10665_v54, 16 }
  0x70   : > { %13786 = vst [vmem:[#allocation19_spill] sm:$0xff] %v10700_v9  ;;  %v13674_v18 = vshll.u32 %v10700_v9, 16  ;;  %13790 = vst [vmem:[#allocation23_spill] sm:$0xff] %v10754_v14  ;;  %v9314_v23 = vld [vmem:[%s13669_s1 + $0x5fc] ss:$40 sps:$4 sm:$0xff]  }
  0x71   : > { %4691 = vmatmul.mubr.bf16.gmra.mrb[8].mxu1 %v10519_v63  ;;  %4804 = vmatmul.mubr.bf16.gmra.mrb[8].mxu0 %v10668_v57  ;;  %13787 = vst [vmem:[#allocation20_spill] sm:$0xff] %v10719_v51  ;;  %v584_v24 = vor.u32 %v13676_v27, %v572_v22  ;;  %v9257_v27 = vld [vmem:[%s13669_s1 + $0xd24] ss:$40 sps:$4 sm:$0xff]  }
  0x72   : > { %4873 = vmatpush1.bf16.msra.mxu0 %v9219_v13  ;;  %5099 = vmatpush1.bf16.msra.mxu1 %v9222_v53  ;;  %v10722_v13 = vsel %vm485_vm0, %v544_v7, %v548_v17  ;;  %v9239_v53 = vld [vmem:[%s13669_s1 + $0xc34] ss:$40 sps:$4 sm:$0xff]   ;;  %v560_v7 = vor.u32 %v13682_v16, %v548_v17  ;;  %v9243_v17 = vld [vmem:[%s13669_s1 + $0xc80] ss:$40 sps:$4 sm:$0xff]   ;;  %v10862_v16 = vpack.c.bf16 %v10281_v32, %v10281_v32 }
  0x73   : > { %4874 = vmatprep.subr.bf16.mxu0 %v9227_v58  ;;  %5100 = vmatprep.subr.bf16.mxu1 %v9230_v21  ;;  %13788 = vst [vmem:[#allocation21_spill] sm:$0xff] %v10722_v13  ;;  %v9237_v58 = vld [vmem:[%s13669_s1 + $0xc30] ss:$40 sps:$4 sm:$0xff]  }
  0x74   : > { %4700 = vmatprep.mubr.bf16.mxu1 %v10553_v37  ;;  %4813 = vmatprep.mubr.bf16.mxu0 %v10688_v12  ;;  %v9240_v21 = vld [vmem:[%s13669_s1 + $0x238] ss:$40 sps:$4 sm:$0xff]  }
  0x76   : > { %4875 = vmatpush1.bf16.msra.mxu0 %v9225_v62  ;;  %5101 = vmatpush1.bf16.msra.mxu1 %v9228_v1  ;;  %v10742_v62 = vsel %vm485_vm0, %v568_v20, %v572_v22  ;;  %v13675_v1 = vshll.u32 %v10719_v51, 16  ;;  %v10773_v20 = vpack.c.bf16 %v10278_v31, %v10272_v29  ;;  %v13678_v22 = vshll.u32 %v10754_v14, 16  ;;  %v9254_v29 = vld [vmem:[%s13669_s1 + $0x2dc] ss:$40 sps:$4 sm:$0xff]  }
  0x77   : > { %4876 = vmatprep.subr.bf16.mxu0 %v9233_v10  ;;  %5102 = vmatprep.subr.bf16.mxu1 %v9236_v46  ;;  %13789 = vst [vmem:[#allocation22_spill] sm:$0xff] %v10742_v62  ;;  %v564_v10 = vrot.slane %v13674_v18, 1  ;;  %v9245_v46 = vld [vmem:[%s13669_s1 + $0xc84] ss:$40 sps:$4 sm:$0xff]   ;;  %v13681_v18 = vshrl.u32 %v10700_v9, 16  ;;  %v13680_v31 = vshrl.u32 %v10719_v51, 16 }
  0x78   : > { %v588_v26 = vrot.slane %v13675_v1, 1  ;;  %13791 = vst [vmem:[#allocation24_spill] sm:$0xff] %v10773_v20  ;;  %v580_v1 = vrot.slane %v13678_v22, 1  ;;  %v13684_v22 = vshrl.u32 %v10754_v14, 16 }
  0x79   : > { %4701 = vmatmul.mubr.bf16.gmra.mrb[12].mxu1 %v10591_v4  ;;  %4814 = vmatmul.mubr.bf16.gmra.mrb[12].mxu0 %v10722_v13 }
  0x7a   : > { %4877 = vmatpush1.bf16.msra.mxu0 %v9231_v47  ;;  %5103 = vmatpush1.bf16.msra.mxu1 %v9234_v38  ;;  %v9248_v47 = vld [vmem:[%s13669_s1 + $0x28c] ss:$40 sps:$4 sm:$0xff]   ;;  %v9246_v38 = vld [vmem:[%s13669_s1 + $0x288] ss:$40 sps:$4 sm:$0xff]   ;;  %v600_v28 = vor.u32 %v13680_v31, %v588_v26 }
  0x7b   : > { %4878 = vmatprep.subr.bf16.mxu0 %v9239_v53  ;;  %5104 = vmatprep.subr.bf16.mxu1 %v9242_v25  ;;  %v10776_v53 = vsel %vm485_vm0, %v560_v7, %v564_v10  ;;  %v9251_v25 = vld [vmem:[%s13669_s1 + $0xcd4] ss:$40 sps:$4 sm:$0xff]   ;;  %v10796_v7 = vsel %vm485_vm0, %v584_v24, %v588_v26  ;;  %v10827_v24 = vpack.c.bf16 %v10284_v33, %v10284_v33  ;;  %v13683_v26 = vshll.u32 %v10808_v6, 16 }
  0x7c   : > { %4710 = vmatprep.mubr.bf16.mxu1 %v10611_v3  ;;  %4823 = vmatprep.mubr.bf16.mxu0 %v10742_v62  ;;  %13792 = vst [vmem:[#allocation25_spill] sm:$0xff] %v10776_v53  ;;  %13793 = vst [vmem:[#allocation26_spill] sm:$0xff] %v10796_v7  ;;  %v9266_v33 = vld [vmem:[%s13669_s1 + $0x37c] ss:$40 sps:$4 sm:$0xff]  }
  0x7d   : > { %v596_v31 = vrot.slane %v13683_v26, 1  ;;  %v13688_v26 = vshrl.u32 %v10808_v6, 16 }
  0x7e   : > { %4879 = vmatpush1.bf16.msra.mxu0 %v9237_v58  ;;  %5105 = vmatpush1.bf16.msra.mxu1 %v9240_v21  ;;  %v9249_v58 = vld [vmem:[%s13669_s1 + $0xcd0] ss:$40 sps:$4 sm:$0xff]  }
  0x7f   : > { %4880 = vmatprep.subr.bf16.mxu0 %v9245_v46  ;;  %5106 = vmatprep.subr.bf16.mxu1 %v9248_v47  ;;  %v9252_v21 = vld [vmem:[%s13669_s1 + $0x2d8] ss:$40 sps:$4 sm:$0xff]   ;;  %v13679_v46 = vshll.u32 %v10773_v20, 16  ;;  %v576_v47 = vor.u32 %v13681_v18, %v564_v10  ;;  %v9269_v18 = vld [vmem:[%s13669_s1 + $0xdc4] ss:$40 sps:$4 sm:$0xff]  }
  0x80   : > { %v9255_v10 = vld [vmem:[%s13669_s1 + $0xd20] ss:$40 sps:$4 sm:$0xff]  }
  0x81   : > { %4711 = vmatmul.mubr.bf16.gmra.mrb[16].mxu1 %v10646_v48  ;;  %4824 = vmatmul.mubr.bf16.gmra.mrb[16].mxu0 %v10776_v53  ;;  %v604_v30 = vrot.slane %v13679_v46, 1  ;;  %v592_v46 = vor.u32 %v13684_v22, %v580_v1  ;;  %v13687_v22 = vshll.u32 %v10862_v16, 16 }
  0x82   : > { %4881 = vmatpush1.bf16.msra.mxu0 %v9243_v17  ;;  %5107 = vmatpush1.bf16.msra.mxu1 %v9246_v38  ;;  %v9260_v17 = vld [vmem:[%s13669_s1 + $0x32c] ss:$40 sps:$4 sm:$0xff]   ;;  %v9258_v38 = vld [vmem:[%s13669_s1 + $0x328] ss:$40 sps:$4 sm:$0xff]  }
  0x83   : > { %4882 = vmatprep.subr.bf16.mxu0 %v9251_v25  ;;  %5108 = vmatprep.subr.bf16.mxu1 %v9254_v29  ;;  %v10830_v25 = vsel %vm485_vm0, %v576_v47, %v580_v1  ;;  %v9263_v29 = vld [vmem:[%s13669_s1 + $0xd74] ss:$40 sps:$4 sm:$0xff]   ;;  %v9264_v47 = vld [vmem:[%s13669_s1 + $0x378] ss:$40 sps:$4 sm:$0xff]  }
  0x84   : > { %4720 = vmatprep.mubr.bf16.mxu1 %v10665_v54  ;;  %4833 = vmatprep.mubr.bf16.mxu0 %v10796_v7  ;;  %13795 = vst [vmem:[#allocation28_spill] sm:$0xff] %v10830_v25  ;;  %v9267_v1 = vld [vmem:[%s13669_s1 + $0xdc0] ss:$40 sps:$4 sm:$0xff]  }
  0x86   : > { %4883 = vmatpush1.bf16.msra.mxu0 %v9249_v58  ;;  %5109 = vmatpush1.bf16.msra.mxu1 %v9252_v21  ;;  %v13686_v58 = vshrl.u32 %v10773_v20, 16  ;;  %v9261_v21 = vld [vmem:[%s13669_s1 + $0xd70] ss:$40 sps:$4 sm:$0xff]  }
  0x87   : > { %4884 = vmatprep.subr.bf16.mxu0 %v9257_v27  ;;  %5110 = vmatprep.subr.bf16.mxu1 %v9260_v17  ;;  %v10850_v27 = vsel %vm485_vm0, %v600_v28, %v604_v30  ;;  %v13685_v17 = vshll.u32 %v10827_v24, 16 }
  0x88   : > { %v616_v32 = vor.u32 %v13686_v58, %v604_v30  ;;  %v9278_v30 = vld [vmem:[%s13669_s1 + $0x41c] ss:$40 sps:$4 sm:$0xff]   ;;  %v9284_v58 = vld [vmem:[%s13669_s1 + $0x46c] ss:$40 sps:$4 sm:$0xff]  }
  0x89   : > { %4721 = vmatmul.mubr.bf16.gmra.mrb[20].mxu1 %v10700_v9  ;;  %4834 = vmatmul.mubr.bf16.gmra.mrb[20].mxu0 %v10830_v25  ;;  %v620_v28 = vrot.slane %v13685_v17, 1  ;;  %v9281_v17 = vld [vmem:[%s13669_s1 + $0xe64] ss:$40 sps:$4 sm:$0xff]  }
  0x8a   : > { %4885 = vmatpush1.bf16.msra.mxu0 %v9255_v10  ;;  %5111 = vmatpush1.bf16.msra.mxu1 %v9258_v38  ;;  %v9272_v10 = vld [vmem:[%s13669_s1 + $0x3cc] ss:$40 sps:$4 sm:$0xff]   ;;  %v9270_v38 = vld [vmem:[%s13669_s1 + $0x3c8] ss:$40 sps:$4 sm:$0xff]  }
  0x8b   : > { %4886 = vmatprep.subr.bf16.mxu0 %v9263_v29  ;;  %5112 = vmatprep.subr.bf16.mxu1 %v9266_v33  ;;  %v10880_v29 = vsel %vm485_vm0, %v592_v46, %v596_v31  ;;  %v9275_v33 = vld [vmem:[%s13669_s1 + $0xe14] ss:$40 sps:$4 sm:$0xff]   ;;  %v9273_v46 = vld [vmem:[%s13669_s1 + $0xe10] ss:$40 sps:$4 sm:$0xff]  }
  0x8c   : > { %4730 = vmatprep.mubr.bf16.mxu1 %v10719_v51  ;;  %4843 = vmatprep.mubr.bf16.mxu0 %v10850_v27 }
  0x8e   : > { %4887 = vmatpush1.bf16.msra.mxu0 %v9261_v21  ;;  %5113 = vmatpush1.bf16.msra.mxu1 %v9264_v47  ;;  %v9276_v21 = vld [vmem:[%s13669_s1 + $0x418] ss:$40 sps:$4 sm:$0xff]   ;;  %v10899_v47 = vsel %vm485_vm0, %v616_v32, %v620_v28  ;;  %v661_v32 = vrot.slane %v10288_v35, 1 }
  0x8f   : > { %4888 = vmatprep.subr.bf16.mxu0 %v9269_v18  ;;  %5114 = vmatprep.subr.bf16.mxu1 %v9272_v10  ;;  %v608_v18 = vor.u32 %v13688_v26, %v596_v31  ;;  %v612_v10 = vrot.slane %v13687_v22, 1  ;;  %v9279_v31 = vld [vmem:[%s13669_s1 + $0xe60] ss:$40 sps:$4 sm:$0xff]   ;;  %v9296_v22 = vld [vmem:[%s13669_s1 + $0x50c] ss:$40 sps:$4 sm:$0xff]  }
  0x90   : > { %v9302_v26 = vld [vmem:[%s13669_s1 + $0x55c] ss:$40 sps:$4 sm:$0xff]  }
  0x91   : > { %4731 = vmatmul.mubr.bf16.gmra.mrb[24].mxu1 %v10754_v14  ;;  %4844 = vmatmul.mubr.bf16.gmra.mrb[24].mxu0 %v10880_v29  ;;  %v10922_v28 = vsel %vm485_vm0, %v608_v18, %v612_v10  ;;  %v9293_v10 = vld [vmem:[%s13669_s1 + $0xf04] ss:$40 sps:$4 sm:$0xff]  }
  0x92   : > { %4889 = vmatpush1.bf16.msra.mxu0 %v9267_v1  ;;  %5115 = vmatpush1.bf16.msra.mxu1 %v9270_v38  ;;  %v660_v1 = vrot.slane %v10286_v34, 1  ;;  %v9282_v38 = vld [vmem:[%s13669_s1 + $0x468] ss:$40 sps:$4 sm:$0xff]  }
  0x93   : > { %4890 = vmatprep.subr.bf16.mxu0 %v9275_v33  ;;  %5116 = vmatprep.subr.bf16.mxu1 %v9278_v30  ;;  %v9287_v33 = vld [vmem:[%s13669_s1 + $0xeb4] ss:$40 sps:$4 sm:$0xff]  }
  0x94   : > { %4740 = vmatprep.mubr.bf16.mxu1 %v10773_v20  ;;  %4853 = vmatprep.mubr.bf16.mxu0 %v10899_v47  ;;  %v9290_v30 = vld [vmem:[%s13669_s1 + $0x4bc] ss:$40 sps:$4 sm:$0xff]   ;;  %v10939_v18 = vsel %vm656_vm2, %v660_v1, %v661_v32  ;;  %v9291_v1 = vld [vmem:[%s13669_s1 + $0xf00] ss:$40 sps:$4 sm:$0xff]  }
  0x96   : > { %4891 = vmatpush1.bf16.msra.mxu0 %v9273_v46  ;;  %5117 = vmatpush1.bf16.msra.mxu1 %v9276_v21  ;;  %v9285_v46 = vld [vmem:[%s13669_s1 + $0xeb0] ss:$40 sps:$4 sm:$0xff]  }
  0x97   : > { %4892 = vmatprep.subr.bf16.mxu0 %v9281_v17  ;;  %5118 = vmatprep.subr.bf16.mxu1 %v9284_v58  ;;  %v9288_v21 = vld [vmem:[%s13669_s1 + $0x4b8] ss:$40 sps:$4 sm:$0xff]   ;;  %v657_v58 = vrot.slane %v10479_v52, 1  ;;  %v658_v17 = vrot.slane %v10495_v2, 1 }
  0x99   : > { %4741 = vmatmul.mubr.bf16.gmra.mrb[28].mxu1 %v10808_v6  ;;  %4854 = vmatmul.mubr.bf16.gmra.mrb[28].mxu0 %v10922_v28 }
  0x9a   : > { %4893 = vmatpush1.bf16.msra.mxu0 %v9279_v31  ;;  %5119 = vmatpush1.bf16.msra.mxu1 %v9282_v38  ;;  %v9294_v31 = vld [vmem:[%s13669_s1 + $0x508] ss:$40 sps:$4 sm:$0xff]   ;;  %v665_v38 = vrot.slane %v10290_v36, 1 }
  0x9b   : > { %4894 = vmatprep.subr.bf16.mxu0 %v9287_v33  ;;  %5120 = vmatprep.subr.bf16.mxu1 %v9290_v30  ;;  %v10959_v33 = vsel %vm656_vm2, %v657_v58, %v658_v17  ;;  %v9299_v30 = vld [vmem:[%s13669_s1 + $0xf54] ss:$40 sps:$4 sm:$0xff]  }
  0x9c   : > { %4896 = vmatprep.mubr.bf16.mxu0 %v10939_v18  ;;  %5122 = vmatprep.mubr.bf16.mxu1 %v10286_v34  ;;  %v10976_v58 = vsel %vm656_vm2, %v661_v32, %v665_v38  ;;  %v9303_v32 = vld [vmem:[%s13669_s1 + $0xfa0] ss:$40 sps:$4 sm:$0xff]  }
  0x9e   : > { %4895 = vmatpush1.bf16.msra.mxu0 %v9285_v46  ;;  %5121 = vmatpush1.bf16.msra.mxu1 %v9288_v21  ;;  %v9297_v46 = vld [vmem:[%s13669_s1 + $0xf50] ss:$40 sps:$4 sm:$0xff]  }
  0x9f   : > { %4977 = vmatprep.subr.bf16.mxu0 %v9293_v10  ;;  %5203 = vmatprep.subr.bf16.mxu1 %v9296_v22  ;;  %v9300_v21 = vld [vmem:[%s13669_s1 + $0x558] ss:$40 sps:$4 sm:$0xff]   ;;  %v663_v22 = vrot.slane %v10519_v63, 1  ;;  %v9305_v10 = vld [vmem:[%s13669_s1 + $0xfa4] ss:$40 sps:$4 sm:$0xff]  }
  0xa1   : > { %4897 = vmatmul.mubr.bf16.vlgmr.msra.gmra.mrb[0].mxu0 %v10959_v33  ;;  %5123 = vmatmul.mubr.bf16.vlgmr.msra.gmra.mrb[32].mxu1 %v10479_v52 }
  0xa2   : > { %4978 = vmatpush1.bf16.msra.mxu0 %v9291_v1  ;;  %5204 = vmatpush1.bf16.msra.mxu1 %v9294_v31  ;;  %v9306_v1 = vld [vmem:[%s13669_s1 + $0x5a8] ss:$40 sps:$4 sm:$0xff]   ;;  %v669_v31 = vrot.slane %v10553_v37, 1 }
  0xa3   : > { %4979 = vmatprep.subr.bf16.mxu0 %v9299_v30  ;;  %5205 = vmatprep.subr.bf16.mxu1 %v9302_v26  ;;  %v10995_v26 = vsel %vm656_vm2, %v658_v17, %v663_v22  ;;  %v9311_v30 = vld [vmem:[%s13669_s1 + $0xff4] ss:$40 sps:$4 sm:$0xff]   ;;  %v9312_v17 = vld [vmem:[%s13669_s1 + $0x5f8] ss:$40 sps:$4 sm:$0xff]  }
  0xa4   : > { %4906 = vmatprep.mubr.bf16.mxu0 %v10976_v58  ;;  %5132 = vmatprep.mubr.bf16.mxu1 %v10288_v35 }
  0xa6   : > { %4980 = vmatpush1.bf16.msra.mxu0 %v9297_v46  ;;  %5206 = vmatpush1.bf16.msra.mxu1 %v9300_v21  ;;  %v9309_v46 = vld [vmem:[%s13669_s1 + $0xff0] ss:$40 sps:$4 sm:$0xff]   ;;  %v11012_v21 = vsel %vm656_vm2, %v665_v38, %v669_v31  ;;  %v9315_v38 = vld [vmem:[%s13669_s1 + $0x1040] ss:$40 sps:$4 sm:$0xff]  }
  0xa7   : > { %4981 = vmatprep.subr.bf16.mxu0 %v9305_v10  ;;  %5207 = vmatprep.subr.bf16.mxu1 %v9308_v45  ;;  %v667_v45 = vrot.slane %v10591_v4, 1  ;;  %v9317_v10 = vld [vmem:[%s13669_s1 + $0x1044] ss:$40 sps:$4 sm:$0xff]  }
  0xa9   : > { %4907 = vmatmul.mubr.bf16.gmra.mrb[4].mxu0 %v10995_v26  ;;  %5133 = vmatmul.mubr.bf16.gmra.mrb[36].mxu1 %v10495_v2 }
  0xaa   : > { %4982 = vmatpush1.bf16.msra.mxu0 %v9303_v32  ;;  %5208 = vmatpush1.bf16.msra.mxu1 %v9306_v1  ;;  %v9318_v32 = vld [vmem:[%s13669_s1 + $0x648] ss:$40 sps:$4 sm:$0xff]   ;;  %v673_v1 = vrot.slane %v10611_v3, 1 }
  0xab   : > { %4983 = vmatprep.subr.bf16.mxu0 %v9311_v30  ;;  %5209 = vmatprep.subr.bf16.mxu1 %v9314_v23  ;;  %v11031_v23 = vsel %vm656_vm2, %v663_v22, %v667_v45  ;;  %v9323_v30 = vld [vmem:[%s13669_s1 + $0x1094] ss:$40 sps:$4 sm:$0xff]   ;;  %v9324_v22 = vld [vmem:[%s13669_s1 + $0x698] ss:$40 sps:$4 sm:$0xff]  }
  0xac   : > { %4916 = vmatprep.mubr.bf16.mxu0 %v11012_v21  ;;  %5142 = vmatprep.mubr.bf16.mxu1 %v10290_v36  ;;  %13796 = vst [vmem:[#allocation29_spill] sm:$0xff] %v11031_v23 }
  0xae   : > { %4984 = vmatpush1.bf16.msra.mxu0 %v9309_v46  ;;  %5210 = vmatpush1.bf16.msra.mxu1 %v9312_v17  ;;  %v9321_v46 = vld [vmem:[%s13669_s1 + $0x1090] ss:$40 sps:$4 sm:$0xff]   ;;  %v11048_v17 = vsel %vm656_vm2, %v669_v31, %v673_v1  ;;  %v9327_v31 = vld [vmem:[%s13669_s1 + $0x10e0] ss:$40 sps:$4 sm:$0xff]  }
  0xaf   : > { %4985 = vmatprep.subr.bf16.mxu0 %v9317_v10  ;;  %5211 = vmatprep.subr.bf16.mxu1 %v9320_v44  ;;  %13797 = vst [vmem:[#allocation30_spill] sm:$0xff] %v11048_v17  ;;  %v671_v44 = vrot.slane %v10646_v48, 1  ;;  %v9329_v10 = vld [vmem:[%s13669_s1 + $0x10e4] ss:$40 sps:$4 sm:$0xff]  }
  0xb1   : > { %4917 = vmatmul.mubr.bf16.gmra.mrb[8].mxu0 %v11031_v23  ;;  %5143 = vmatmul.mubr.bf16.gmra.mrb[40].mxu1 %v10519_v63 }
  0xb2   : > { %4986 = vmatpush1.bf16.msra.mxu0 %v9315_v38  ;;  %5212 = vmatpush1.bf16.msra.mxu1 %v9318_v32  ;;  %v9330_v38 = vld [vmem:[%s13669_s1 + $0x6e8] ss:$40 sps:$4 sm:$0xff]   ;;  %v677_v32 = vrot.slane %v10665_v54, 1 }
  0xb3   : > { %4987 = vmatprep.subr.bf16.mxu0 %v9323_v30  ;;  %5213 = vmatprep.subr.bf16.mxu1 %v9326_v59  ;;  %v11067_v59 = vsel %vm656_vm2, %v667_v45, %v671_v44  ;;  %v9335_v30 = vld [vmem:[%s13669_s1 + $0x1134] ss:$40 sps:$4 sm:$0xff]   ;;  %v9336_v45 = vld [vmem:[%s13669_s1 + $0x738] ss:$40 sps:$4 sm:$0xff]  }
  0xb4   : > { %4926 = vmatprep.mubr.bf16.mxu0 %v11048_v17  ;;  %5152 = vmatprep.mubr.bf16.mxu1 %v10553_v37 }
  0xb6   : > { %4988 = vmatpush1.bf16.msra.mxu0 %v9321_v46  ;;  %5214 = vmatpush1.bf16.msra.mxu1 %v9324_v22  ;;  %v9333_v46 = vld [vmem:[%s13669_s1 + $0x1130] ss:$40 sps:$4 sm:$0xff]   ;;  %v11084_v22 = vsel %vm656_vm2, %v673_v1, %v677_v32  ;;  %v9339_v1 = vld [vmem:[%s13669_s1 + $0x1180] ss:$40 sps:$4 sm:$0xff]  }
  0xb7   : > { %4989 = vmatprep.subr.bf16.mxu0 %v9329_v10  ;;  %5215 = vmatprep.subr.bf16.mxu1 %v9332_v55  ;;  %v675_v55 = vrot.slane %v10700_v9, 1  ;;  %v9341_v10 = vld [vmem:[%s13669_s1 + $0x1184] ss:$40 sps:$4 sm:$0xff]  }
  0xb9   : > { %4927 = vmatmul.mubr.bf16.gmra.mrb[12].mxu0 %v11067_v59  ;;  %5153 = vmatmul.mubr.bf16.gmra.mrb[44].mxu1 %v10591_v4 }
  0xba   : > { %4990 = vmatpush1.bf16.msra.mxu0 %v9327_v31  ;;  %5216 = vmatpush1.bf16.msra.mxu1 %v9330_v38  ;;  %v9342_v31 = vld [vmem:[%s13669_s1 + $0x788] ss:$40 sps:$4 sm:$0xff]   ;;  %v681_v38 = vrot.slane %v10719_v51, 1 }
  0xbb   : > { %4991 = vmatprep.subr.bf16.mxu0 %v9335_v30  ;;  %5217 = vmatprep.subr.bf16.mxu1 %v9338_v19  ;;  %v11103_v19 = vsel %vm656_vm2, %v671_v44, %v675_v55  ;;  %v9347_v30 = vld [vmem:[%s13669_s1 + $0x11d4] ss:$40 sps:$4 sm:$0xff]   ;;  %v9348_v44 = vld [vmem:[%s13669_s1 + $0x7d8] ss:$40 sps:$4 sm:$0xff]  }
  0xbc   : > { %4936 = vmatprep.mubr.bf16.mxu0 %v11084_v22  ;;  %5162 = vmatprep.mubr.bf16.mxu1 %v10611_v3 }
  0xbe   : > { %4992 = vmatpush1.bf16.msra.mxu0 %v9333_v46  ;;  %5218 = vmatpush1.bf16.msra.mxu1 %v9336_v45  ;;  %v9345_v46 = vld [vmem:[%s13669_s1 + $0x11d0] ss:$40 sps:$4 sm:$0xff]   ;;  %v11120_v45 = vsel %vm656_vm2, %v677_v32, %v681_v38  ;;  %v9351_v32 = vld [vmem:[%s13669_s1 + $0x1220] ss:$40 sps:$4 sm:$0xff]  }
  0xbf   : > { %4993 = vmatprep.subr.bf16.mxu0 %v9341_v10  ;;  %5219 = vmatprep.subr.bf16.mxu1 %v9344_v43  ;;  %13798 = vst [vmem:[#allocation31_spill] sm:$0xff] %v11120_v45  ;;  %v679_v43 = vrot.slane %v10754_v14, 1  ;;  %v9353_v10 = vld [vmem:[%s13669_s1 + $0x1224] ss:$40 sps:$4 sm:$0xff]  }
  0xc1   : > { %4937 = vmatmul.mubr.bf16.gmra.mrb[16].mxu0 %v11103_v19  ;;  %5163 = vmatmul.mubr.bf16.gmra.mrb[48].mxu1 %v10646_v48 }
  0xc2   : > { %4994 = vmatpush1.bf16.msra.mxu0 %v9339_v1  ;;  %5220 = vmatpush1.bf16.msra.mxu1 %v9342_v31  ;;  %v9354_v1 = vld [vmem:[%s13669_s1 + $0x828] ss:$40 sps:$4 sm:$0xff]   ;;  %v685_v31 = vrot.slane %v10773_v20, 1 }
  0xc3   : > { %4995 = vmatprep.subr.bf16.mxu0 %v9347_v30  ;;  %5221 = vmatprep.subr.bf16.mxu1 %v9350_v8  ;;  %v11139_v8 = vsel %vm656_vm2, %v675_v55, %v679_v43  ;;  %v9359_v30 = vld [vmem:[%s13669_s1 + $0x1274] ss:$40 sps:$4 sm:$0xff]   ;;  %v9360_v55 = vld [vmem:[%s13669_s1 + $0x878] ss:$40 sps:$4 sm:$0xff]  }
  0xc4   : > { %4946 = vmatprep.mubr.bf16.mxu0 %v11120_v45  ;;  %5172 = vmatprep.mubr.bf16.mxu1 %v10665_v54  ;;  %13799 = vst [vmem:[#allocation32_spill] sm:$0xff] %v11139_v8 }
  0xc6   : > { %4996 = vmatpush1.bf16.msra.mxu0 %v9345_v46  ;;  %5222 = vmatpush1.bf16.msra.mxu1 %v9348_v44  ;;  %v9357_v46 = vld [vmem:[%s13669_s1 + $0x1270] ss:$40 sps:$4 sm:$0xff]   ;;  %v11156_v44 = vsel %vm656_vm2, %v681_v38, %v685_v31  ;;  %v9363_v38 = vld [vmem:[%s13669_s1 + $0x12c0] ss:$40 sps:$4 sm:$0xff]  }
  0xc7   : > { %4997 = vmatprep.subr.bf16.mxu0 %v9353_v10  ;;  %5223 = vmatprep.subr.bf16.mxu1 %v9356_v41  ;;  %13800 = vst [vmem:[#allocation33_spill] sm:$0xff] %v11156_v44  ;;  %v683_v41 = vrot.slane %v10808_v6, 1  ;;  %v9365_v10 = vld [vmem:[%s13669_s1 + $0x12c4] ss:$40 sps:$4 sm:$0xff]  }
  0xc9   : > { %4947 = vmatmul.mubr.bf16.gmra.mrb[20].mxu0 %v11139_v8  ;;  %5173 = vmatmul.mubr.bf16.gmra.mrb[52].mxu1 %v10700_v9 }
  0xca   : > { %4998 = vmatpush1.bf16.msra.mxu0 %v9351_v32  ;;  %5224 = vmatpush1.bf16.msra.mxu1 %v9354_v1  ;;  %v9366_v32 = vld [vmem:[%s13669_s1 + $0x8c8] ss:$40 sps:$4 sm:$0xff]   ;;  %v689_v1 = vrot.slane %v10827_v24, 1 }
  0xcb   : > { %4999 = vmatprep.subr.bf16.mxu0 %v9359_v30  ;;  %5225 = vmatprep.subr.bf16.mxu1 %v9362_v39  ;;  %v11175_v39 = vsel %vm656_vm2, %v679_v43, %v683_v41  ;;  %v9371_v30 = vld [vmem:[%s13669_s1 + $0x1314] ss:$40 sps:$4 sm:$0xff]   ;;  %v9372_v43 = vld [vmem:[%s13669_s1 + $0x918] ss:$40 sps:$4 sm:$0xff]  }
  0xcc   : > { %4956 = vmatprep.mubr.bf16.mxu0 %v11156_v44  ;;  %5182 = vmatprep.mubr.bf16.mxu1 %v10719_v51  ;;  %13801 = vst [vmem:[#allocation34_spill] sm:$0xff] %v11175_v39  ;;  %v13806_v44 = vshll.u32 %v10495_v2, 16 }
  0xce   : > { %5000 = vmatpush1.bf16.msra.mxu0 %v9357_v46  ;;  %5226 = vmatpush1.bf16.msra.mxu1 %v9360_v55  ;;  %v9369_v46 = vld [vmem:[%s13669_s1 + $0x1310] ss:$40 sps:$4 sm:$0xff]   ;;  %v11192_v55 = vsel %vm656_vm2, %v685_v31, %v689_v1  ;;  %v708_v31 = vrot.slane %v487_v60, 1  ;;  %v9383_v60 = vld [vmem:[%s13669_s1 + $0x13b4] ss:$40 sps:$4 sm:$0xff]   ;;  %v712_v8 = vrot.slane %v13806_v44, 2 }
  0xcf   : > { %5001 = vmatprep.subr.bf16.mxu0 %v9365_v10  ;;  %5227 = vmatprep.subr.bf16.mxu1 %v9368_v61  ;;  %13802 = vst [vmem:[#allocation35_spill] sm:$0xff] %v11192_v55  ;;  %v687_v61 = vrot.slane %v10862_v16, 1  ;;  %v9377_v10 = vld [vmem:[%s13669_s1 + $0x1364] ss:$40 sps:$4 sm:$0xff]   ;;  %v9384_v44 = vld [vmem:[%s13669_s1 + $0x9b8] ss:$40 sps:$4 sm:$0xff]  }
  0xd1   : > { %4957 = vmatmul.mubr.bf16.gmra.mrb[24].mxu0 %v11175_v39  ;;  %5183 = vmatmul.mubr.bf16.gmra.mrb[56].mxu1 %v10754_v14 }
  0xd2   : > { %5002 = vmatpush1.bf16.msra.mxu0 %v9363_v38  ;;  %5228 = vmatpush1.bf16.msra.mxu1 %v9366_v32  ;;  %v9375_v38 = vld [vmem:[%s13669_s1 + $0x1360] ss:$40 sps:$4 sm:$0xff]  }
  0xd3   : > { %5003 = vmatprep.subr.bf16.mxu0 %v9371_v30  ;;  %5229 = vmatprep.subr.bf16.mxu1 %v9374_v42  ;;  %v9378_v32 = vld [vmem:[%s13669_s1 + $0x968] ss:$40 sps:$4 sm:$0xff]   ;;  %v13803_v42 = vshll.u32 %v10479_v52, 16  ;;  %v11214_v30 = vsel %vm656_vm2, %v683_v41, %v687_v61 }
  0xd4   : > { %4966 = vmatprep.mubr.bf16.mxu0 %v11192_v55  ;;  %5192 = vmatprep.mubr.bf16.mxu1 %v10773_v20  ;;  %13804 = vst [vmem:[#allocation36_spill] sm:$0xff] %v11214_v30  ;;  %v13805_v55 = vshrl.u32 %v10495_v2, 16 }
  0xd5   : > { %v709_v1 = vrot.slane %v13803_v42, 2 }
  0xd6   : > { %5004 = vmatpush1.bf16.msra.mxu0 %v9369_v46  ;;  %5230 = vmatpush1.bf16.msra.mxu1 %v9372_v43  ;;  %v711_v39 = vrot.slane %v13805_v55, 1  ;;  %v9386_v46 = vld [vmem:[%s13669_s1 + $0x9bc] ss:$40 sps:$4 sm:$0xff]   ;;  %v13807_v43 = vshrl.u32 %v10290_v36, 16  ;;  %v9381_v55 = vld [vmem:[%s13669_s1 + $0x13b0] ss:$40 sps:$4 sm:$0xff]  }
  0xd7   : > { %5005 = vmatprep.subr.bf16.mxu0 %v9377_v10  ;;  %5231 = vmatprep.subr.bf16.mxu1 %v9380_v56  ;;  %v13808_v56 = vshll.u32 %v10290_v36, 16  ;;  %v710_v10 = vor.u32 %v709_v1, %v708_v31  ;;  %v13810_v1 = vshrl.u32 %v10519_v63, 16 }
  0xd8   : > { %v726_v41 = vrot.slane %v13807_v43, 1  ;;  %v713_v42 = vor.u32 %v712_v8, %v711_v39  ;;  %v9389_v43 = vld [vmem:[%s13669_s1 + $0xa0c] ss:$40 sps:$4 sm:$0xff]   ;;  %v9390_v8 = vld [vmem:[%s13669_s1 + $0x10] ss:$40 sps:$4 sm:$0xff]  }
  0xd9   : > { %4967 = vmatmul.mubr.bf16.gmra.mrb[28].mxu0 %v11214_v30  ;;  %5193 = vmatmul.mubr.bf16.gmra.mrb[60].mxu1 %v10808_v6  ;;  %v727_v61 = vrot.slane %v13808_v56, 2  ;;  %v9392_v30 = vld [vmem:[%s13669_s1 + $0x14] ss:$40 sps:$4 sm:$0xff]  }
  0xda   : > { %5006 = vmatpush1.bf16.msra.mxu0 %v9375_v38  ;;  %5232 = vmatpush1.bf16.msra.mxu1 %v9378_v32  ;;  %v9387_v38 = vld [vmem:[%s13669_s1 + $0xa08] ss:$40 sps:$4 sm:$0xff]   ;;  %v11253_v31 = vsel %vm707_vm1, %v710_v10, %v713_v42  ;;  %v9395_v32 = vld [vmem:[%s13669_s1 + $0xa5c] ss:$40 sps:$4 sm:$0xff]  }
  0xdb   : > { %5007 = vmatprep.subr.bf16.mxu0 %v9383_v60  ;;  %5233 = vmatprep.subr.bf16.mxu1 %v9386_v46  ;;  %v728_v39 = vor.u32 %v727_v61, %v726_v41  ;;  %13809 = vst [vmem:[#allocation37_spill] sm:$0xff] %v11253_v31  ;;  %v722_v60 = vrot.slane %v13810_v1, 1  ;;  %v13811_v46 = vshll.u32 %v10519_v63, 16  ;;  %v9398_v41 = vld [vmem:[%s13669_s1 + $0x64] ss:$40 sps:$4 sm:$0xff]  }
  0xdc   : > { %5009 = vmatprep.mubr.bf16.mxu0 %v10580_v0  ;;  %5235 = vmatprep.mubr.bf16.mxu1 %v10317_v49  ;;  %v9393_v61 = vld [vmem:[%s13669_s1 + $0xa58] ss:$40 sps:$4 sm:$0xff]  }
  0xdd   : > { %v723_v56 = vrot.slane %v13811_v46, 2  ;;  %v9396_v10 = vld [vmem:[%s13669_s1 + $0x60] ss:$40 sps:$4 sm:$0xff]  }
  0xde   : > { %5008 = vmatpush1.bf16.msra.mxu0 %v9381_v55  ;;  %5234 = vmatpush1.bf16.msra.mxu1 %v9384_v44  ;;  %v13812_v55 = vshrl.u32 %v10553_v37, 16 }
  0xdf   : > { %5316 = vmatprep.subr.bf16.mxu1 %v9389_v43  ;;  %5542 = vmatprep.subr.bf16.mxu0 %v9392_v30  ;;  %v11277_v30 = vsel %vm707_vm1, %v10566_v15, %v728_v39  ;;  %v13814_v43 = vshll.u32 %v10553_v37, 16  ;;  %v724_v46 = vor.u32 %v723_v56, %v722_v60  ;;  %v9399_v15 = vld [vmem:[%s13669_s1 + $0xaa8] ss:$40 sps:$4 sm:$0xff]   ;;  %v9407_v60 = vld [vmem:[%s13669_s1 + $0xafc] ss:$40 sps:$4 sm:$0xff]   ;;  %v13816_v56 = vshrl.u32 %v10591_v4, 16 }
  0xe0   : > { %v734_v44 = vrot.slane %v13812_v55, 1  ;;  %13813 = vst [vmem:[#allocation38_spill] sm:$0xff] %v11277_v30  ;;  %v9401_v55 = vld [vmem:[%s13669_s1 + $0xaac] ss:$40 sps:$4 sm:$0xff]  }
  0xe1   : > { %5010 = vmatmul.mubr.bf16.vlgmr.msra.gmra.mrb[0].mxu0 %v11253_v31  ;;  %5236 = vmatmul.mubr.bf16.vlgmr.msra.gmra.mrb[32].mxu1 %v10558_v40  ;;  %v735_v1 = vrot.slane %v13814_v43, 2  ;;  %v9404_v40 = vld [vmem:[%s13669_s1 + $0xb4] ss:$40 sps:$4 sm:$0xff]   ;;  %v13817_v43 = vshll.u32 %v10591_v4, 16 }
  0xe2   : > { %5317 = vmatpush1.bf16.msra.mxu1 %v9387_v38  ;;  %5543 = vmatpush1.bf16.msra.mxu0 %v9390_v8  ;;  %v9402_v38 = vld [vmem:[%s13669_s1 + $0xb0] ss:$40 sps:$4 sm:$0xff]  }
  0xe3   : > { %5318 = vmatprep.subr.bf16.mxu1 %v9395_v32  ;;  %5544 = vmatprep.subr.bf16.mxu0 %v9398_v41  ;;  %v736_v8 = vor.u32 %v735_v1, %v734_v44  ;;  %v11296_v32 = vsel %vm707_vm1, %v713_v42, %v724_v46  ;;  %v730_v41 = vrot.slane %v13816_v56, 1  ;;  %v9410_v44 = vld [vmem:[%s13669_s1 + $0x104] ss:$40 sps:$4 sm:$0xff]   ;;  %v9408_v1 = vld [vmem:[%s13669_s1 + $0x100] ss:$40 sps:$4 sm:$0xff]  }
  0xe4   : > { %5019 = vmatprep.mubr.bf16.mxu0 %v11277_v30  ;;  %5245 = vmatprep.mubr.bf16.mxu1 %v10321_v50  ;;  %13815 = vst [vmem:[#allocation39_spill] sm:$0xff] %v11296_v32  ;;  %v731_v50 = vrot.slane %v13817_v43, 2 }
  0xe6   : > { %5319 = vmatpush1.bf16.msra.mxu1 %v9393_v61  ;;  %5545 = vmatpush1.bf16.msra.mxu0 %v9396_v10  ;;  %v13818_v61 = vshrl.u32 %v10611_v3, 16  ;;  %v9405_v10 = vld [vmem:[%s13669_s1 + $0xaf8] ss:$40 sps:$4 sm:$0xff]   ;;  %v732_v43 = vor.u32 %v731_v50, %v730_v41  ;;  %v13821_v41 = vshrl.u32 %v10646_v48, 16 }
  0xe7   : > { %5320 = vmatprep.subr.bf16.mxu1 %v9401_v55  ;;  %5546 = vmatprep.subr.bf16.mxu0 %v9404_v40  ;;  %v11319_v40 = vsel %vm707_vm1, %v728_v39, %v736_v8  ;;  %v13820_v55 = vshll.u32 %v10611_v3, 16  ;;  %v9411_v39 = vld [vmem:[%s13669_s1 + $0xb48] ss:$40 sps:$4 sm:$0xff]  }
  0xe8   : > { %v742_v42 = vrot.slane %v13818_v61, 1  ;;  %13819 = vst [vmem:[#allocation40_spill] sm:$0xff] %v11319_v40  ;;  %v9413_v61 = vld [vmem:[%s13669_s1 + $0xb4c] ss:$40 sps:$4 sm:$0xff]   ;;  %v9414_v50 = vld [vmem:[%s13669_s1 + $0x150] ss:$40 sps:$4 sm:$0xff]  }
  0xe9   : > { %5020 = vmatmul.mubr.bf16.gmra.mrb[4].mxu0 %v11296_v32  ;;  %5246 = vmatmul.mubr.bf16.gmra.mrb[36].mxu1 %v10614_v5  ;;  %v743_v56 = vrot.slane %v13820_v55, 2  ;;  %v9416_v5 = vld [vmem:[%s13669_s1 + $0x154] ss:$40 sps:$4 sm:$0xff]   ;;  %v13822_v55 = vshll.u32 %v10646_v48, 16 }
  0xea   : > { %5321 = vmatpush1.bf16.msra.mxu1 %v9399_v15  ;;  %5547 = vmatpush1.bf16.msra.mxu0 %v9402_v38  ;;  %v11338_v38 = vsel %vm707_vm1, %v724_v46, %v732_v43 }
  0xeb   : > { %5322 = vmatprep.subr.bf16.mxu1 %v9407_v60  ;;  %5548 = vmatprep.subr.bf16.mxu0 %v9410_v44  ;;  %v744_v15 = vor.u32 %v743_v56, %v742_v42  ;;  %v9419_v60 = vld [vmem:[%s13669_s1 + $0xb9c] ss:$40 sps:$4 sm:$0xff]   ;;  %v738_v44 = vrot.slane %v13821_v41, 1  ;;  %v9420_v56 = vld [vmem:[%s13669_s1 + $0x1a0] ss:$40 sps:$4 sm:$0xff]  }
  0xec   : > { %5029 = vmatprep.mubr.bf16.mxu0 %v11319_v40  ;;  %5255 = vmatprep.mubr.bf16.mxu1 %v10634_v11  ;;  %v739_v11 = vrot.slane %v13822_v55, 2  ;;  %v9422_v42 = vld [vmem:[%s13669_s1 + $0x1a4] ss:$40 sps:$4 sm:$0xff]  }
  0xee   : > { %5323 = vmatpush1.bf16.msra.mxu1 %v9405_v10  ;;  %5549 = vmatpush1.bf16.msra.mxu0 %v9408_v1  ;;  %v13823_v10 = vshrl.u32 %v10665_v54, 16  ;;  %v9417_v1 = vld [vmem:[%s13669_s1 + $0xb98] ss:$40 sps:$4 sm:$0xff]   ;;  %v740_v55 = vor.u32 %v739_v11, %v738_v44  ;;  %v13826_v44 = vshrl.u32 %v10700_v9, 16 }
  0xef   : > { %5324 = vmatprep.subr.bf16.mxu1 %v9413_v61  ;;  %5550 = vmatprep.subr.bf16.mxu0 %v9416_v5  ;;  %v11361_v5 = vsel %vm707_vm1, %v736_v8, %v744_v15  ;;  %v13825_v61 = vshll.u32 %v10665_v54, 16  ;;  %v9423_v8 = vld [vmem:[%s13669_s1 + $0xbe8] ss:$40 sps:$4 sm:$0xff]  }
  0xf0   : > { %v750_v46 = vrot.slane %v13823_v10, 1  ;;  %13824 = vst [vmem:[#allocation41_spill] sm:$0xff] %v11361_v5  ;;  %v9425_v10 = vld [vmem:[%s13669_s1 + $0xbec] ss:$40 sps:$4 sm:$0xff]   ;;  %v9426_v11 = vld [vmem:[%s13669_s1 + $0x1f0] ss:$40 sps:$4 sm:$0xff]  }
  0xf1   : > { %5030 = vmatmul.mubr.bf16.gmra.mrb[8].mxu0 %v11338_v38  ;;  %5256 = vmatmul.mubr.bf16.gmra.mrb[40].mxu1 %v10668_v57  ;;  %v751_v41 = vrot.slane %v13825_v61, 2  ;;  %v9428_v57 = vld [vmem:[%s13669_s1 + $0x1f4] ss:$40 sps:$4 sm:$0xff]   ;;  %v13827_v61 = vshll.u32 %v10700_v9, 16 }
  0xf2   : > { %5325 = vmatpush1.bf16.msra.mxu1 %v9411_v39  ;;  %5551 = vmatpush1.bf16.msra.mxu0 %v9414_v50  ;;  %v11380_v50 = vsel %vm707_vm1, %v732_v43, %v740_v55 }
  0xf3   : > { %5326 = vmatprep.subr.bf16.mxu1 %v9419_v60  ;;  %5552 = vmatprep.subr.bf16.mxu0 %v9422_v42  ;;  %v752_v39 = vor.u32 %v751_v41, %v750_v46  ;;  %v9431_v60 = vld [vmem:[%s13669_s1 + $0xc3c] ss:$40 sps:$4 sm:$0xff]   ;;  %v746_v42 = vrot.slane %v13826_v44, 1  ;;  %v9432_v41 = vld [vmem:[%s13669_s1 + $0x240] ss:$40 sps:$4 sm:$0xff]  }
  0xf4   : > { %5039 = vmatprep.mubr.bf16.mxu0 %v11361_v5  ;;  %5265 = vmatprep.mubr.bf16.mxu1 %v10688_v12  ;;  %v747_v12 = vrot.slane %v13827_v61, 2  ;;  %v9434_v46 = vld [vmem:[%s13669_s1 + $0x244] ss:$40 sps:$4 sm:$0xff]  }
  0xf6   : > { %5327 = vmatpush1.bf16.msra.mxu1 %v9417_v1  ;;  %5553 = vmatpush1.bf16.msra.mxu0 %v9420_v56  ;;  %v13828_v1 = vshrl.u32 %v10719_v51, 16  ;;  %v9429_v56 = vld [vmem:[%s13669_s1 + $0xc38] ss:$40 sps:$4 sm:$0xff]   ;;  %v748_v61 = vor.u32 %v747_v12, %v746_v42  ;;  %v13831_v42 = vshrl.u32 %v10754_v14, 16 }
  0xf7   : > { %5328 = vmatprep.subr.bf16.mxu1 %v9425_v10  ;;  %5554 = vmatprep.subr.bf16.mxu0 %v9428_v57  ;;  %v11403_v57 = vsel %vm707_vm1, %v744_v15, %v752_v39  ;;  %v13830_v10 = vshll.u32 %v10719_v51, 16  ;;  %v9435_v15 = vld [vmem:[%s13669_s1 + $0xc88] ss:$40 sps:$4 sm:$0xff]  }
  0xf8   : > { %v758_v43 = vrot.slane %v13828_v1, 1  ;;  %13829 = vst [vmem:[#allocation42_spill] sm:$0xff] %v11403_v57  ;;  %v9437_v1 = vld [vmem:[%s13669_s1 + $0xc8c] ss:$40 sps:$4 sm:$0xff]   ;;  %v9438_v12 = vld [vmem:[%s13669_s1 + $0x290] ss:$40 sps:$4 sm:$0xff]  }
  0xf9   : > { %5040 = vmatmul.mubr.bf16.gmra.mrb[12].mxu0 %v11380_v50  ;;  %5266 = vmatmul.mubr.bf16.gmra.mrb[44].mxu1 %v10722_v13  ;;  %v759_v44 = vrot.slane %v13830_v10, 2  ;;  %v9440_v13 = vld [vmem:[%s13669_s1 + $0x294] ss:$40 sps:$4 sm:$0xff]   ;;  %v13832_v10 = vshll.u32 %v10754_v14, 16 }
  0xfa   : > { %5329 = vmatpush1.bf16.msra.mxu1 %v9423_v8  ;;  %5555 = vmatpush1.bf16.msra.mxu0 %v9426_v11  ;;  %v11422_v11 = vsel %vm707_vm1, %v740_v55, %v748_v61 }
  0xfb   : > { %5330 = vmatprep.subr.bf16.mxu1 %v9431_v60  ;;  %5556 = vmatprep.subr.bf16.mxu0 %v9434_v46  ;;  %v760_v8 = vor.u32 %v759_v44, %v758_v43  ;;  %v9443_v60 = vld [vmem:[%s13669_s1 + $0xcdc] ss:$40 sps:$4 sm:$0xff]   ;;  %v754_v46 = vrot.slane %v13831_v42, 1  ;;  %v9444_v44 = vld [vmem:[%s13669_s1 + $0x2e0] ss:$40 sps:$4 sm:$0xff]  }
  0xfc   : > { %5049 = vmatprep.mubr.bf16.mxu0 %v11403_v57  ;;  %5275 = vmatprep.mubr.bf16.mxu1 %v10742_v62  ;;  %v755_v62 = vrot.slane %v13832_v10, 2  ;;  %v9446_v43 = vld [vmem:[%s13669_s1 + $0x2e4] ss:$40 sps:$4 sm:$0xff]  }
  0xfe   : > { %5331 = vmatpush1.bf16.msra.mxu1 %v9429_v56  ;;  %5557 = vmatpush1.bf16.msra.mxu0 %v9432_v41  ;;  %v13833_v56 = vshrl.u32 %v10773_v20, 16  ;;  %v9441_v41 = vld [vmem:[%s13669_s1 + $0xcd8] ss:$40 sps:$4 sm:$0xff]   ;;  %v756_v10 = vor.u32 %v755_v62, %v754_v46  ;;  %v9447_v62 = vld [vmem:[%s13669_s1 + $0xd28] ss:$40 sps:$4 sm:$0xff]  }
  0xff   : > { %5332 = vmatprep.subr.bf16.mxu1 %v9437_v1  ;;  %5558 = vmatprep.subr.bf16.mxu0 %v9440_v13  ;;  %v11445_v13 = vsel %vm707_vm1, %v752_v39, %v760_v8  ;;  %v13835_v1 = vshll.u32 %v10773_v20, 16  ;;  %v776_v39 = vshrl.u32 %v10827_v24, 16  ;;  %v9455_v46 = vld [vmem:[%s13669_s1 + $0xd7c] ss:$40 sps:$4 sm:$0xff]  }
 0x100   : > { %v766_v55 = vrot.slane %v13833_v56, 1  ;;  %13834 = vst [vmem:[#allocation43_spill] sm:$0xff] %v11445_v13  ;;  %v9449_v56 = vld [vmem:[%s13669_s1 + $0xd2c] ss:$40 sps:$4 sm:$0xff]  }
 0x101   : > { %5050 = vmatmul.mubr.bf16.gmra.mrb[16].mxu0 %v11422_v11  ;;  %5276 = vmatmul.mubr.bf16.gmra.mrb[48].mxu1 %v10776_v53  ;;  %v767_v42 = vrot.slane %v13835_v1, 2  ;;  %v9452_v53 = vld [vmem:[%s13669_s1 + $0x334] ss:$40 sps:$4 sm:$0xff]  }
 0x102   : > { %5333 = vmatpush1.bf16.msra.mxu1 %v9435_v15  ;;  %5559 = vmatpush1.bf16.msra.mxu0 %v9438_v12  ;;  %v9450_v15 = vld [vmem:[%s13669_s1 + $0x330] ss:$40 sps:$4 sm:$0xff]  }
 0x103   : > { %5334 = vmatprep.subr.bf16.mxu1 %v9443_v60  ;;  %5560 = vmatprep.subr.bf16.mxu0 %v9446_v43  ;;  %v768_v12 = vor.u32 %v767_v42, %v766_v55  ;;  %v11465_v60 = vsel %vm707_vm1, %v748_v61, %v756_v10  ;;  %v13836_v43 = vshrl.u32 %v10808_v6, 16  ;;  %v9458_v55 = vld [vmem:[%s13669_s1 + $0x384] ss:$40 sps:$4 sm:$0xff]   ;;  %v9453_v61 = vld [vmem:[%s13669_s1 + $0xd78] ss:$40 sps:$4 sm:$0xff]  }
 0x104   : > { %5059 = vmatprep.mubr.bf16.mxu0 %v11445_v13  ;;  %5285 = vmatprep.mubr.bf16.mxu1 %v10796_v7  ;;  %v13837_v7 = vshll.u32 %v10808_v6, 16 }
 0x105   : > { %v762_v1 = vrot.slane %v13836_v43, 1  ;;  %v770_v43 = vshrl.u32 %v10862_v16, 16 }
 0x106   : > { %5335 = vmatpush1.bf16.msra.mxu1 %v9441_v41  ;;  %5561 = vmatpush1.bf16.msra.mxu0 %v9444_v44  ;;  %v763_v13 = vrot.slane %v13837_v7, 2  ;;  %v778_v41 = vrot.slane %v776_v39, 1  ;;  %v9456_v44 = vld [vmem:[%s13669_s1 + $0x380] ss:$40 sps:$4 sm:$0xff]   ;;  %v11486_v7 = vsel %vm707_vm1, %v760_v8, %v768_v12  ;;  %v9461_v39 = vld [vmem:[%s13669_s1 + $0xdcc] ss:$40 sps:$4 sm:$0xff]  }
 0x107   : > { %5336 = vmatprep.subr.bf16.mxu1 %v9449_v56  ;;  %5562 = vmatprep.subr.bf16.mxu0 %v9452_v53  ;;  %v13838_v53 = vshll.u32 %v10827_v24, 16  ;;  %v9459_v24 = vld [vmem:[%s13669_s1 + $0xdc8] ss:$40 sps:$4 sm:$0xff]  }
 0x108   : > { %v764_v56 = vor.u32 %v763_v13, %v762_v1  ;;  %v9462_v8 = vld [vmem:[%s13669_s1 + $0x3d0] ss:$40 sps:$4 sm:$0xff]   ;;  %v13839_v1 = vshll.u32 %v10862_v16, 16 }
 0x109   : > { %5060 = vmatmul.mubr.bf16.gmra.mrb[20].mxu0 %v11465_v60  ;;  %5286 = vmatmul.mubr.bf16.gmra.mrb[52].mxu1 %v10830_v25  ;;  %v779_v42 = vrot.slane %v13838_v53, 2  ;;  %v9464_v25 = vld [vmem:[%s13669_s1 + $0x3d4] ss:$40 sps:$4 sm:$0xff]   ;;  %v9470_v53 = vld [vmem:[%s13669_s1 + $0x424] ss:$40 sps:$4 sm:$0xff]  }
 0x10a   : > { %5337 = vmatpush1.bf16.msra.mxu1 %v9447_v62  ;;  %5563 = vmatpush1.bf16.msra.mxu0 %v9450_v15  ;;  %v11506_v62 = vsel %vm707_vm1, %v756_v10, %v764_v56  ;;  %v9467_v15 = vld [vmem:[%s13669_s1 + $0xe1c] ss:$40 sps:$4 sm:$0xff]   ;;  %v9465_v10 = vld [vmem:[%s13669_s1 + $0xe18] ss:$40 sps:$4 sm:$0xff]  }
 0x10b   : > { %5338 = vmatprep.subr.bf16.mxu1 %v9455_v46  ;;  %5564 = vmatprep.subr.bf16.mxu0 %v9458_v55  ;;  %v780_v13 = vor.u32 %v779_v42, %v778_v41  ;;  %v772_v46 = vrot.slane %v770_v43, 1  ;;  %v773_v55 = vrot.slane %v13839_v1, 2  ;;  %v9468_v41 = vld [vmem:[%s13669_s1 + $0x420] ss:$40 sps:$4 sm:$0xff]   ;;  %v9474_v42 = vld [vmem:[%s13669_s1 + $0x470] ss:$40 sps:$4 sm:$0xff]  }
 0x10c   : > { %5069 = vmatprep.mubr.bf16.mxu0 %v11486_v7  ;;  %5295 = vmatprep.mubr.bf16.mxu1 %v10850_v27  ;;  %v9479_v43 = vld [vmem:[%s13669_s1 + $0xebc] ss:$40 sps:$4 sm:$0xff]   ;;  %v9486_v1 = vld [vmem:[%s13669_s1 + $0x510] ss:$40 sps:$4 sm:$0xff]  }
 0x10d   : > { %v11525_v16 = vsel %vm707_vm1, %v768_v12, %v780_v13  ;;  %v9471_v12 = vld [vmem:[%s13669_s1 + $0xe68] ss:$40 sps:$4 sm:$0xff]   ;;  %v9485_v13 = vld [vmem:[%s13669_s1 + $0xf0c] ss:$40 sps:$4 sm:$0xff]  }
 0x10e   : > { %5339 = vmatpush1.bf16.msra.mxu1 %v9453_v61  ;;  %5565 = vmatpush1.bf16.msra.mxu0 %v9456_v44  ;;  %v9473_v61 = vld [vmem:[%s13669_s1 + $0xe6c] ss:$40 sps:$4 sm:$0xff]  }
 0x10f   : > { %5340 = vmatprep.subr.bf16.mxu1 %v9461_v39  ;;  %5566 = vmatprep.subr.bf16.mxu0 %v9464_v25  ;;  %v774_v25 = vor.u32 %v773_v55, %v772_v46  ;;  %v9476_v44 = vld [vmem:[%s13669_s1 + $0x474] ss:$40 sps:$4 sm:$0xff]   ;;  %v9483_v46 = vld [vmem:[%s13669_s1 + $0xf08] ss:$40 sps:$4 sm:$0xff]  }
 0x110   : > { %v9491_v55 = vld [vmem:[%s13669_s1 + $0xf5c] ss:$40 sps:$4 sm:$0xff]  }
 0x111   : > { %5070 = vmatmul.mubr.bf16.gmra.mrb[24].mxu0 %v11506_v62  ;;  %5296 = vmatmul.mubr.bf16.gmra.mrb[56].mxu1 %v10880_v29  ;;  %v11542_v39 = vsel %vm707_vm1, %v764_v56, %v774_v25  ;;  %v9480_v56 = vld [vmem:[%s13669_s1 + $0x4c0] ss:$40 sps:$4 sm:$0xff]   ;;  %v9497_v25 = vld [vmem:[%s13669_s1 + $0xfac] ss:$40 sps:$4 sm:$0xff]  }
 0x112   : > { %5341 = vmatpush1.bf16.msra.mxu1 %v9459_v24  ;;  %5567 = vmatpush1.bf16.msra.mxu0 %v9462_v8  ;;  %v9482_v24 = vld [vmem:[%s13669_s1 + $0x4c4] ss:$40 sps:$4 sm:$0xff]   ;;  %v9477_v8 = vld [vmem:[%s13669_s1 + $0xeb8] ss:$40 sps:$4 sm:$0xff]  }
 0x113   : > { %5342 = vmatprep.subr.bf16.mxu1 %v9467_v15  ;;  %5568 = vmatprep.subr.bf16.mxu0 %v9470_v53  ;;  %v9488_v15 = vld [vmem:[%s13669_s1 + $0x514] ss:$40 sps:$4 sm:$0xff]   ;;  %v9494_v53 = vld [vmem:[%s13669_s1 + $0x564] ss:$40 sps:$4 sm:$0xff]  }
 0x114   : > { %5079 = vmatprep.mubr.bf16.mxu0 %v11525_v16  ;;  %5305 = vmatprep.mubr.bf16.mxu1 %v10899_v47 }
 0x116   : > { %5343 = vmatpush1.bf16.msra.mxu1 %v9465_v10  ;;  %5569 = vmatpush1.bf16.msra.mxu0 %v9468_v41  ;;  %v9489_v10 = vld [vmem:[%s13669_s1 + $0xf58] ss:$40 sps:$4 sm:$0xff]  }
 0x117   : > { %5344 = vmatprep.subr.bf16.mxu1 %v9473_v61  ;;  %5570 = vmatprep.subr.bf16.mxu0 %v9476_v44  ;;  %v9492_v41 = vld [vmem:[%s13669_s1 + $0x560] ss:$40 sps:$4 sm:$0xff]   ;;  %v9500_v61 = vld [vmem:[%s13669_s1 + $0x5b4] ss:$40 sps:$4 sm:$0xff]  }
 0x118   : > { %v9495_v44 = vld [vmem:[%s13669_s1 + $0xfa8] ss:$40 sps:$4 sm:$0xff]  }
 0x119   : > { %5080 = vmatmul.mubr.bf16.gmra.mrb[28].mxu0 %v11542_v39  ;;  %5306 = vmatmul.mubr.bf16.gmra.mrb[60].mxu1 %v10922_v28 }
 0x11a   : > { %5345 = vmatpush1.bf16.msra.mxu1 %v9471_v12  ;;  %5571 = vmatpush1.bf16.msra.mxu0 %v9474_v42  ;;  %v9498_v12 = vld [vmem:[%s13669_s1 + $0x5b0] ss:$40 sps:$4 sm:$0xff]   ;;  %v9503_v42 = vld [vmem:[%s13669_s1 + $0xffc] ss:$40 sps:$4 sm:$0xff]  }
 0x11b   : > { %5346 = vmatprep.subr.bf16.mxu1 %v9479_v43  ;;  %5572 = vmatprep.subr.bf16.mxu0 %v9482_v24  ;;  %v9506_v43 = vld [vmem:[%s13669_s1 + $0x604] ss:$40 sps:$4 sm:$0xff]   ;;  %v9501_v24 = vld [vmem:[%s13669_s1 + $0xff8] ss:$40 sps:$4 sm:$0xff]  }
 0x11c   : > { %5348 = vmatprep.mubr.bf16.mxu1 %v10939_v18  ;;  %5574 = vmatprep.mubr.bf16.mxu0 %v10286_v34 }
 0x11e   : > { %5347 = vmatpush1.bf16.msra.mxu1 %v9477_v8  ;;  %5573 = vmatpush1.bf16.msra.mxu0 %v9480_v56  ;;  %v9504_v8 = vld [vmem:[%s13669_s1 + $0x600] ss:$40 sps:$4 sm:$0xff]   ;;  %v9509_v56 = vld [vmem:[%s13669_s1 + $0x104c] ss:$40 sps:$4 sm:$0xff]  }
 0x11f   : > { %5429 = vmatprep.subr.bf16.mxu1 %v9485_v13  ;;  %5655 = vmatprep.subr.bf16.mxu0 %v9488_v15  ;;  %v9512_v13 = vld [vmem:[%s13669_s1 + $0x654] ss:$40 sps:$4 sm:$0xff]   ;;  %v9507_v15 = vld [vmem:[%s13669_s1 + $0x1048] ss:$40 sps:$4 sm:$0xff]  }
 0x121   : > { %5349 = vmatmul.mubr.bf16.vlgmr.msra.gmra.mrb[32].mxu1 %v10959_v33  ;;  %5575 = vmatmul.mubr.bf16.vlgmr.msra.gmra.mrb[32].mxu0 %v10479_v52 }
 0x122   : > { %5430 = vmatpush1.bf16.msra.mxu1 %v9483_v46  ;;  %5656 = vmatpush1.bf16.msra.mxu0 %v9486_v1  ;;  %v9510_v46 = vld [vmem:[%s13669_s1 + $0x650] ss:$40 sps:$4 sm:$0xff]   ;;  %v9515_v1 = vld [vmem:[%s13669_s1 + $0x109c] ss:$40 sps:$4 sm:$0xff]  }
 0x123   : > { %5431 = vmatprep.subr.bf16.mxu1 %v9491_v55  ;;  %5657 = vmatprep.subr.bf16.mxu0 %v9494_v53  ;;  %v9518_v55 = vld [vmem:[%s13669_s1 + $0x6a4] ss:$40 sps:$4 sm:$0xff]   ;;  %v9513_v53 = vld [vmem:[%s13669_s1 + $0x1098] ss:$40 sps:$4 sm:$0xff]  }
 0x124   : > { %5358 = vmatprep.mubr.bf16.mxu1 %v10976_v58  ;;  %5584 = vmatprep.mubr.bf16.mxu0 %v10288_v35 }
 0x126   : > { %5432 = vmatpush1.bf16.msra.mxu1 %v9489_v10  ;;  %5658 = vmatpush1.bf16.msra.mxu0 %v9492_v41  ;;  %v9516_v10 = vld [vmem:[%s13669_s1 + $0x6a0] ss:$40 sps:$4 sm:$0xff]   ;;  %v9521_v41 = vld [vmem:[%s13669_s1 + $0x10ec] ss:$40 sps:$4 sm:$0xff]  }
 0x127   : > { %5433 = vmatprep.subr.bf16.mxu1 %v9497_v25  ;;  %5659 = vmatprep.subr.bf16.mxu0 %v9500_v61  ;;  %v9524_v25 = vld [vmem:[%s13669_s1 + $0x6f4] ss:$40 sps:$4 sm:$0xff]   ;;  %v9519_v61 = vld [vmem:[%s13669_s1 + $0x10e8] ss:$40 sps:$4 sm:$0xff]  }
 0x129   : > { %5359 = vmatmul.mubr.bf16.gmra.mrb[36].mxu1 %v10995_v26  ;;  %5585 = vmatmul.mubr.bf16.gmra.mrb[36].mxu0 %v10495_v2 }
 0x12a   : > { %5434 = vmatpush1.bf16.msra.mxu1 %v9495_v44  ;;  %5660 = vmatpush1.bf16.msra.mxu0 %v9498_v12  ;;  %v9522_v44 = vld [vmem:[%s13669_s1 + $0x6f0] ss:$40 sps:$4 sm:$0xff]  }
 0x12b   : > { %5435 = vmatprep.subr.bf16.mxu1 %v9503_v42  ;;  %5661 = vmatprep.subr.bf16.mxu0 %v9506_v43 }
 0x12c   : > { %5368 = vmatprep.mubr.bf16.mxu1 %v11012_v21  ;;  %5594 = vmatprep.mubr.bf16.mxu0 %v10290_v36 }
 0x12e   : > { %5436 = vmatpush1.bf16.msra.mxu1 %v9501_v24  ;;  %5662 = vmatpush1.bf16.msra.mxu0 %v9504_v8  ;;  %v9527_v24 = vld [vmem:[%s13669_s1 + $0x113c] ss:$40 sps:$4 sm:$0xff]  }
 0x12f   : > { %5437 = vmatprep.subr.bf16.mxu1 %v9509_v56  ;;  %5663 = vmatprep.subr.bf16.mxu0 %v9512_v13  ;;  %v9530_v8 = vld [vmem:[%s13669_s1 + $0x744] ss:$40 sps:$4 sm:$0xff]   ;;  %v9525_v13 = vld [vmem:[%s13669_s1 + $0x1138] ss:$40 sps:$4 sm:$0xff]  }
 0x131   : > { %5369 = vmatmul.mubr.bf16.gmra.mrb[40].mxu1 %v11031_v23  ;;  %5595 = vmatmul.mubr.bf16.gmra.mrb[40].mxu0 %v10519_v63 }
 0x132   : > { %5438 = vmatpush1.bf16.msra.mxu1 %v9507_v15  ;;  %5664 = vmatpush1.bf16.msra.mxu0 %v9510_v46  ;;  %v9528_v15 = vld [vmem:[%s13669_s1 + $0x740] ss:$40 sps:$4 sm:$0xff]   ;;  %v9533_v46 = vld [vmem:[%s13669_s1 + $0x118c] ss:$40 sps:$4 sm:$0xff]  }
 0x133   : > { %5439 = vmatprep.subr.bf16.mxu1 %v9515_v1  ;;  %5665 = vmatprep.subr.bf16.mxu0 %v9518_v55  ;;  %v9536_v1 = vld [vmem:[%s13669_s1 + $0x794] ss:$40 sps:$4 sm:$0xff]   ;;  %v9531_v55 = vld [vmem:[%s13669_s1 + $0x1188] ss:$40 sps:$4 sm:$0xff]  }
 0x134   : > { %5378 = vmatprep.mubr.bf16.mxu1 %v11048_v17  ;;  %5604 = vmatprep.mubr.bf16.mxu0 %v10553_v37  ;;  %v11656_v12 = vpop.f32.mrb[0].mxu1 }
 0x135   : > { %v11658_v42 = vpop.f32.mrb[1].mxu1 }
 0x136   : > { %5440 = vmatpush1.bf16.msra.mxu1 %v9513_v53  ;;  %5666 = vmatpush1.bf16.msra.mxu0 %v9516_v10  ;;  %v11660_v43 = vpop.f32.mrb[2].mxu1  ;;  %v9534_v53 = vld [vmem:[%s13669_s1 + $0x790] ss:$40 sps:$4 sm:$0xff]  }
 0x137   : > { %5441 = vmatprep.subr.bf16.mxu1 %v9521_v41  ;;  %5667 = vmatprep.subr.bf16.mxu0 %v9524_v25  ;;  %v11668_v56 = vpop.f32.mrb[3].mxu1 }
 0x139   : > { %5379 = vmatmul.mubr.bf16.gmra.mrb[44].mxu1 %v11067_v59  ;;  %5605 = vmatmul.mubr.bf16.gmra.mrb[44].mxu0 %v10591_v4 }
 0x13a   : > { %5442 = vmatpush1.bf16.msra.mxu1 %v9519_v61  ;;  %5668 = vmatpush1.bf16.msra.mxu0 %v9522_v44  ;;  %v9539_v61 = vld [vmem:[%s13669_s1 + $0x11dc] ss:$40 sps:$4 sm:$0xff]  }
 0x13b   : > { %5443 = vmatprep.subr.bf16.mxu1 %v9527_v24  ;;  %5669 = vmatprep.subr.bf16.mxu0 %v9530_v8  ;;  %v9542_v44 = vld [vmem:[%s13669_s1 + $0x7e4] ss:$40 sps:$4 sm:$0xff]   ;;  %v9537_v8 = vld [vmem:[%s13669_s1 + $0x11d8] ss:$40 sps:$4 sm:$0xff]  }
 0x13c   : > { %5388 = vmatprep.mubr.bf16.mxu1 %v11084_v22  ;;  %5614 = vmatprep.mubr.bf16.mxu0 %v10611_v3  ;;  %v11692_v10 = vpop.f32.mrb[4].mxu1 }
 0x13d   : > { %v11694_v41 = vpop.f32.mrb[5].mxu1 }
 0x13e   : > { %5444 = vmatpush1.bf16.msra.mxu1 %v9525_v13  ;;  %5670 = vmatpush1.bf16.msra.mxu0 %v9528_v15  ;;  %v11696_v25 = vpop.f32.mrb[6].mxu1  ;;  %v9540_v13 = vld [vmem:[%s13669_s1 + $0x7e0] ss:$40 sps:$4 sm:$0xff]   ;;  %v9545_v15 = vld [vmem:[%s13669_s1 + $0x122c] ss:$40 sps:$4 sm:$0xff]  }
 0x13f   : > { %5445 = vmatprep.subr.bf16.mxu1 %v9533_v46  ;;  %5671 = vmatprep.subr.bf16.mxu0 %v9536_v1  ;;  %v11704_v24 = vpop.f32.mrb[7].mxu1  ;;  %v9548_v46 = vld [vmem:[%s13669_s1 + $0x834] ss:$40 sps:$4 sm:$0xff]   ;;  %v9543_v1 = vld [vmem:[%s13669_s1 + $0x1228] ss:$40 sps:$4 sm:$0xff]  }
 0x141   : > { %5389 = vmatmul.mubr.bf16.gmra.mrb[48].mxu1 %v11103_v19  ;;  %5615 = vmatmul.mubr.bf16.gmra.mrb[48].mxu0 %v10646_v48 }
 0x142   : > { %5446 = vmatpush1.bf16.msra.mxu1 %v9531_v55  ;;  %5672 = vmatpush1.bf16.msra.mxu0 %v9534_v53  ;;  %v9546_v55 = vld [vmem:[%s13669_s1 + $0x830] ss:$40 sps:$4 sm:$0xff]  }
 0x143   : > { %5447 = vmatprep.subr.bf16.mxu1 %v9539_v61  ;;  %5673 = vmatprep.subr.bf16.mxu0 %v9542_v44 }
 0x144   : > { %5398 = vmatprep.mubr.bf16.mxu1 %v11120_v45  ;;  %5624 = vmatprep.mubr.bf16.mxu0 %v10665_v54  ;;  %v11728_v53 = vpop.f32.mrb[8].mxu1  ;;  %v9551_v54 = vld [vmem:[%s13669_s1 + $0x127c] ss:$40 sps:$4 sm:$0xff]  }
 0x145   : > { %v11730_v61 = vpop.f32.mrb[9].mxu1  ;;  %v9554_v45 = vld [vmem:[%s13669_s1 + $0x884] ss:$40 sps:$4 sm:$0xff]  }
 0x146   : > { %13840 = vst [vmem:[#allocation44_spill] sm:$0xff] %v11730_v61  ;;  %5448 = vmatpush1.bf16.msra.mxu1 %v9537_v8  ;;  %5674 = vmatpush1.bf16.msra.mxu0 %v9540_v13  ;;  %v11732_v44 = vpop.f32.mrb[10].mxu1  ;;  %v9549_v61 = vld [vmem:[%s13669_s1 + $0x1278] ss:$40 sps:$4 sm:$0xff]   ;;  %v13842_v13 = vld [vmem:[#allocation32_spill] sm:$0xff] }
 0x147   : > { %5449 = vmatprep.subr.bf16.mxu1 %v9545_v15  ;;  %5675 = vmatprep.subr.bf16.mxu0 %v9548_v46  ;;  %v11740_v48 = vpop.f32.mrb[11].mxu1  ;;  %v9552_v8 = vld [vmem:[%s13669_s1 + $0x880] ss:$40 sps:$4 sm:$0xff]   ;;  %v9557_v15 = vld [vmem:[%s13669_s1 + $0x12cc] ss:$40 sps:$4 sm:$0xff]  }
 0x148   : > { %13841 = vst [vmem:[#allocation45_spill] sm:$0xff] %v11740_v48  ;;  %v9560_v46 = vld [vmem:[%s13669_s1 + $0x8d4] ss:$40 sps:$4 sm:$0xff]  }
 0x149   : > { %5399 = vmatmul.mubr.bf16.gmra.mrb[52].mxu1 %v13842_v13  ;;  %5625 = vmatmul.mubr.bf16.gmra.mrb[52].mxu0 %v10700_v9  ;;  %v13843_v48 = vld [vmem:[#allocation33_spill] sm:$0xff] }
 0x14a   : > { %5450 = vmatpush1.bf16.msra.mxu1 %v9543_v1  ;;  %5676 = vmatpush1.bf16.msra.mxu0 %v9546_v55  ;;  %v9555_v9 = vld [vmem:[%s13669_s1 + $0x12c8] ss:$40 sps:$4 sm:$0xff]  }
 0x14b   : > { %5451 = vmatprep.subr.bf16.mxu1 %v9551_v54  ;;  %5677 = vmatprep.subr.bf16.mxu0 %v9554_v45  ;;  %v9558_v54 = vld [vmem:[%s13669_s1 + $0x8d0] ss:$40 sps:$4 sm:$0xff]  }
 0x14c   : > { %5408 = vmatprep.mubr.bf16.mxu1 %v13843_v48  ;;  %5634 = vmatprep.mubr.bf16.mxu0 %v10719_v51  ;;  %v11764_v45 = vpop.f32.mrb[12].mxu1  ;;  %v9563_v51 = vld [vmem:[%s13669_s1 + $0x131c] ss:$40 sps:$4 sm:$0xff]  }
 0x14d   : > { %v11766_v1 = vpop.f32.mrb[13].mxu1  ;;  %v9566_v48 = vld [vmem:[%s13669_s1 + $0x924] ss:$40 sps:$4 sm:$0xff]  }
 0x14e   : > { %13844 = vst [vmem:[#allocation46_spill] sm:$0xff] %v11766_v1  ;;  %5452 = vmatpush1.bf16.msra.mxu1 %v9549_v61  ;;  %5678 = vmatpush1.bf16.msra.mxu0 %v9552_v8  ;;  %v11768_v55 = vpop.f32.mrb[14].mxu1  ;;  %v9561_v1 = vld [vmem:[%s13669_s1 + $0x1318] ss:$40 sps:$4 sm:$0xff]  }
 0x14f   : > { %5453 = vmatprep.subr.bf16.mxu1 %v9557_v15  ;;  %5679 = vmatprep.subr.bf16.mxu0 %v9560_v46  ;;  %v11776_v13 = vpop.f32.mrb[15].mxu1  ;;  %v9564_v61 = vld [vmem:[%s13669_s1 + $0x920] ss:$40 sps:$4 sm:$0xff]   ;;  %v13846_v8 = vld [vmem:[#allocation34_spill] sm:$0xff]  ;;  %v9569_v15 = vld [vmem:[%s13669_s1 + $0x136c] ss:$40 sps:$4 sm:$0xff]  }
 0x150   : > { %13845 = vst [vmem:[#allocation47_spill] sm:$0xff] %v11776_v13  ;;  %v9572_v46 = vld [vmem:[%s13669_s1 + $0x974] ss:$40 sps:$4 sm:$0xff]   ;;  %v13847_v13 = vld [vmem:[#allocation35_spill] sm:$0xff] }
 0x151   : > { %5409 = vmatmul.mubr.bf16.gmra.mrb[56].mxu1 %v13846_v8  ;;  %5635 = vmatmul.mubr.bf16.gmra.mrb[56].mxu0 %v10754_v14  ;;  %v9567_v14 = vld [vmem:[%s13669_s1 + $0x1368] ss:$40 sps:$4 sm:$0xff]  }
 0x152   : > { %5454 = vmatpush1.bf16.msra.mxu1 %v9555_v9  ;;  %5680 = vmatpush1.bf16.msra.mxu0 %v9558_v54 }
 0x153   : > { %5455 = vmatprep.subr.bf16.mxu1 %v9563_v51  ;;  %5681 = vmatprep.subr.bf16.mxu0 %v9566_v48  ;;  %v9570_v48 = vld [vmem:[%s13669_s1 + $0x970] ss:$40 sps:$4 sm:$0xff]  }
 0x154   : > { %5418 = vmatprep.mubr.bf16.mxu1 %v13847_v13  ;;  %5644 = vmatprep.mubr.bf16.mxu0 %v10773_v20  ;;  %v11800_v9 = vpop.f32.mrb[16].mxu1  ;;  %v9575_v20 = vld [vmem:[%s13669_s1 + $0x13bc] ss:$40 sps:$4 sm:$0xff]  }
 0x155   : > { %v11802_v51 = vpop.f32.mrb[17].mxu1  ;;  %v9578_v13 = vld [vmem:[%s13669_s1 + $0x9c4] ss:$40 sps:$4 sm:$0xff]  }
 0x156   : > { %13848 = vst [vmem:[#allocation48_spill] sm:$0xff] %v11802_v51  ;;  %5456 = vmatpush1.bf16.msra.mxu1 %v9561_v1  ;;  %5682 = vmatpush1.bf16.msra.mxu0 %v9564_v61  ;;  %v11804_v54 = vpop.f32.mrb[18].mxu1  ;;  %v9573_v51 = vld [vmem:[%s13669_s1 + $0x13b8] ss:$40 sps:$4 sm:$0xff]   ;;  %v13849_v61 = vld [vmem:[#allocation36_spill] sm:$0xff] }
 0x157   : > { %5457 = vmatprep.subr.bf16.mxu1 %v9569_v15  ;;  %5683 = vmatprep.subr.bf16.mxu0 %v9572_v46  ;;  %v11812_v8 = vpop.f32.mrb[19].mxu1  ;;  %v9576_v1 = vld [vmem:[%s13669_s1 + $0x9c0] ss:$40 sps:$4 sm:$0xff]   ;;  %v9581_v15 = vld [vmem:[%s13669_s1 + $0xa14] ss:$40 sps:$4 sm:$0xff]  }
 0x158   : > { %v9584_v46 = vld [vmem:[%s13669_s1 + $0x1c] ss:$40 sps:$4 sm:$0xff]  }
 0x159   : > { %5419 = vmatmul.mubr.bf16.gmra.mrb[60].mxu1 %v13849_v61  ;;  %5645 = vmatmul.mubr.bf16.gmra.mrb[60].mxu0 %v10808_v6  ;;  %v9579_v6 = vld [vmem:[%s13669_s1 + $0xa10] ss:$40 sps:$4 sm:$0xff]  }
 0x15a   : > { %5458 = vmatpush1.bf16.msra.mxu1 %v9567_v14  ;;  %5684 = vmatpush1.bf16.msra.mxu0 %v9570_v48  ;;  %v9582_v14 = vld [vmem:[%s13669_s1 + $0x18] ss:$40 sps:$4 sm:$0xff]  }
 0x15b   : > { %5459 = vmatprep.subr.bf16.mxu1 %v9575_v20  ;;  %5685 = vmatprep.subr.bf16.mxu0 %v9578_v13 }
 0x15c   : > { %5461 = vmatprep.mubr.bf16.mxu1 %v10580_v0  ;;  %5687 = vmatprep.mubr.bf16.mxu0 %v10317_v49  ;;  %v11836_v20 = vpop.f32.mrb[20].mxu1  ;;  %v9587_v49 = vld [vmem:[%s13669_s1 + $0xa64] ss:$40 sps:$4 sm:$0xff]  }
 0x15d   : > { %v11838_v13 = vpop.f32.mrb[21].mxu1  ;;  %v9590_v0 = vld [vmem:[%s13669_s1 + $0x6c] ss:$40 sps:$4 sm:$0xff]  }
 0x15e   : > { %13850 = vst [vmem:[#allocation49_spill] sm:$0xff] %v11838_v13  ;;  %5460 = vmatpush1.bf16.msra.mxu1 %v9573_v51  ;;  %5686 = vmatpush1.bf16.msra.mxu0 %v9576_v1  ;;  %v11840_v48 = vpop.f32.mrb[22].mxu1  ;;  %v9585_v13 = vld [vmem:[%s13669_s1 + $0xa60] ss:$40 sps:$4 sm:$0xff]  }
 0x15f   : > { %5768 = vmatprep.subr.bf16.mxu0 %v9581_v15  ;;  %5994 = vmatprep.subr.bf16.mxu1 %v9584_v46  ;;  %v11848_v61 = vpop.f32.mrb[23].mxu1  ;;  %v9588_v51 = vld [vmem:[%s13669_s1 + $0x68] ss:$40 sps:$4 sm:$0xff]   ;;  %v13852_v1 = vld [vmem:[#allocation11_spill] sm:$0xff]  ;;  %v9593_v15 = vld [vmem:[%s13669_s1 + $0xab4] ss:$40 sps:$4 sm:$0xff]  }
 0x160   : > { %13851 = vst [vmem:[#allocation50_spill] sm:$0xff] %v11848_v61  ;;  %v9596_v46 = vld [vmem:[%s13669_s1 + $0xbc] ss:$40 sps:$4 sm:$0xff]   ;;  %v13853_v61 = vld [vmem:[#allocation8_spill] sm:$0xff] }
 0x161   : > { %5462 = vmatmul.mubr.bf16.vlgmr.msra.gmra.mrb[32].mxu1 %v11253_v31  ;;  %5688 = vmatmul.mubr.bf16.vlgmr.msra.gmra.mrb[32].mxu0 %v13852_v1  ;;  %v9591_v1 = vld [vmem:[%s13669_s1 + $0xab0] ss:$40 sps:$4 sm:$0xff]  }
 0x162   : > { %5769 = vmatpush1.bf16.msra.mxu0 %v9579_v6  ;;  %5995 = vmatpush1.bf16.msra.mxu1 %v9582_v14 }
 0x163   : > { %5770 = vmatprep.subr.bf16.mxu0 %v9587_v49  ;;  %5996 = vmatprep.subr.bf16.mxu1 %v9590_v0  ;;  %v9594_v49 = vld [vmem:[%s13669_s1 + $0xb8] ss:$40 sps:$4 sm:$0xff]  }
 0x164   : > { %5471 = vmatprep.mubr.bf16.mxu1 %v11277_v30  ;;  %5697 = vmatprep.mubr.bf16.mxu0 %v13853_v61  ;;  %v11872_v0 = vpop.f32.mrb[24].mxu1  ;;  %v9599_v61 = vld [vmem:[%s13669_s1 + $0xb04] ss:$40 sps:$4 sm:$0xff]  }
 0x165   : > { %v11874_v6 = vpop.f32.mrb[25].mxu1  ;;  %v9602_v30 = vld [vmem:[%s13669_s1 + $0x10c] ss:$40 sps:$4 sm:$0xff]  }
 0x166   : > { %13854 = vst [vmem:[#allocation51_spill] sm:$0xff] %v11874_v6  ;;  %5771 = vmatpush1.bf16.msra.mxu0 %v9585_v13  ;;  %5997 = vmatpush1.bf16.msra.mxu1 %v9588_v51  ;;  %v11876_v14 = vpop.f32.mrb[26].mxu1  ;;  %v9597_v6 = vld [vmem:[%s13669_s1 + $0xb00] ss:$40 sps:$4 sm:$0xff]   ;;  %v13856_v51 = vld [vmem:[#allocation13_spill] sm:$0xff] }
 0x167   : > { %5772 = vmatprep.subr.bf16.mxu0 %v9593_v15  ;;  %5998 = vmatprep.subr.bf16.mxu1 %v9596_v46  ;;  %v11884_v31 = vpop.f32.mrb[27].mxu1  ;;  %v9600_v13 = vld [vmem:[%s13669_s1 + $0x108] ss:$40 sps:$4 sm:$0xff]   ;;  %v9605_v15 = vld [vmem:[%s13669_s1 + $0xb54] ss:$40 sps:$4 sm:$0xff]  }
 0x168   : > { %13855 = vst [vmem:[#allocation52_spill] sm:$0xff] %v11884_v31  ;;  %v9608_v46 = vld [vmem:[%s13669_s1 + $0x15c] ss:$40 sps:$4 sm:$0xff]  }
 0x169   : > { %5472 = vmatmul.mubr.bf16.gmra.mrb[36].mxu1 %v11296_v32  ;;  %5698 = vmatmul.mubr.bf16.gmra.mrb[36].mxu0 %v13856_v51  ;;  %v13857_v31 = vld [vmem:[#allocation14_spill] sm:$0xff] }
 0x16a   : > { %5773 = vmatpush1.bf16.msra.mxu0 %v9591_v1  ;;  %5999 = vmatpush1.bf16.msra.mxu1 %v9594_v49  ;;  %v9603_v51 = vld [vmem:[%s13669_s1 + $0xb50] ss:$40 sps:$4 sm:$0xff]  }
 0x16b   : > { %5774 = vmatprep.subr.bf16.mxu0 %v9599_v61  ;;  %6000 = vmatprep.subr.bf16.mxu1 %v9602_v30  ;;  %v9606_v30 = vld [vmem:[%s13669_s1 + $0x158] ss:$40 sps:$4 sm:$0xff]  }
 0x16c   : > { %5481 = vmatprep.mubr.bf16.mxu1 %v11319_v40  ;;  %5707 = vmatprep.mubr.bf16.mxu0 %v13857_v31  ;;  %v11908_v61 = vpop.f32.mrb[28].mxu1  ;;  %v9611_v31 = vld [vmem:[%s13669_s1 + $0xba4] ss:$40 sps:$4 sm:$0xff]  }
 0x16d   : > { %13858 = vst [vmem:[#allocation53_spill] sm:$0xff] %v11908_v61  ;;  %v11910_v1 = vpop.f32.mrb[29].mxu1  ;;  %v9614_v40 = vld [vmem:[%s13669_s1 + $0x1ac] ss:$40 sps:$4 sm:$0xff]  }
 0x16e   : > { %5775 = vmatpush1.bf16.msra.mxu0 %v9597_v6  ;;  %6001 = vmatpush1.bf16.msra.mxu1 %v9600_v13  ;;  %v11912_v49 = vpop.f32.mrb[30].mxu1  ;;  %v13859_v61 = vld [vmem:[#allocation17_spill] sm:$0xff]  ;;  %v9609_v6 = vld [vmem:[%s13669_s1 + $0xba0] ss:$40 sps:$4 sm:$0xff]  }
 0x16f   : > { %5776 = vmatprep.subr.bf16.mxu0 %v9605_v15  ;;  %6002 = vmatprep.subr.bf16.mxu1 %v9608_v46  ;;  %v11920_v32 = vpop.f32.mrb[31].mxu1  ;;  %v9612_v13 = vld [vmem:[%s13669_s1 + $0x1a8] ss:$40 sps:$4 sm:$0xff]   ;;  %v9617_v15 = vld [vmem:[%s13669_s1 + $0xbf4] ss:$40 sps:$4 sm:$0xff]  }
 0x170   : > { %v9620_v46 = vld [vmem:[%s13669_s1 + $0x1fc] ss:$40 sps:$4 sm:$0xff]  }
 0x171   : > { %5482 = vmatmul.mubr.bf16.gmra.mrb[40].mxu1 %v11338_v38  ;;  %5708 = vmatmul.mubr.bf16.gmra.mrb[40].mxu0 %v13859_v61 }
 0x172   : > { %5777 = vmatpush1.bf16.msra.mxu0 %v9603_v51  ;;  %6003 = vmatpush1.bf16.msra.mxu1 %v9606_v30  ;;  %v13860_v51 = vld [vmem:[#allocation18_spill] sm:$0xff] }
 0x173   : > { %5778 = vmatprep.subr.bf16.mxu0 %v9611_v31  ;;  %6004 = vmatprep.subr.bf16.mxu1 %v9614_v40  ;;  %v9615_v30 = vld [vmem:[%s13669_s1 + $0xbf0] ss:$40 sps:$4 sm:$0xff]   ;;  %v9623_v40 = vld [vmem:[%s13669_s1 + $0xc44] ss:$40 sps:$4 sm:$0xff]  }
 0x174   : > { %5491 = vmatprep.mubr.bf16.mxu1 %v11361_v5  ;;  %5717 = vmatprep.mubr.bf16.mxu0 %v13860_v51  ;;  %v9618_v31 = vld [vmem:[%s13669_s1 + $0x1f8] ss:$40 sps:$4 sm:$0xff]   ;;  %v9626_v51 = vld [vmem:[%s13669_s1 + $0x24c] ss:$40 sps:$4 sm:$0xff]  }
 0x175   : > { %v13861_v5 = vld [vmem:[#allocation21_spill] sm:$0xff] }
 0x176   : > { %5779 = vmatpush1.bf16.msra.mxu0 %v9609_v6  ;;  %6005 = vmatpush1.bf16.msra.mxu1 %v9612_v13  ;;  %v9621_v6 = vld [vmem:[%s13669_s1 + $0xc40] ss:$40 sps:$4 sm:$0xff]  }
 0x177   : > { %5780 = vmatprep.subr.bf16.mxu0 %v9617_v15  ;;  %6006 = vmatprep.subr.bf16.mxu1 %v9620_v46  ;;  %v9624_v13 = vld [vmem:[%s13669_s1 + $0x248] ss:$40 sps:$4 sm:$0xff]   ;;  %v9629_v15 = vld [vmem:[%s13669_s1 + $0xc94] ss:$40 sps:$4 sm:$0xff]  }
 0x178   : > { %v9632_v46 = vld [vmem:[%s13669_s1 + $0x29c] ss:$40 sps:$4 sm:$0xff]  }
 0x179   : > { %5492 = vmatmul.mubr.bf16.gmra.mrb[44].mxu1 %v11380_v50  ;;  %5718 = vmatmul.mubr.bf16.gmra.mrb[44].mxu0 %v13861_v5 }
 0x17a   : > { %5781 = vmatpush1.bf16.msra.mxu0 %v9615_v30  ;;  %6007 = vmatpush1.bf16.msra.mxu1 %v9618_v31  ;;  %v13862_v30 = vld [vmem:[#allocation22_spill] sm:$0xff] }
 0x17b   : > { %5782 = vmatprep.subr.bf16.mxu0 %v9623_v40  ;;  %6008 = vmatprep.subr.bf16.mxu1 %v9626_v51  ;;  %v9627_v31 = vld [vmem:[%s13669_s1 + $0xc90] ss:$40 sps:$4 sm:$0xff]   ;;  %v9635_v40 = vld [vmem:[%s13669_s1 + $0xce4] ss:$40 sps:$4 sm:$0xff]  }
 0x17c   : > { %5501 = vmatprep.mubr.bf16.mxu1 %v11403_v57  ;;  %5727 = vmatprep.mubr.bf16.mxu0 %v13862_v30  ;;  %v9630_v51 = vld [vmem:[%s13669_s1 + $0x298] ss:$40 sps:$4 sm:$0xff]   ;;  %v9638_v30 = vld [vmem:[%s13669_s1 + $0x2ec] ss:$40 sps:$4 sm:$0xff]  }
 0x17d   : > { %v13863_v57 = vld [vmem:[#allocation25_spill] sm:$0xff] }
 0x17e   : > { %5783 = vmatpush1.bf16.msra.mxu0 %v9621_v6  ;;  %6009 = vmatpush1.bf16.msra.mxu1 %v9624_v13  ;;  %v9633_v6 = vld [vmem:[%s13669_s1 + $0xce0] ss:$40 sps:$4 sm:$0xff]  }
 0x17f   : > { %5784 = vmatprep.subr.bf16.mxu0 %v9629_v15  ;;  %6010 = vmatprep.subr.bf16.mxu1 %v9632_v46  ;;  %v9636_v13 = vld [vmem:[%s13669_s1 + $0x2e8] ss:$40 sps:$4 sm:$0xff]   ;;  %v9641_v15 = vld [vmem:[%s13669_s1 + $0xd34] ss:$40 sps:$4 sm:$0xff]  }
 0x180   : > { %v9644_v46 = vld [vmem:[%s13669_s1 + $0x33c] ss:$40 sps:$4 sm:$0xff]  }
 0x181   : > { %5502 = vmatmul.mubr.bf16.gmra.mrb[48].mxu1 %v11422_v11  ;;  %5728 = vmatmul.mubr.bf16.gmra.mrb[48].mxu0 %v13863_v57  ;;  %v9639_v57 = vld [vmem:[%s13669_s1 + $0xd30] ss:$40 sps:$4 sm:$0xff]  }
 0x182   : > { %5785 = vmatpush1.bf16.msra.mxu0 %v9627_v31  ;;  %6011 = vmatpush1.bf16.msra.mxu1 %v9630_v51  ;;  %v13864_v31 = vld [vmem:[#allocation43_spill] sm:$0xff]  ;;  %v13865_v51 = vld [vmem:[#allocation26_spill] sm:$0xff] }
 0x183   : > { %5786 = vmatprep.subr.bf16.mxu0 %v9635_v40  ;;  %6012 = vmatprep.subr.bf16.mxu1 %v9638_v30  ;;  %v9642_v30 = vld [vmem:[%s13669_s1 + $0x338] ss:$40 sps:$4 sm:$0xff]   ;;  %v9647_v40 = vld [vmem:[%s13669_s1 + $0xd84] ss:$40 sps:$4 sm:$0xff]  }
 0x184   : > { %5511 = vmatprep.mubr.bf16.mxu1 %v13864_v31  ;;  %5737 = vmatprep.mubr.bf16.mxu0 %v13865_v51  ;;  %v9650_v51 = vld [vmem:[%s13669_s1 + $0x38c] ss:$40 sps:$4 sm:$0xff]  }
 0x185   : > { %v13866_v31 = vld [vmem:[#allocation28_spill] sm:$0xff] }
 0x186   : > { %5787 = vmatpush1.bf16.msra.mxu0 %v9633_v6  ;;  %6013 = vmatpush1.bf16.msra.mxu1 %v9636_v13  ;;  %v9645_v6 = vld [vmem:[%s13669_s1 + $0xd80] ss:$40 sps:$4 sm:$0xff]  }
 0x187   : > { %5788 = vmatprep.subr.bf16.mxu0 %v9641_v15  ;;  %6014 = vmatprep.subr.bf16.mxu1 %v9644_v46  ;;  %v9648_v13 = vld [vmem:[%s13669_s1 + $0x388] ss:$40 sps:$4 sm:$0xff]   ;;  %v9653_v15 = vld [vmem:[%s13669_s1 + $0xdd4] ss:$40 sps:$4 sm:$0xff]  }
 0x188   : > { %v9656_v46 = vld [vmem:[%s13669_s1 + $0x3dc] ss:$40 sps:$4 sm:$0xff]  }
 0x189   : > { %5512 = vmatmul.mubr.bf16.gmra.mrb[52].mxu1 %v11465_v60  ;;  %5738 = vmatmul.mubr.bf16.gmra.mrb[52].mxu0 %v13866_v31 }
 0x18a   : > { %5789 = vmatpush1.bf16.msra.mxu0 %v9639_v57  ;;  %6015 = vmatpush1.bf16.msra.mxu1 %v9642_v30  ;;  %v9651_v57 = vld [vmem:[%s13669_s1 + $0xdd0] ss:$40 sps:$4 sm:$0xff]   ;;  %v9659_v30 = vld [vmem:[%s13669_s1 + $0xe24] ss:$40 sps:$4 sm:$0xff]  }
 0x18b   : > { %5790 = vmatprep.subr.bf16.mxu0 %v9647_v40  ;;  %6016 = vmatprep.subr.bf16.mxu1 %v9650_v51  ;;  %v9654_v51 = vld [vmem:[%s13669_s1 + $0x3d8] ss:$40 sps:$4 sm:$0xff]   ;;  %v9662_v40 = vld [vmem:[%s13669_s1 + $0x42c] ss:$40 sps:$4 sm:$0xff]  }
 0x18c   : > { %5521 = vmatprep.mubr.bf16.mxu1 %v11486_v7  ;;  %5747 = vmatprep.mubr.bf16.mxu0 %v10850_v27 }
 0x18e   : > { %5791 = vmatpush1.bf16.msra.mxu0 %v9645_v6  ;;  %6017 = vmatpush1.bf16.msra.mxu1 %v9648_v13  ;;  %v9657_v6 = vld [vmem:[%s13669_s1 + $0xe20] ss:$40 sps:$4 sm:$0xff]  }
 0x18f   : > { %5792 = vmatprep.subr.bf16.mxu0 %v9653_v15  ;;  %6018 = vmatprep.subr.bf16.mxu1 %v9656_v46  ;;  %v9660_v13 = vld [vmem:[%s13669_s1 + $0x428] ss:$40 sps:$4 sm:$0xff]   ;;  %v9665_v15 = vld [vmem:[%s13669_s1 + $0xe74] ss:$40 sps:$4 sm:$0xff]  }
 0x190   : > { %v9668_v46 = vld [vmem:[%s13669_s1 + $0x47c] ss:$40 sps:$4 sm:$0xff]  }
 0x191   : > { %5522 = vmatmul.mubr.bf16.gmra.mrb[56].mxu1 %v11506_v62  ;;  %5748 = vmatmul.mubr.bf16.gmra.mrb[56].mxu0 %v10880_v29 }
 0x192   : > { %5793 = vmatpush1.bf16.msra.mxu0 %v9651_v57  ;;  %6019 = vmatpush1.bf16.msra.mxu1 %v9654_v51  ;;  %v9663_v57 = vld [vmem:[%s13669_s1 + $0xe70] ss:$40 sps:$4 sm:$0xff]  }
 0x193   : > { %5794 = vmatprep.subr.bf16.mxu0 %v9659_v30  ;;  %6020 = vmatprep.subr.bf16.mxu1 %v9662_v40  ;;  %v9666_v51 = vld [vmem:[%s13669_s1 + $0x478] ss:$40 sps:$4 sm:$0xff]   ;;  %v9671_v30 = vld [vmem:[%s13669_s1 + $0xec4] ss:$40 sps:$4 sm:$0xff]  }
 0x194   : > { %5531 = vmatprep.mubr.bf16.mxu1 %v11525_v16  ;;  %5757 = vmatprep.mubr.bf16.mxu0 %v10899_v47  ;;  %v9674_v40 = vld [vmem:[%s13669_s1 + $0x4cc] ss:$40 sps:$4 sm:$0xff]  }
 0x196   : > { %5795 = vmatpush1.bf16.msra.mxu0 %v9657_v6  ;;  %6021 = vmatpush1.bf16.msra.mxu1 %v9660_v13  ;;  %v9669_v6 = vld [vmem:[%s13669_s1 + $0xec0] ss:$40 sps:$4 sm:$0xff]  }
 0x197   : > { %5796 = vmatprep.subr.bf16.mxu0 %v9665_v15  ;;  %6022 = vmatprep.subr.bf16.mxu1 %v9668_v46  ;;  %v9672_v13 = vld [vmem:[%s13669_s1 + $0x4c8] ss:$40 sps:$4 sm:$0xff]   ;;  %v9677_v15 = vld [vmem:[%s13669_s1 + $0xf14] ss:$40 sps:$4 sm:$0xff]  }
 0x198   : > { %v9680_v46 = vld [vmem:[%s13669_s1 + $0x51c] ss:$40 sps:$4 sm:$0xff]  }
 0x199   : > { %5532 = vmatmul.mubr.bf16.gmra.mrb[60].mxu1 %v11542_v39  ;;  %5758 = vmatmul.mubr.bf16.gmra.mrb[60].mxu0 %v10922_v28 }
 0x19a   : > { %5797 = vmatpush1.bf16.msra.mxu0 %v9663_v57  ;;  %6023 = vmatpush1.bf16.msra.mxu1 %v9666_v51  ;;  %v9675_v57 = vld [vmem:[%s13669_s1 + $0xf10] ss:$40 sps:$4 sm:$0xff]  }
 0x19b   : > { %5798 = vmatprep.subr.bf16.mxu0 %v9671_v30  ;;  %6024 = vmatprep.subr.bf16.mxu1 %v9674_v40  ;;  %v9678_v51 = vld [vmem:[%s13669_s1 + $0x518] ss:$40 sps:$4 sm:$0xff]   ;;  %v9683_v30 = vld [vmem:[%s13669_s1 + $0xf64] ss:$40 sps:$4 sm:$0xff]  }
 0x19c   : > { %5800 = vmatprep.mubr.bf16.mxu0 %v10939_v18  ;;  %6026 = vmatprep.mubr.bf16.mxu1 %v10286_v34  ;;  %v9686_v40 = vld [vmem:[%s13669_s1 + $0x56c] ss:$40 sps:$4 sm:$0xff]  }
 0x19e   : > { %5799 = vmatpush1.bf16.msra.mxu0 %v9669_v6  ;;  %6025 = vmatpush1.bf16.msra.mxu1 %v9672_v13  ;;  %v9681_v6 = vld [vmem:[%s13669_s1 + $0xf60] ss:$40 sps:$4 sm:$0xff]  }
 0x19f   : > { %5881 = vmatprep.subr.bf16.mxu0 %v9677_v15  ;;  %6107 = vmatprep.subr.bf16.mxu1 %v9680_v46  ;;  %v9684_v13 = vld [vmem:[%s13669_s1 + $0x568] ss:$40 sps:$4 sm:$0xff]   ;;  %v9689_v15 = vld [vmem:[%s13669_s1 + $0xfb4] ss:$40 sps:$4 sm:$0xff]  }
 0x1a0   : > { %v9692_v46 = vld [vmem:[%s13669_s1 + $0x5bc] ss:$40 sps:$4 sm:$0xff]  }
 0x1a1   : > { %5801 = vmatmul.mubr.bf16.vlgmr.msra.gmra.mrb[32].mxu0 %v10959_v33  ;;  %6027 = vmatmul.mubr.bf16.vlgmr.msra.gmra.mrb[64].mxu1 %v10479_v52 }
 0x1a2   : > { %5882 = vmatpush1.bf16.msra.mxu0 %v9675_v57  ;;  %6108 = vmatpush1.bf16.msra.mxu1 %v9678_v51  ;;  %v9687_v57 = vld [vmem:[%s13669_s1 + $0xfb0] ss:$40 sps:$4 sm:$0xff]  }
 0x1a3   : > { %5883 = vmatprep.subr.bf16.mxu0 %v9683_v30  ;;  %6109 = vmatprep.subr.bf16.mxu1 %v9686_v40  ;;  %v9690_v51 = vld [vmem:[%s13669_s1 + $0x5b8] ss:$40 sps:$4 sm:$0xff]   ;;  %v9695_v30 = vld [vmem:[%s13669_s1 + $0x1004] ss:$40 sps:$4 sm:$0xff]  }
 0x1a4   : > { %5810 = vmatprep.mubr.bf16.mxu0 %v10976_v58  ;;  %6036 = vmatprep.mubr.bf16.mxu1 %v10288_v35  ;;  %v9698_v40 = vld [vmem:[%s13669_s1 + $0x60c] ss:$40 sps:$4 sm:$0xff]  }
 0x1a6   : > { %5884 = vmatpush1.bf16.msra.mxu0 %v9681_v6  ;;  %6110 = vmatpush1.bf16.msra.mxu1 %v9684_v13  ;;  %v9693_v6 = vld [vmem:[%s13669_s1 + $0x1000] ss:$40 sps:$4 sm:$0xff]  }
 0x1a7   : > { %5885 = vmatprep.subr.bf16.mxu0 %v9689_v15  ;;  %6111 = vmatprep.subr.bf16.mxu1 %v9692_v46  ;;  %v9696_v13 = vld [vmem:[%s13669_s1 + $0x608] ss:$40 sps:$4 sm:$0xff]   ;;  %v9701_v15 = vld [vmem:[%s13669_s1 + $0x1054] ss:$40 sps:$4 sm:$0xff]  }
 0x1a8   : > { %v9704_v46 = vld [vmem:[%s13669_s1 + $0x65c] ss:$40 sps:$4 sm:$0xff]  }
 0x1a9   : > { %5811 = vmatmul.mubr.bf16.gmra.mrb[36].mxu0 %v10995_v26  ;;  %6037 = vmatmul.mubr.bf16.gmra.mrb[68].mxu1 %v10495_v2 }
 0x1aa   : > { %5886 = vmatpush1.bf16.msra.mxu0 %v9687_v57  ;;  %6112 = vmatpush1.bf16.msra.mxu1 %v9690_v51  ;;  %v9699_v57 = vld [vmem:[%s13669_s1 + $0x1050] ss:$40 sps:$4 sm:$0xff]  }
 0x1ab   : > { %5887 = vmatprep.subr.bf16.mxu0 %v9695_v30  ;;  %6113 = vmatprep.subr.bf16.mxu1 %v9698_v40  ;;  %v9702_v51 = vld [vmem:[%s13669_s1 + $0x658] ss:$40 sps:$4 sm:$0xff]   ;;  %v9707_v30 = vld [vmem:[%s13669_s1 + $0x10a4] ss:$40 sps:$4 sm:$0xff]  }
 0x1ac   : > { %5820 = vmatprep.mubr.bf16.mxu0 %v11012_v21  ;;  %6046 = vmatprep.mubr.bf16.mxu1 %v10290_v36  ;;  %v9710_v40 = vld [vmem:[%s13669_s1 + $0x6ac] ss:$40 sps:$4 sm:$0xff]  }
 0x1ae   : > { %5888 = vmatpush1.bf16.msra.mxu0 %v9693_v6  ;;  %6114 = vmatpush1.bf16.msra.mxu1 %v9696_v13  ;;  %v9705_v6 = vld [vmem:[%s13669_s1 + $0x10a0] ss:$40 sps:$4 sm:$0xff]  }
 0x1af   : > { %5889 = vmatprep.subr.bf16.mxu0 %v9701_v15  ;;  %6115 = vmatprep.subr.bf16.mxu1 %v9704_v46  ;;  %v9708_v13 = vld [vmem:[%s13669_s1 + $0x6a8] ss:$40 sps:$4 sm:$0xff]   ;;  %v9713_v15 = vld [vmem:[%s13669_s1 + $0x10f4] ss:$40 sps:$4 sm:$0xff]  }
 0x1b0   : > { %v9716_v46 = vld [vmem:[%s13669_s1 + $0x6fc] ss:$40 sps:$4 sm:$0xff]  }
 0x1b1   : > { %5821 = vmatmul.mubr.bf16.gmra.mrb[40].mxu0 %v11031_v23  ;;  %6047 = vmatmul.mubr.bf16.gmra.mrb[72].mxu1 %v10519_v63  ;;  %v9711_v23 = vld [vmem:[%s13669_s1 + $0x10f0] ss:$40 sps:$4 sm:$0xff]  }
 0x1b2   : > { %5890 = vmatpush1.bf16.msra.mxu0 %v9699_v57  ;;  %6116 = vmatpush1.bf16.msra.mxu1 %v9702_v51 }
 0x1b3   : > { %5891 = vmatprep.subr.bf16.mxu0 %v9707_v30  ;;  %6117 = vmatprep.subr.bf16.mxu1 %v9710_v40 }
 0x1b4   : > { %v5011_v57 = vpop.f32.mrb[0].mxu0  ;;  %5830 = vmatprep.mubr.bf16.mxu0 %v11048_v17  ;;  %6056 = vmatprep.mubr.bf16.mxu1 %v10553_v37  ;;  %v9714_v17 = vld [vmem:[%s13669_s1 + $0x6f8] ss:$40 sps:$4 sm:$0xff]  }
 0x1b5   : > { %v12163_v51 = vadd.f32 %v5011_v57, %v11656_v12  ;;  %v5013_v63 = vpop.f32.mrb[1].mxu0 }
 0x1b6   : > { %v12166_v30 = vadd.f32 %v5013_v63, %v11658_v42  ;;  %v5015_v40 = vpop.f32.mrb[2].mxu0  ;;  %5892 = vmatpush1.bf16.msra.mxu0 %v9705_v6  ;;  %6118 = vmatpush1.bf16.msra.mxu1 %v9708_v13  ;;  %v9719_v63 = vld [vmem:[%s13669_s1 + $0x1144] ss:$40 sps:$4 sm:$0xff]   ;;  %v9720_v13 = vld [vmem:[%s13669_s1 + $0x748] ss:$40 sps:$4 sm:$0xff]  }
 0x1b7   : > { %13867 = vst [vmem:[#allocation17_spill] sm:$0xff] %v12163_v51  ;;  %v12175_v37 = vadd.f32 %v5015_v40, %v11660_v43  ;;  %v5017_v12 = vpop.f32.mrb[3].mxu0  ;;  %5893 = vmatprep.subr.bf16.mxu0 %v9713_v15  ;;  %6119 = vmatprep.subr.bf16.mxu1 %v9716_v46  ;;  %v9722_v42 = vld [vmem:[%s13669_s1 + $0x74c] ss:$40 sps:$4 sm:$0xff]   ;;  %v9717_v43 = vld [vmem:[%s13669_s1 + $0x1140] ss:$40 sps:$4 sm:$0xff]  }
 0x1b8   : > { %13868 = vst [vmem:[#allocation21_spill] sm:$0xff] %v12166_v30  ;;  %v12184_v6 = vadd.f32 %v5017_v12, %v11668_v56  ;;  %v9725_v56 = vld [vmem:[%s13669_s1 + $0x1194] ss:$40 sps:$4 sm:$0xff]   ;;  %v9723_v12 = vld [vmem:[%s13669_s1 + $0x1190] ss:$40 sps:$4 sm:$0xff]  }
 0x1b9   : > { %13869 = vst [vmem:[#allocation28_spill] sm:$0xff] %v12175_v37  ;;  %5831 = vmatmul.mubr.bf16.gmra.mrb[44].mxu0 %v11067_v59  ;;  %6057 = vmatmul.mubr.bf16.gmra.mrb[76].mxu1 %v10591_v4  ;;  %v9728_v15 = vld [vmem:[%s13669_s1 + $0x79c] ss:$40 sps:$4 sm:$0xff]   ;;  %v9762_v37 = vld [vmem:[%s13669_s1 + $0x978] ss:$40 sps:$4 sm:$0xff]  }
 0x1ba   : > { %13870 = vst [vmem:[#allocation54_spill] sm:$0xff] %v12184_v6  ;;  %5894 = vmatpush1.bf16.msra.mxu0 %v9711_v23  ;;  %6120 = vmatpush1.bf16.msra.mxu1 %v9714_v17  ;;  %v9738_v6 = vld [vmem:[%s13669_s1 + $0x838] ss:$40 sps:$4 sm:$0xff]  }
 0x1bb   : > { %5895 = vmatprep.subr.bf16.mxu0 %v9719_v63  ;;  %6121 = vmatprep.subr.bf16.mxu1 %v9722_v42  ;;  %v9726_v63 = vld [vmem:[%s13669_s1 + $0x798] ss:$40 sps:$4 sm:$0xff]  }
 0x1bc   : > { %v5021_v23 = vpop.f32.mrb[4].mxu0  ;;  %5840 = vmatprep.mubr.bf16.mxu0 %v11084_v22  ;;  %6066 = vmatprep.mubr.bf16.mxu1 %v10611_v3 }
 0x1bd   : > { %v12203_v17 = vadd.f32 %v5021_v23, %v11692_v10  ;;  %v5023_v46 = vpop.f32.mrb[5].mxu0  ;;  %v13875_v23 = vld [vmem:[#allocation15_spill] sm:$0xff] }
 0x1be   : > { %v12206_v57 = vadd.f32 %v5023_v46, %v11694_v41  ;;  %v5025_v40 = vpop.f32.mrb[6].mxu0  ;;  %5896 = vmatpush1.bf16.msra.mxu0 %v9717_v43  ;;  %6122 = vmatpush1.bf16.msra.mxu1 %v9720_v13  ;;  %v9731_v41 = vld [vmem:[%s13669_s1 + $0x11e4] ss:$40 sps:$4 sm:$0xff]  }
 0x1bf   : > { %13871 = vst [vmem:[#allocation55_spill] sm:$0xff] %v12203_v17  ;;  %v12215_v42 = vadd.f32 %v5025_v40, %v11696_v25  ;;  %v5027_v10 = vpop.f32.mrb[7].mxu0  ;;  %5897 = vmatprep.subr.bf16.mxu0 %v9725_v56  ;;  %6123 = vmatprep.subr.bf16.mxu1 %v9728_v15  ;;  %v9734_v43 = vld [vmem:[%s13669_s1 + $0x7ec] ss:$40 sps:$4 sm:$0xff]   ;;  %v9729_v25 = vld [vmem:[%s13669_s1 + $0x11e0] ss:$40 sps:$4 sm:$0xff]  }
 0x1c0   : > { %13872 = vst [vmem:[#allocation56_spill] sm:$0xff] %v12206_v57  ;;  %v12224_v13 = vadd.f32 %v5027_v10, %v11704_v24  ;;  %v9732_v56 = vld [vmem:[%s13669_s1 + $0x7e8] ss:$40 sps:$4 sm:$0xff]   ;;  %v9737_v24 = vld [vmem:[%s13669_s1 + $0x1234] ss:$40 sps:$4 sm:$0xff]   ;;  %v13876_v40 = vld [vmem:[#allocation31_spill] sm:$0xff] }
 0x1c1   : > { %13873 = vst [vmem:[#allocation57_spill] sm:$0xff] %v12215_v42  ;;  %5841 = vmatmul.mubr.bf16.gmra.mrb[48].mxu0 %v11103_v19  ;;  %6067 = vmatmul.mubr.bf16.gmra.mrb[80].mxu1 %v13875_v23  ;;  %v9740_v15 = vld [vmem:[%s13669_s1 + $0x83c] ss:$40 sps:$4 sm:$0xff]   ;;  %v9735_v57 = vld [vmem:[%s13669_s1 + $0x1230] ss:$40 sps:$4 sm:$0xff]  }
 0x1c2   : > { %13874 = vst [vmem:[#allocation58_spill] sm:$0xff] %v12224_v13  ;;  %5898 = vmatpush1.bf16.msra.mxu0 %v9723_v12  ;;  %6124 = vmatpush1.bf16.msra.mxu1 %v9726_v63  ;;  %v13877_v12 = vld [vmem:[#allocation16_spill] sm:$0xff]  ;;  %v9750_v42 = vld [vmem:[%s13669_s1 + $0x8d8] ss:$40 sps:$4 sm:$0xff]  }
 0x1c3   : > { %5899 = vmatprep.subr.bf16.mxu0 %v9731_v41  ;;  %6125 = vmatprep.subr.bf16.mxu1 %v9734_v43  ;;  %v13879_v13 = vld [vmem:[#allocation44_spill] sm:$0xff] }
 0x1c4   : > { %v5031_v46 = vpop.f32.mrb[8].mxu0  ;;  %5850 = vmatprep.mubr.bf16.mxu0 %v13876_v40  ;;  %6076 = vmatprep.mubr.bf16.mxu1 %v13877_v12 }
 0x1c5   : > { %v12243_v63 = vadd.f32 %v5031_v46, %v11728_v53  ;;  %v5033_v10 = vpop.f32.mrb[9].mxu0 }
 0x1c6   : > { %v12246_v41 = vadd.f32 %v5033_v10, %v13879_v13  ;;  %v5035_v43 = vpop.f32.mrb[10].mxu0  ;;  %5900 = vmatpush1.bf16.msra.mxu0 %v9729_v25  ;;  %6126 = vmatpush1.bf16.msra.mxu1 %v9732_v56  ;;  %v9743_v13 = vld [vmem:[%s13669_s1 + $0x1284] ss:$40 sps:$4 sm:$0xff]   ;;  %v13882_v56 = vld [vmem:[#allocation45_spill] sm:$0xff] }
 0x1c7   : > { %13878 = vst [vmem:[#allocation15_spill] sm:$0xff] %v12243_v63  ;;  %v12255_v30 = vadd.f32 %v5035_v43, %v11732_v44  ;;  %v5037_v53 = vpop.f32.mrb[11].mxu0  ;;  %5901 = vmatprep.subr.bf16.mxu0 %v9737_v24  ;;  %6127 = vmatprep.subr.bf16.mxu1 %v9740_v15  ;;  %v9746_v25 = vld [vmem:[%s13669_s1 + $0x88c] ss:$40 sps:$4 sm:$0xff]   ;;  %v9741_v44 = vld [vmem:[%s13669_s1 + $0x1280] ss:$40 sps:$4 sm:$0xff]  }
 0x1c8   : > { %13880 = vst [vmem:[#allocation31_spill] sm:$0xff] %v12246_v41  ;;  %v12264_v46 = vadd.f32 %v5037_v53, %v13882_v56  ;;  %v13884_v10 = vld [vmem:[#allocation32_spill] sm:$0xff]  ;;  %v13885_v41 = vld [vmem:[#allocation19_spill] sm:$0xff]  ;;  %v9749_v15 = vld [vmem:[%s13669_s1 + $0x12d4] ss:$40 sps:$4 sm:$0xff]  }
 0x1c9   : > { %13881 = vst [vmem:[#allocation16_spill] sm:$0xff] %v12255_v30  ;;  %5851 = vmatmul.mubr.bf16.gmra.mrb[52].mxu0 %v13884_v10  ;;  %6077 = vmatmul.mubr.bf16.gmra.mrb[84].mxu1 %v13885_v41  ;;  %v9744_v24 = vld [vmem:[%s13669_s1 + $0x888] ss:$40 sps:$4 sm:$0xff]   ;;  %v9752_v43 = vld [vmem:[%s13669_s1 + $0x8dc] ss:$40 sps:$4 sm:$0xff]  }
 0x1ca   : > { %13883 = vst [vmem:[#allocation44_spill] sm:$0xff] %v12264_v46  ;;  %5902 = vmatpush1.bf16.msra.mxu0 %v9735_v57  ;;  %6128 = vmatpush1.bf16.msra.mxu1 %v9738_v6  ;;  %v13886_v6 = vld [vmem:[#allocation33_spill] sm:$0xff]  ;;  %v13887_v53 = vld [vmem:[#allocation20_spill] sm:$0xff]  ;;  %v13889_v30 = vld [vmem:[#allocation46_spill] sm:$0xff] }
 0x1cb   : > { %5903 = vmatprep.subr.bf16.mxu0 %v9743_v13  ;;  %6129 = vmatprep.subr.bf16.mxu1 %v9746_v25  ;;  %v9747_v63 = vld [vmem:[%s13669_s1 + $0x12d0] ss:$40 sps:$4 sm:$0xff]  }
 0x1cc   : > { %v5041_v57 = vpop.f32.mrb[12].mxu0  ;;  %5860 = vmatprep.mubr.bf16.mxu0 %v13886_v6  ;;  %6086 = vmatprep.mubr.bf16.mxu1 %v13887_v53 }
 0x1cd   : > { %v12283_v56 = vadd.f32 %v5041_v57, %v11764_v45  ;;  %v5043_v46 = vpop.f32.mrb[13].mxu0  ;;  %v13894_v57 = vld [vmem:[#allocation34_spill] sm:$0xff] }
 0x1ce   : > { %v12286_v13 = vadd.f32 %v5043_v46, %v13889_v30  ;;  %v5045_v25 = vpop.f32.mrb[14].mxu0  ;;  %5904 = vmatpush1.bf16.msra.mxu0 %v9741_v44  ;;  %6130 = vmatpush1.bf16.msra.mxu1 %v9744_v24  ;;  %v9755_v30 = vld [vmem:[%s13669_s1 + $0x1324] ss:$40 sps:$4 sm:$0xff]  }
 0x1cf   : > { %13888 = vst [vmem:[#allocation45_spill] sm:$0xff] %v12283_v56  ;;  %v12295_v17 = vadd.f32 %v5045_v25, %v11768_v55  ;;  %v5047_v45 = vpop.f32.mrb[15].mxu0  ;;  %5905 = vmatprep.subr.bf16.mxu0 %v9749_v15  ;;  %6131 = vmatprep.subr.bf16.mxu1 %v9752_v43  ;;  %v9758_v46 = vld [vmem:[%s13669_s1 + $0x92c] ss:$40 sps:$4 sm:$0xff]   ;;  %v13892_v44 = vld [vmem:[#allocation47_spill] sm:$0xff] }
 0x1d0   : > { %13890 = vst [vmem:[#allocation32_spill] sm:$0xff] %v12286_v13  ;;  %v12304_v24 = vadd.f32 %v5047_v45, %v13892_v44  ;;  %v13895_v13 = vld [vmem:[#allocation23_spill] sm:$0xff]  ;;  %v9756_v15 = vld [vmem:[%s13669_s1 + $0x928] ss:$40 sps:$4 sm:$0xff]   ;;  %v9761_v43 = vld [vmem:[%s13669_s1 + $0x1374] ss:$40 sps:$4 sm:$0xff]  }
 0x1d1   : > { %13891 = vst [vmem:[#allocation19_spill] sm:$0xff] %v12295_v17  ;;  %5861 = vmatmul.mubr.bf16.gmra.mrb[56].mxu0 %v13894_v57  ;;  %6087 = vmatmul.mubr.bf16.gmra.mrb[88].mxu1 %v13895_v13  ;;  %v9753_v55 = vld [vmem:[%s13669_s1 + $0x1320] ss:$40 sps:$4 sm:$0xff]   ;;  %v9764_v25 = vld [vmem:[%s13669_s1 + $0x97c] ss:$40 sps:$4 sm:$0xff]  }
 0x1d2   : > { %13893 = vst [vmem:[#allocation33_spill] sm:$0xff] %v12304_v24  ;;  %5906 = vmatpush1.bf16.msra.mxu0 %v9747_v63  ;;  %6132 = vmatpush1.bf16.msra.mxu1 %v9750_v42  ;;  %v13896_v42 = vld [vmem:[#allocation35_spill] sm:$0xff]  ;;  %v13897_v45 = vld [vmem:[#allocation24_spill] sm:$0xff]  ;;  %v9759_v56 = vld [vmem:[%s13669_s1 + $0x1370] ss:$40 sps:$4 sm:$0xff]  }
 0x1d3   : > { %5907 = vmatprep.subr.bf16.mxu0 %v9755_v30  ;;  %6133 = vmatprep.subr.bf16.mxu1 %v9758_v46  ;;  %v13899_v17 = vld [vmem:[#allocation48_spill] sm:$0xff] }
 0x1d4   : > { %v5051_v63 = vpop.f32.mrb[16].mxu0  ;;  %5870 = vmatprep.mubr.bf16.mxu0 %v13896_v42  ;;  %6096 = vmatprep.mubr.bf16.mxu1 %v13897_v45 }
 0x1d5   : > { %v12323_v44 = vadd.f32 %v5051_v63, %v11800_v9  ;;  %v5053_v24 = vpop.f32.mrb[17].mxu0  ;;  %v13904_v63 = vld [vmem:[#allocation27_spill] sm:$0xff] }
 0x1d6   : > { %v12326_v30 = vadd.f32 %v5053_v24, %v13899_v17  ;;  %v5055_v46 = vpop.f32.mrb[18].mxu0  ;;  %5908 = vmatpush1.bf16.msra.mxu0 %v9753_v55  ;;  %6134 = vmatpush1.bf16.msra.mxu1 %v9756_v15  ;;  %v9767_v17 = vld [vmem:[%s13669_s1 + $0x13c4] ss:$40 sps:$4 sm:$0xff]  }
 0x1d7   : > { %13898 = vst [vmem:[#allocation20_spill] sm:$0xff] %v12323_v44  ;;  %v12335_v51 = vadd.f32 %v5055_v46, %v11804_v54  ;;  %v5057_v9 = vpop.f32.mrb[19].mxu0  ;;  %5909 = vmatprep.subr.bf16.mxu0 %v9761_v43  ;;  %6135 = vmatprep.subr.bf16.mxu1 %v9764_v25  ;;  %v9770_v24 = vld [vmem:[%s13669_s1 + $0x9cc] ss:$40 sps:$4 sm:$0xff]   ;;  %v9765_v54 = vld [vmem:[%s13669_s1 + $0x13c0] ss:$40 sps:$4 sm:$0xff]  }
 0x1d8   : > { %13900 = vst [vmem:[#allocation46_spill] sm:$0xff] %v12326_v30  ;;  %v12344_v55 = vadd.f32 %v5057_v9, %v11812_v8  ;;  %v13903_v15 = vld [vmem:[#allocation36_spill] sm:$0xff]  ;;  %v9773_v8 = vld [vmem:[%s13669_s1 + $0xa1c] ss:$40 sps:$4 sm:$0xff]   ;;  %v13908_v30 = vld [vmem:[#allocation49_spill] sm:$0xff] }
 0x1d9   : > { %13901 = vst [vmem:[#allocation47_spill] sm:$0xff] %v12335_v51  ;;  %5871 = vmatmul.mubr.bf16.gmra.mrb[60].mxu0 %v13903_v15  ;;  %6097 = vmatmul.mubr.bf16.gmra.mrb[92].mxu1 %v13904_v63  ;;  %v9768_v43 = vld [vmem:[%s13669_s1 + $0x9c8] ss:$40 sps:$4 sm:$0xff]   ;;  %v9776_v25 = vld [vmem:[%s13669_s1 + $0x24] ss:$40 sps:$4 sm:$0xff]  }
 0x1da   : > { %13902 = vst [vmem:[#allocation34_spill] sm:$0xff] %v12344_v55  ;;  %5910 = vmatpush1.bf16.msra.mxu0 %v9759_v56  ;;  %6136 = vmatpush1.bf16.msra.mxu1 %v9762_v37  ;;  %v13905_v37 = vld [vmem:[#allocation12_spill] sm:$0xff]  ;;  %v13906_v46 = vld [vmem:[#allocation7_spill] sm:$0xff] }
 0x1db   : > { %5911 = vmatprep.subr.bf16.mxu0 %v9767_v17  ;;  %6137 = vmatprep.subr.bf16.mxu1 %v9770_v24  ;;  %v9771_v51 = vld [vmem:[%s13669_s1 + $0xa18] ss:$40 sps:$4 sm:$0xff]  }
 0x1dc   : > { %v5061_v56 = vpop.f32.mrb[20].mxu0  ;;  %5913 = vmatprep.mubr.bf16.mxu0 %v13905_v37  ;;  %6139 = vmatprep.mubr.bf16.mxu1 %v13906_v46  ;;  %v9774_v44 = vld [vmem:[%s13669_s1 + $0x20] ss:$40 sps:$4 sm:$0xff]  }
 0x1dd   : > { %v12363_v9 = vadd.f32 %v5061_v56, %v11836_v20  ;;  %v5063_v55 = vpop.f32.mrb[21].mxu0  ;;  %v13913_v56 = vld [vmem:[#allocation37_spill] sm:$0xff] }
 0x1de   : > { %v12366_v17 = vadd.f32 %v5063_v55, %v13908_v30  ;;  %v5065_v24 = vpop.f32.mrb[22].mxu0  ;;  %5912 = vmatpush1.bf16.msra.mxu0 %v9765_v54  ;;  %6138 = vmatpush1.bf16.msra.mxu1 %v9768_v43  ;;  %v9779_v30 = vld [vmem:[%s13669_s1 + $0xa6c] ss:$40 sps:$4 sm:$0xff]   ;;  %v13911_v54 = vld [vmem:[#allocation50_spill] sm:$0xff] }
 0x1df   : > { %13907 = vst [vmem:[#allocation23_spill] sm:$0xff] %v12363_v9  ;;  %v12375_v46 = vadd.f32 %v5065_v24, %v11840_v48  ;;  %v5067_v20 = vpop.f32.mrb[23].mxu0  ;;  %6220 = vmatprep.subr.bf16.mxu1 %v9773_v8  ;;  %6446 = vmatprep.subr.bf16.mxu0 %v9776_v25  ;;  %v9782_v55 = vld [vmem:[%s13669_s1 + $0x74] ss:$40 sps:$4 sm:$0xff]   ;;  %v9777_v48 = vld [vmem:[%s13669_s1 + $0xa68] ss:$40 sps:$4 sm:$0xff]  }
 0x1e0   : > { %13909 = vst [vmem:[#allocation35_spill] sm:$0xff] %v12366_v17  ;;  %v12384_v43 = vadd.f32 %v5067_v20, %v13911_v54  ;;  %v13914_v17 = vld [vmem:[#allocation11_spill] sm:$0xff]  ;;  %v9780_v8 = vld [vmem:[%s13669_s1 + $0x70] ss:$40 sps:$4 sm:$0xff]   ;;  %v13916_v20 = vld [vmem:[#allocation8_spill] sm:$0xff] }
 0x1e1   : > { %13910 = vst [vmem:[#allocation24_spill] sm:$0xff] %v12375_v46  ;;  %5914 = vmatmul.mubr.bf16.vlgmr.msra.gmra.mrb[32].mxu0 %v13913_v56  ;;  %6140 = vmatmul.mubr.bf16.vlgmr.msra.gmra.mrb[64].mxu1 %v13914_v17  ;;  %v9785_v25 = vld [vmem:[%s13669_s1 + $0xabc] ss:$40 sps:$4 sm:$0xff]   ;;  %v9783_v9 = vld [vmem:[%s13669_s1 + $0xab8] ss:$40 sps:$4 sm:$0xff]  }
 0x1e2   : > { %13912 = vst [vmem:[#allocation48_spill] sm:$0xff] %v12384_v43  ;;  %6221 = vmatpush1.bf16.msra.mxu1 %v9771_v51  ;;  %6447 = vmatpush1.bf16.msra.mxu0 %v9774_v44  ;;  %v9788_v24 = vld [vmem:[%s13669_s1 + $0xc4] ss:$40 sps:$4 sm:$0xff]   ;;  %v13915_v44 = vld [vmem:[#allocation38_spill] sm:$0xff] }
 0x1e3   : > { %6222 = vmatprep.subr.bf16.mxu1 %v9779_v30  ;;  %6448 = vmatprep.subr.bf16.mxu0 %v9782_v55  ;;  %v13918_v46 = vld [vmem:[#allocation51_spill] sm:$0xff] }
 0x1e4   : > { %v5071_v51 = vpop.f32.mrb[24].mxu0  ;;  %5923 = vmatprep.mubr.bf16.mxu0 %v13915_v44  ;;  %6149 = vmatprep.mubr.bf16.mxu1 %v13916_v20  ;;  %v9786_v44 = vld [vmem:[%s13669_s1 + $0xc0] ss:$40 sps:$4 sm:$0xff]  }
 0x1e5   : > { %v12403_v54 = vadd.f32 %v5071_v51, %v11872_v0  ;;  %v5073_v43 = vpop.f32.mrb[25].mxu0  ;;  %v13923_v51 = vld [vmem:[#allocation39_spill] sm:$0xff] }
 0x1e6   : > { %v12406_v30 = vadd.f32 %v5073_v43, %v13918_v46  ;;  %v5075_v55 = vpop.f32.mrb[26].mxu0  ;;  %6223 = vmatpush1.bf16.msra.mxu1 %v9777_v48  ;;  %6449 = vmatpush1.bf16.msra.mxu0 %v9780_v8  ;;  %v9791_v46 = vld [vmem:[%s13669_s1 + $0xb0c] ss:$40 sps:$4 sm:$0xff]  }
 0x1e7   : > { %13917 = vst [vmem:[#allocation36_spill] sm:$0xff] %v12403_v54  ;;  %v12415_v20 = vadd.f32 %v5075_v55, %v11876_v14  ;;  %v5077_v0 = vpop.f32.mrb[27].mxu0  ;;  %6224 = vmatprep.subr.bf16.mxu1 %v9785_v25  ;;  %6450 = vmatprep.subr.bf16.mxu0 %v9788_v24  ;;  %v9794_v43 = vld [vmem:[%s13669_s1 + $0x114] ss:$40 sps:$4 sm:$0xff]   ;;  %v13921_v48 = vld [vmem:[#allocation52_spill] sm:$0xff] }
 0x1e8   : > { %13919 = vst [vmem:[#allocation27_spill] sm:$0xff] %v12406_v30  ;;  %v12424_v8 = vadd.f32 %v5077_v0, %v13921_v48  ;;  %v13924_v30 = vld [vmem:[#allocation13_spill] sm:$0xff]  ;;  %v9797_v24 = vld [vmem:[%s13669_s1 + $0xb5c] ss:$40 sps:$4 sm:$0xff]   ;;  %v9795_v54 = vld [vmem:[%s13669_s1 + $0xb58] ss:$40 sps:$4 sm:$0xff]  }
 0x1e9   : > { %13920 = vst [vmem:[#allocation12_spill] sm:$0xff] %v12415_v20  ;;  %5924 = vmatmul.mubr.bf16.gmra.mrb[36].mxu0 %v13923_v51  ;;  %6150 = vmatmul.mubr.bf16.gmra.mrb[68].mxu1 %v13924_v30  ;;  %v9789_v14 = vld [vmem:[%s13669_s1 + $0xb08] ss:$40 sps:$4 sm:$0xff]   ;;  %v9800_v55 = vld [vmem:[%s13669_s1 + $0x164] ss:$40 sps:$4 sm:$0xff]   ;;  %v13926_v0 = vld [vmem:[#allocation14_spill] sm:$0xff] }
 0x1ea   : > { %13922 = vst [vmem:[#allocation49_spill] sm:$0xff] %v12424_v8  ;;  %6225 = vmatpush1.bf16.msra.mxu1 %v9783_v9  ;;  %6451 = vmatpush1.bf16.msra.mxu0 %v9786_v44  ;;  %v9792_v25 = vld [vmem:[%s13669_s1 + $0x110] ss:$40 sps:$4 sm:$0xff]   ;;  %v13925_v44 = vld [vmem:[#allocation40_spill] sm:$0xff] }
 0x1eb   : > { %6226 = vmatprep.subr.bf16.mxu1 %v9791_v46  ;;  %6452 = vmatprep.subr.bf16.mxu0 %v9794_v43  ;;  %v13927_v48 = vld [vmem:[#allocation53_spill] sm:$0xff] }
 0x1ec   : > { %v5081_v9 = vpop.f32.mrb[28].mxu0  ;;  %5933 = vmatprep.mubr.bf16.mxu0 %v13925_v44  ;;  %6159 = vmatprep.mubr.bf16.mxu1 %v13926_v0  ;;  %v9798_v44 = vld [vmem:[%s13669_s1 + $0x160] ss:$40 sps:$4 sm:$0xff]  }
 0x1ed   : > { %v12443_v8 = vadd.f32 %v5081_v9, %v13927_v48  ;;  %v5083_v20 = vpop.f32.mrb[29].mxu0  ;;  %v9810_v48 = vld [vmem:[%s13669_s1 + $0x200] ss:$40 sps:$4 sm:$0xff]  }
 0x1ee   : > { %v12446_v46 = vadd.f32 %v5083_v20, %v11910_v1  ;;  %v5085_v43 = vpop.f32.mrb[30].mxu0  ;;  %6227 = vmatpush1.bf16.msra.mxu1 %v9789_v14  ;;  %6453 = vmatpush1.bf16.msra.mxu0 %v9792_v25  ;;  %v9803_v1 = vld [vmem:[%s13669_s1 + $0xbac] ss:$40 sps:$4 sm:$0xff]   ;;  %v9804_v25 = vld [vmem:[%s13669_s1 + $0x1b0] ss:$40 sps:$4 sm:$0xff]  }
 0x1ef   : > { %v12455_v0 = vadd.f32 %v5085_v43, %v11912_v49  ;;  %v5087_v9 = vpop.f32.mrb[31].mxu0  ;;  %6228 = vmatprep.subr.bf16.mxu1 %v9797_v24  ;;  %6454 = vmatprep.subr.bf16.mxu0 %v9800_v55  ;;  %v9806_v20 = vld [vmem:[%s13669_s1 + $0x1b4] ss:$40 sps:$4 sm:$0xff]   ;;  %v9801_v49 = vld [vmem:[%s13669_s1 + $0xba8] ss:$40 sps:$4 sm:$0xff]  }
 0x1f0   : > { %13928 = vst [vmem:[#allocation50_spill] sm:$0xff] %v12446_v46  ;;  %v12464_v14 = vadd.f32 %v5087_v9, %v11920_v32  ;;  %v9809_v32 = vld [vmem:[%s13669_s1 + $0xbfc] ss:$40 sps:$4 sm:$0xff]   ;;  %v9815_v43 = vld [vmem:[%s13669_s1 + $0xc4c] ss:$40 sps:$4 sm:$0xff]  }
 0x1f1   : > { %13929 = vst [vmem:[#allocation37_spill] sm:$0xff] %v12455_v0  ;;  %5934 = vmatmul.mubr.bf16.gmra.mrb[40].mxu0 %v11338_v38  ;;  %6160 = vmatmul.mubr.bf16.gmra.mrb[72].mxu1 %v13859_v61  ;;  %v9812_v24 = vld [vmem:[%s13669_s1 + $0x204] ss:$40 sps:$4 sm:$0xff]   ;;  %v13932_v55 = vld [vmem:[#allocation18_spill] sm:$0xff] }
 0x1f2   : > { %13930 = vst [vmem:[#allocation11_spill] sm:$0xff] %v12464_v14  ;;  %6229 = vmatpush1.bf16.msra.mxu1 %v9795_v54  ;;  %6455 = vmatpush1.bf16.msra.mxu0 %v9798_v44  ;;  %v13931_v54 = vld [vmem:[#allocation41_spill] sm:$0xff]  ;;  %v9807_v44 = vld [vmem:[%s13669_s1 + $0xbf8] ss:$40 sps:$4 sm:$0xff]   ;;  %v9836_v14 = vld [vmem:[%s13669_s1 + $0x344] ss:$40 sps:$4 sm:$0xff]  }
 0x1f3   : > { %6230 = vmatprep.subr.bf16.mxu1 %v9803_v1  ;;  %6456 = vmatprep.subr.bf16.mxu0 %v9806_v20  ;;  %v9818_v9 = vld [vmem:[%s13669_s1 + $0x254] ss:$40 sps:$4 sm:$0xff]   ;;  %v9813_v1 = vld [vmem:[%s13669_s1 + $0xc48] ss:$40 sps:$4 sm:$0xff]   ;;  %v9831_v46 = vld [vmem:[%s13669_s1 + $0xd38] ss:$40 sps:$4 sm:$0xff]  }
 0x1f4   : > { %5943 = vmatprep.mubr.bf16.mxu0 %v13931_v54  ;;  %6169 = vmatprep.mubr.bf16.mxu1 %v13932_v55  ;;  %v9816_v20 = vld [vmem:[%s13669_s1 + $0x250] ss:$40 sps:$4 sm:$0xff]   ;;  %v9842_v0 = vld [vmem:[%s13669_s1 + $0x394] ss:$40 sps:$4 sm:$0xff]  }
 0x1f6   : > { %6231 = vmatpush1.bf16.msra.mxu1 %v9801_v49  ;;  %6457 = vmatpush1.bf16.msra.mxu0 %v9804_v25  ;;  %v9821_v49 = vld [vmem:[%s13669_s1 + $0xc9c] ss:$40 sps:$4 sm:$0xff]  }
 0x1f7   : > { %6232 = vmatprep.subr.bf16.mxu1 %v9809_v32  ;;  %6458 = vmatprep.subr.bf16.mxu0 %v9812_v24  ;;  %v9824_v25 = vld [vmem:[%s13669_s1 + $0x2a4] ss:$40 sps:$4 sm:$0xff]   ;;  %v13933_v32 = vld [vmem:[#allocation42_spill] sm:$0xff] }
 0x1f8   : > { %v13934_v24 = vld [vmem:[#allocation22_spill] sm:$0xff] }
 0x1f9   : > { %5944 = vmatmul.mubr.bf16.gmra.mrb[44].mxu0 %v11380_v50  ;;  %6170 = vmatmul.mubr.bf16.gmra.mrb[76].mxu1 %v13861_v5 }
 0x1fa   : > { %6233 = vmatpush1.bf16.msra.mxu1 %v9807_v44  ;;  %6459 = vmatpush1.bf16.msra.mxu0 %v9810_v48  ;;  %v9819_v44 = vld [vmem:[%s13669_s1 + $0xc98] ss:$40 sps:$4 sm:$0xff]  }
 0x1fb   : > { %6234 = vmatprep.subr.bf16.mxu1 %v9815_v43  ;;  %6460 = vmatprep.subr.bf16.mxu0 %v9818_v9  ;;  %v9822_v48 = vld [vmem:[%s13669_s1 + $0x2a0] ss:$40 sps:$4 sm:$0xff]   ;;  %v9827_v43 = vld [vmem:[%s13669_s1 + $0xcec] ss:$40 sps:$4 sm:$0xff]  }
 0x1fc   : > { %5953 = vmatprep.mubr.bf16.mxu0 %v13933_v32  ;;  %6179 = vmatprep.mubr.bf16.mxu1 %v13934_v24  ;;  %v9830_v9 = vld [vmem:[%s13669_s1 + $0x2f4] ss:$40 sps:$4 sm:$0xff]  }
 0x1fe   : > { %6235 = vmatpush1.bf16.msra.mxu1 %v9813_v1  ;;  %6461 = vmatpush1.bf16.msra.mxu0 %v9816_v20  ;;  %v13935_v1 = vld [vmem:[#allocation25_spill] sm:$0xff] }
 0x1ff   : > { %6236 = vmatprep.subr.bf16.mxu1 %v9821_v49  ;;  %6462 = vmatprep.subr.bf16.mxu0 %v9824_v25  ;;  %v9825_v20 = vld [vmem:[%s13669_s1 + $0xce8] ss:$40 sps:$4 sm:$0xff]   ;;  %v9833_v25 = vld [vmem:[%s13669_s1 + $0xd3c] ss:$40 sps:$4 sm:$0xff]  }
 0x200   : > { %v9828_v49 = vld [vmem:[%s13669_s1 + $0x2f0] ss:$40 sps:$4 sm:$0xff]  }
 0x201   : > { %5954 = vmatmul.mubr.bf16.gmra.mrb[48].mxu0 %v11422_v11  ;;  %6180 = vmatmul.mubr.bf16.gmra.mrb[80].mxu1 %v13935_v1 }
 0x202   : > { %6237 = vmatpush1.bf16.msra.mxu1 %v9819_v44  ;;  %6463 = vmatpush1.bf16.msra.mxu0 %v9822_v48  ;;  %v13936_v44 = vld [vmem:[#allocation43_spill] sm:$0xff]  ;;  %v13937_v48 = vld [vmem:[#allocation26_spill] sm:$0xff] }
 0x203   : > { %6238 = vmatprep.subr.bf16.mxu1 %v9827_v43  ;;  %6464 = vmatprep.subr.bf16.mxu0 %v9830_v9  ;;  %v9834_v43 = vld [vmem:[%s13669_s1 + $0x340] ss:$40 sps:$4 sm:$0xff]   ;;  %v9839_v9 = vld [vmem:[%s13669_s1 + $0xd8c] ss:$40 sps:$4 sm:$0xff]  }
 0x204   : > { %5963 = vmatprep.mubr.bf16.mxu0 %v13936_v44  ;;  %6189 = vmatprep.mubr.bf16.mxu1 %v13937_v48 }
 0x206   : > { %6239 = vmatpush1.bf16.msra.mxu1 %v9825_v20  ;;  %6465 = vmatpush1.bf16.msra.mxu0 %v9828_v49  ;;  %v9837_v20 = vld [vmem:[%s13669_s1 + $0xd88] ss:$40 sps:$4 sm:$0xff]   ;;  %v9845_v49 = vld [vmem:[%s13669_s1 + $0xddc] ss:$40 sps:$4 sm:$0xff]  }
 0x207   : > { %6240 = vmatprep.subr.bf16.mxu1 %v9833_v25  ;;  %6466 = vmatprep.subr.bf16.mxu0 %v9836_v14  ;;  %v9840_v14 = vld [vmem:[%s13669_s1 + $0x390] ss:$40 sps:$4 sm:$0xff]   ;;  %v9848_v25 = vld [vmem:[%s13669_s1 + $0x3e4] ss:$40 sps:$4 sm:$0xff]  }
 0x209   : > { %5964 = vmatmul.mubr.bf16.gmra.mrb[52].mxu0 %v11465_v60  ;;  %6190 = vmatmul.mubr.bf16.gmra.mrb[84].mxu1 %v13866_v31 }
 0x20a   : > { %6241 = vmatpush1.bf16.msra.mxu1 %v9831_v46  ;;  %6467 = vmatpush1.bf16.msra.mxu0 %v9834_v43  ;;  %v9843_v46 = vld [vmem:[%s13669_s1 + $0xdd8] ss:$40 sps:$4 sm:$0xff]   ;;  %v9851_v43 = vld [vmem:[%s13669_s1 + $0xe2c] ss:$40 sps:$4 sm:$0xff]  }
 0x20b   : > { %6242 = vmatprep.subr.bf16.mxu1 %v9839_v9  ;;  %6468 = vmatprep.subr.bf16.mxu0 %v9842_v0  ;;  %v9846_v0 = vld [vmem:[%s13669_s1 + $0x3e0] ss:$40 sps:$4 sm:$0xff]   ;;  %v9854_v9 = vld [vmem:[%s13669_s1 + $0x434] ss:$40 sps:$4 sm:$0xff]  }
 0x20c   : > { %5973 = vmatprep.mubr.bf16.mxu0 %v11486_v7  ;;  %6199 = vmatprep.mubr.bf16.mxu1 %v10850_v27 }
 0x20e   : > { %6243 = vmatpush1.bf16.msra.mxu1 %v9837_v20  ;;  %6469 = vmatpush1.bf16.msra.mxu0 %v9840_v14  ;;  %v9849_v20 = vld [vmem:[%s13669_s1 + $0xe28] ss:$40 sps:$4 sm:$0xff]  }
 0x20f   : > { %6244 = vmatprep.subr.bf16.mxu1 %v9845_v49  ;;  %6470 = vmatprep.subr.bf16.mxu0 %v9848_v25  ;;  %v9852_v14 = vld [vmem:[%s13669_s1 + $0x430] ss:$40 sps:$4 sm:$0xff]   ;;  %v9857_v49 = vld [vmem:[%s13669_s1 + $0xe7c] ss:$40 sps:$4 sm:$0xff]  }
 0x210   : > { %v9860_v25 = vld [vmem:[%s13669_s1 + $0x484] ss:$40 sps:$4 sm:$0xff]  }
 0x211   : > { %5974 = vmatmul.mubr.bf16.gmra.mrb[56].mxu0 %v11506_v62  ;;  %6200 = vmatmul.mubr.bf16.gmra.mrb[88].mxu1 %v10880_v29 }
 0x212   : > { %6245 = vmatpush1.bf16.msra.mxu1 %v9843_v46  ;;  %6471 = vmatpush1.bf16.msra.mxu0 %v9846_v0  ;;  %v9855_v46 = vld [vmem:[%s13669_s1 + $0xe78] ss:$40 sps:$4 sm:$0xff]  }
 0x213   : > { %6246 = vmatprep.subr.bf16.mxu1 %v9851_v43  ;;  %6472 = vmatprep.subr.bf16.mxu0 %v9854_v9  ;;  %v9858_v0 = vld [vmem:[%s13669_s1 + $0x480] ss:$40 sps:$4 sm:$0xff]   ;;  %v9863_v43 = vld [vmem:[%s13669_s1 + $0xecc] ss:$40 sps:$4 sm:$0xff]  }
 0x214   : > { %5983 = vmatprep.mubr.bf16.mxu0 %v11525_v16  ;;  %6209 = vmatprep.mubr.bf16.mxu1 %v10899_v47  ;;  %v9866_v9 = vld [vmem:[%s13669_s1 + $0x4d4] ss:$40 sps:$4 sm:$0xff]  }
 0x216   : > { %6247 = vmatpush1.bf16.msra.mxu1 %v9849_v20  ;;  %6473 = vmatpush1.bf16.msra.mxu0 %v9852_v14  ;;  %v9861_v20 = vld [vmem:[%s13669_s1 + $0xec8] ss:$40 sps:$4 sm:$0xff]  }
 0x217   : > { %6248 = vmatprep.subr.bf16.mxu1 %v9857_v49  ;;  %6474 = vmatprep.subr.bf16.mxu0 %v9860_v25  ;;  %v9864_v14 = vld [vmem:[%s13669_s1 + $0x4d0] ss:$40 sps:$4 sm:$0xff]   ;;  %v9869_v49 = vld [vmem:[%s13669_s1 + $0xf1c] ss:$40 sps:$4 sm:$0xff]  }
 0x218   : > { %v9872_v25 = vld [vmem:[%s13669_s1 + $0x524] ss:$40 sps:$4 sm:$0xff]  }
 0x219   : > { %5984 = vmatmul.mubr.bf16.gmra.mrb[60].mxu0 %v11542_v39  ;;  %6210 = vmatmul.mubr.bf16.gmra.mrb[92].mxu1 %v10922_v28 }
 0x21a   : > { %6249 = vmatpush1.bf16.msra.mxu1 %v9855_v46  ;;  %6475 = vmatpush1.bf16.msra.mxu0 %v9858_v0  ;;  %v9867_v46 = vld [vmem:[%s13669_s1 + $0xf18] ss:$40 sps:$4 sm:$0xff]  }
 0x21b   : > { %6250 = vmatprep.subr.bf16.mxu1 %v9863_v43  ;;  %6476 = vmatprep.subr.bf16.mxu0 %v9866_v9  ;;  %v9870_v0 = vld [vmem:[%s13669_s1 + $0x520] ss:$40 sps:$4 sm:$0xff]   ;;  %v9875_v43 = vld [vmem:[%s13669_s1 + $0xf6c] ss:$40 sps:$4 sm:$0xff]  }
 0x21c   : > { %6252 = vmatprep.mubr.bf16.mxu1 %v10939_v18  ;;  %6478 = vmatprep.mubr.bf16.mxu0 %v10286_v34  ;;  %v9878_v34 = vld [vmem:[%s13669_s1 + $0x574] ss:$40 sps:$4 sm:$0xff]   ;;  %v9873_v9 = vld [vmem:[%s13669_s1 + $0xf68] ss:$40 sps:$4 sm:$0xff]  }
 0x21e   : > { %6251 = vmatpush1.bf16.msra.mxu1 %v9861_v20  ;;  %6477 = vmatpush1.bf16.msra.mxu0 %v9864_v14  ;;  %v9876_v20 = vld [vmem:[%s13669_s1 + $0x570] ss:$40 sps:$4 sm:$0xff]   ;;  %v9881_v14 = vld [vmem:[%s13669_s1 + $0xfbc] ss:$40 sps:$4 sm:$0xff]  }
 0x21f   : > { %6333 = vmatprep.subr.bf16.mxu1 %v9869_v49  ;;  %6559 = vmatprep.subr.bf16.mxu0 %v9872_v25  ;;  %v9879_v49 = vld [vmem:[%s13669_s1 + $0xfb8] ss:$40 sps:$4 sm:$0xff]  }
 0x220   : > { %v9882_v25 = vld [vmem:[%s13669_s1 + $0x5c0] ss:$40 sps:$4 sm:$0xff]  }
 0x221   : > { %6253 = vmatmul.mubr.bf16.vlgmr.msra.gmra.mrb[64].mxu1 %v10959_v33  ;;  %6479 = vmatmul.mubr.bf16.vlgmr.msra.gmra.mrb[64].mxu0 %v10479_v52  ;;  %v9884_v52 = vld [vmem:[%s13669_s1 + $0x5c4] ss:$40 sps:$4 sm:$0xff]  }
 0x222   : > { %6334 = vmatpush1.bf16.msra.mxu1 %v9867_v46  ;;  %6560 = vmatpush1.bf16.msra.mxu0 %v9870_v0  ;;  %v9887_v46 = vld [vmem:[%s13669_s1 + $0x100c] ss:$40 sps:$4 sm:$0xff]   ;;  %v9885_v0 = vld [vmem:[%s13669_s1 + $0x1008] ss:$40 sps:$4 sm:$0xff]  }
 0x223   : > { %6335 = vmatprep.subr.bf16.mxu1 %v9875_v43  ;;  %6561 = vmatprep.subr.bf16.mxu0 %v9878_v34  ;;  %v9888_v43 = vld [vmem:[%s13669_s1 + $0x610] ss:$40 sps:$4 sm:$0xff]   ;;  %v9893_v34 = vld [vmem:[%s13669_s1 + $0x105c] ss:$40 sps:$4 sm:$0xff]  }
 0x224   : > { %6262 = vmatprep.mubr.bf16.mxu1 %v10976_v58  ;;  %6488 = vmatprep.mubr.bf16.mxu0 %v10288_v35  ;;  %v9890_v35 = vld [vmem:[%s13669_s1 + $0x614] ss:$40 sps:$4 sm:$0xff]  }
 0x226   : > { %6336 = vmatpush1.bf16.msra.mxu1 %v9873_v9  ;;  %6562 = vmatpush1.bf16.msra.mxu0 %v9876_v20  ;;  %v9891_v9 = vld [vmem:[%s13669_s1 + $0x1058] ss:$40 sps:$4 sm:$0xff]  }
 0x227   : > { %6337 = vmatprep.subr.bf16.mxu1 %v9881_v14  ;;  %6563 = vmatprep.subr.bf16.mxu0 %v9884_v52  ;;  %v9894_v20 = vld [vmem:[%s13669_s1 + $0x660] ss:$40 sps:$4 sm:$0xff]   ;;  %v9899_v14 = vld [vmem:[%s13669_s1 + $0x10ac] ss:$40 sps:$4 sm:$0xff]  }
 0x228   : > { %v13938_v52 = vld [vmem:[#allocation29_spill] sm:$0xff] }
 0x229   : > { %6263 = vmatmul.mubr.bf16.gmra.mrb[68].mxu1 %v10995_v26  ;;  %6489 = vmatmul.mubr.bf16.gmra.mrb[68].mxu0 %v10495_v2  ;;  %v9896_v2 = vld [vmem:[%s13669_s1 + $0x664] ss:$40 sps:$4 sm:$0xff]  }
 0x22a   : > { %6338 = vmatpush1.bf16.msra.mxu1 %v9879_v49  ;;  %6564 = vmatpush1.bf16.msra.mxu0 %v9882_v25  ;;  %v13939_v49 = vld [vmem:[#allocation9_spill] sm:$0xff] }
 0x22b   : > { %6339 = vmatprep.subr.bf16.mxu1 %v9887_v46  ;;  %6565 = vmatprep.subr.bf16.mxu0 %v9890_v35  ;;  %v9897_v25 = vld [vmem:[%s13669_s1 + $0x10a8] ss:$40 sps:$4 sm:$0xff]   ;;  %v9905_v35 = vld [vmem:[%s13669_s1 + $0x10fc] ss:$40 sps:$4 sm:$0xff]  }
 0x22c   : > { %6272 = vmatprep.mubr.bf16.mxu1 %v11012_v21  ;;  %6498 = vmatprep.mubr.bf16.mxu0 %v10290_v36  ;;  %v9902_v36 = vld [vmem:[%s13669_s1 + $0x6b4] ss:$40 sps:$4 sm:$0xff]   ;;  %v9900_v46 = vld [vmem:[%s13669_s1 + $0x6b0] ss:$40 sps:$4 sm:$0xff]  }
 0x22e   : > { %6340 = vmatpush1.bf16.msra.mxu1 %v9885_v0  ;;  %6566 = vmatpush1.bf16.msra.mxu0 %v9888_v43  ;;  %v9908_v0 = vld [vmem:[%s13669_s1 + $0x704] ss:$40 sps:$4 sm:$0xff]  }
 0x22f   : > { %6341 = vmatprep.subr.bf16.mxu1 %v9893_v34  ;;  %6567 = vmatprep.subr.bf16.mxu0 %v9896_v2  ;;  %v13940_v34 = vld [vmem:[#allocation30_spill] sm:$0xff] }
 0x230   : > { %v13941_v2 = vld [vmem:[#allocation10_spill] sm:$0xff] }
 0x231   : > { %6273 = vmatmul.mubr.bf16.gmra.mrb[72].mxu1 %v13938_v52  ;;  %6499 = vmatmul.mubr.bf16.gmra.mrb[72].mxu0 %v13939_v49 }
 0x232   : > { %6342 = vmatpush1.bf16.msra.mxu1 %v9891_v9  ;;  %6568 = vmatpush1.bf16.msra.mxu0 %v9894_v20 }
 0x233   : > { %6343 = vmatprep.subr.bf16.mxu1 %v9899_v14  ;;  %6569 = vmatprep.subr.bf16.mxu0 %v9902_v36  ;;  %v9903_v14 = vld [vmem:[%s13669_s1 + $0x10f8] ss:$40 sps:$4 sm:$0xff]  }
 0x234   : > { %v12704_v43 = vpop.f32.mrb[32].mxu1  ;;  %6282 = vmatprep.mubr.bf16.mxu1 %v13940_v34  ;;  %6508 = vmatprep.mubr.bf16.mxu0 %v13941_v2  ;;  %v9906_v36 = vld [vmem:[%s13669_s1 + $0x700] ss:$40 sps:$4 sm:$0xff]   ;;  %v9911_v2 = vld [vmem:[%s13669_s1 + $0x114c] ss:$40 sps:$4 sm:$0xff]  }
 0x235   : > { %v12708_v9 = vpop.f32.mrb[33].mxu1 }
 0x236   : > { %13942 = vst [vmem:[#allocation51_spill] sm:$0xff] %v12708_v9  ;;  %v12710_v20 = vpop.f32.mrb[34].mxu1  ;;  %6344 = vmatpush1.bf16.msra.mxu1 %v9897_v25  ;;  %6570 = vmatpush1.bf16.msra.mxu0 %v9900_v46  ;;  %v9914_v25 = vld [vmem:[%s13669_s1 + $0x754] ss:$40 sps:$4 sm:$0xff]   ;;  %v9909_v46 = vld [vmem:[%s13669_s1 + $0x1148] ss:$40 sps:$4 sm:$0xff]  }
 0x237   : > { %v12718_v49 = vpop.f32.mrb[35].mxu1  ;;  %6345 = vmatprep.subr.bf16.mxu1 %v9905_v35  ;;  %6571 = vmatprep.subr.bf16.mxu0 %v9908_v0  ;;  %v9912_v35 = vld [vmem:[%s13669_s1 + $0x750] ss:$40 sps:$4 sm:$0xff]   ;;  %v9917_v0 = vld [vmem:[%s13669_s1 + $0x119c] ss:$40 sps:$4 sm:$0xff]  }
 0x238   : > { %13943 = vst [vmem:[#allocation52_spill] sm:$0xff] %v12718_v49 }
 0x239   : > { %6283 = vmatmul.mubr.bf16.gmra.mrb[76].mxu1 %v11067_v59  ;;  %6509 = vmatmul.mubr.bf16.gmra.mrb[76].mxu0 %v10591_v4  ;;  %v9920_v4 = vld [vmem:[%s13669_s1 + $0x7a4] ss:$40 sps:$4 sm:$0xff]  }
 0x23a   : > { %6346 = vmatpush1.bf16.msra.mxu1 %v9903_v14  ;;  %6572 = vmatpush1.bf16.msra.mxu0 %v9906_v36 }
 0x23b   : > { %6347 = vmatprep.subr.bf16.mxu1 %v9911_v2  ;;  %6573 = vmatprep.subr.bf16.mxu0 %v9914_v25  ;;  %v9915_v2 = vld [vmem:[%s13669_s1 + $0x1198] ss:$40 sps:$4 sm:$0xff]  }
 0x23c   : > { %v12740_v14 = vpop.f32.mrb[36].mxu1  ;;  %6292 = vmatprep.mubr.bf16.mxu1 %v11084_v22  ;;  %6518 = vmatprep.mubr.bf16.mxu0 %v10611_v3  ;;  %v9918_v25 = vld [vmem:[%s13669_s1 + $0x7a0] ss:$40 sps:$4 sm:$0xff]   ;;  %v9923_v3 = vld [vmem:[%s13669_s1 + $0x11ec] ss:$40 sps:$4 sm:$0xff]  }
 0x23d   : > { %v12744_v36 = vpop.f32.mrb[37].mxu1 }
 0x23e   : > { %13944 = vst [vmem:[#allocation39_spill] sm:$0xff] %v12744_v36  ;;  %v12746_v49 = vpop.f32.mrb[38].mxu1  ;;  %6348 = vmatpush1.bf16.msra.mxu1 %v9909_v46  ;;  %6574 = vmatpush1.bf16.msra.mxu0 %v9912_v35  ;;  %v9926_v46 = vld [vmem:[%s13669_s1 + $0x7f4] ss:$40 sps:$4 sm:$0xff]   ;;  %v9921_v35 = vld [vmem:[%s13669_s1 + $0x11e8] ss:$40 sps:$4 sm:$0xff]  }
 0x23f   : > { %v12754_v9 = vpop.f32.mrb[39].mxu1  ;;  %6349 = vmatprep.subr.bf16.mxu1 %v9917_v0  ;;  %6575 = vmatprep.subr.bf16.mxu0 %v9920_v4  ;;  %v9924_v0 = vld [vmem:[%s13669_s1 + $0x7f0] ss:$40 sps:$4 sm:$0xff]   ;;  %v9929_v4 = vld [vmem:[%s13669_s1 + $0x123c] ss:$40 sps:$4 sm:$0xff]  }
 0x240   : > { %13945 = vst [vmem:[#allocation13_spill] sm:$0xff] %v12754_v9 }
 0x241   : > { %6293 = vmatmul.mubr.bf16.gmra.mrb[80].mxu1 %v11103_v19  ;;  %6519 = vmatmul.mubr.bf16.gmra.mrb[80].mxu0 %v13875_v23  ;;  %v9932_v23 = vld [vmem:[%s13669_s1 + $0x844] ss:$40 sps:$4 sm:$0xff]  }
 0x242   : > { %6350 = vmatpush1.bf16.msra.mxu1 %v9915_v2  ;;  %6576 = vmatpush1.bf16.msra.mxu0 %v9918_v25 }
 0x243   : > { %6351 = vmatprep.subr.bf16.mxu1 %v9923_v3  ;;  %6577 = vmatprep.subr.bf16.mxu0 %v9926_v46  ;;  %v9927_v3 = vld [vmem:[%s13669_s1 + $0x1238] ss:$40 sps:$4 sm:$0xff]  }
 0x244   : > { %v12776_v2 = vpop.f32.mrb[40].mxu1  ;;  %6302 = vmatprep.mubr.bf16.mxu1 %v13876_v40  ;;  %6528 = vmatprep.mubr.bf16.mxu0 %v13877_v12  ;;  %v9930_v46 = vld [vmem:[%s13669_s1 + $0x840] ss:$40 sps:$4 sm:$0xff]   ;;  %v9935_v12 = vld [vmem:[%s13669_s1 + $0x128c] ss:$40 sps:$4 sm:$0xff]  }
 0x245   : > { %v12780_v25 = vpop.f32.mrb[41].mxu1 }
 0x246   : > { %13946 = vst [vmem:[#allocation53_spill] sm:$0xff] %v12780_v25  ;;  %v12782_v9 = vpop.f32.mrb[42].mxu1  ;;  %6352 = vmatpush1.bf16.msra.mxu1 %v9921_v35  ;;  %6578 = vmatpush1.bf16.msra.mxu0 %v9924_v0  ;;  %v9938_v35 = vld [vmem:[%s13669_s1 + $0x894] ss:$40 sps:$4 sm:$0xff]   ;;  %v9933_v0 = vld [vmem:[%s13669_s1 + $0x1288] ss:$40 sps:$4 sm:$0xff]  }
 0x247   : > { %v12790_v36 = vpop.f32.mrb[43].mxu1  ;;  %6353 = vmatprep.subr.bf16.mxu1 %v9929_v4  ;;  %6579 = vmatprep.subr.bf16.mxu0 %v9932_v23  ;;  %v9936_v4 = vld [vmem:[%s13669_s1 + $0x890] ss:$40 sps:$4 sm:$0xff]   ;;  %v9941_v23 = vld [vmem:[%s13669_s1 + $0x12dc] ss:$40 sps:$4 sm:$0xff]  }
 0x248   : > { %13947 = vst [vmem:[#allocation41_spill] sm:$0xff] %v12790_v36 }
 0x249   : > { %6303 = vmatmul.mubr.bf16.gmra.mrb[84].mxu1 %v13884_v10  ;;  %6529 = vmatmul.mubr.bf16.gmra.mrb[84].mxu0 %v13885_v41  ;;  %v9944_v41 = vld [vmem:[%s13669_s1 + $0x8e4] ss:$40 sps:$4 sm:$0xff]  }
 0x24a   : > { %6354 = vmatpush1.bf16.msra.mxu1 %v9927_v3  ;;  %6580 = vmatpush1.bf16.msra.mxu0 %v9930_v46 }
 0x24b   : > { %6355 = vmatprep.subr.bf16.mxu1 %v9935_v12  ;;  %6581 = vmatprep.subr.bf16.mxu0 %v9938_v35  ;;  %v9939_v12 = vld [vmem:[%s13669_s1 + $0x12d8] ss:$40 sps:$4 sm:$0xff]  }
 0x24c   : > { %v12812_v3 = vpop.f32.mrb[44].mxu1  ;;  %6312 = vmatprep.mubr.bf16.mxu1 %v13886_v6  ;;  %6538 = vmatprep.mubr.bf16.mxu0 %v13887_v53  ;;  %v9942_v35 = vld [vmem:[%s13669_s1 + $0x8e0] ss:$40 sps:$4 sm:$0xff]   ;;  %v9947_v53 = vld [vmem:[%s13669_s1 + $0x132c] ss:$40 sps:$4 sm:$0xff]  }
 0x24d   : > { %v12816_v46 = vpop.f32.mrb[45].mxu1 }
 0x24e   : > { %13948 = vst [vmem:[#allocation18_spill] sm:$0xff] %v12816_v46  ;;  %v12818_v36 = vpop.f32.mrb[46].mxu1  ;;  %6356 = vmatpush1.bf16.msra.mxu1 %v9933_v0  ;;  %6582 = vmatpush1.bf16.msra.mxu0 %v9936_v4  ;;  %v9950_v0 = vld [vmem:[%s13669_s1 + $0x934] ss:$40 sps:$4 sm:$0xff]   ;;  %v9945_v4 = vld [vmem:[%s13669_s1 + $0x1328] ss:$40 sps:$4 sm:$0xff]  }
 0x24f   : > { %v12826_v25 = vpop.f32.mrb[47].mxu1  ;;  %6357 = vmatprep.subr.bf16.mxu1 %v9941_v23  ;;  %6583 = vmatprep.subr.bf16.mxu0 %v9944_v41  ;;  %v9948_v23 = vld [vmem:[%s13669_s1 + $0x930] ss:$40 sps:$4 sm:$0xff]   ;;  %v9953_v41 = vld [vmem:[%s13669_s1 + $0x137c] ss:$40 sps:$4 sm:$0xff]  }
 0x250   : > { %13949 = vst [vmem:[#allocation42_spill] sm:$0xff] %v12826_v25 }
 0x251   : > { %6313 = vmatmul.mubr.bf16.gmra.mrb[88].mxu1 %v13894_v57  ;;  %6539 = vmatmul.mubr.bf16.gmra.mrb[88].mxu0 %v13895_v13  ;;  %v9956_v13 = vld [vmem:[%s13669_s1 + $0x984] ss:$40 sps:$4 sm:$0xff]  }
 0x252   : > { %6358 = vmatpush1.bf16.msra.mxu1 %v9939_v12  ;;  %6584 = vmatpush1.bf16.msra.mxu0 %v9942_v35 }
 0x253   : > { %6359 = vmatprep.subr.bf16.mxu1 %v9947_v53  ;;  %6585 = vmatprep.subr.bf16.mxu0 %v9950_v0  ;;  %v9951_v53 = vld [vmem:[%s13669_s1 + $0x1378] ss:$40 sps:$4 sm:$0xff]  }
 0x254   : > { %v12848_v12 = vpop.f32.mrb[48].mxu1  ;;  %6322 = vmatprep.mubr.bf16.mxu1 %v13896_v42  ;;  %6548 = vmatprep.mubr.bf16.mxu0 %v13897_v45  ;;  %v9954_v0 = vld [vmem:[%s13669_s1 + $0x980] ss:$40 sps:$4 sm:$0xff]   ;;  %v9959_v45 = vld [vmem:[%s13669_s1 + $0x13cc] ss:$40 sps:$4 sm:$0xff]  }
 0x255   : > { %v12852_v35 = vpop.f32.mrb[49].mxu1 }
 0x256   : > { %13950 = vst [vmem:[#allocation22_spill] sm:$0xff] %v12852_v35  ;;  %v12854_v25 = vpop.f32.mrb[50].mxu1  ;;  %6360 = vmatpush1.bf16.msra.mxu1 %v9945_v4  ;;  %6586 = vmatpush1.bf16.msra.mxu0 %v9948_v23  ;;  %v9962_v4 = vld [vmem:[%s13669_s1 + $0x9d4] ss:$40 sps:$4 sm:$0xff]   ;;  %v9957_v23 = vld [vmem:[%s13669_s1 + $0x13c8] ss:$40 sps:$4 sm:$0xff]  }
 0x257   : > { %v12862_v46 = vpop.f32.mrb[51].mxu1  ;;  %6361 = vmatprep.subr.bf16.mxu1 %v9953_v41  ;;  %6587 = vmatprep.subr.bf16.mxu0 %v9956_v13  ;;  %v9960_v41 = vld [vmem:[%s13669_s1 + $0x9d0] ss:$40 sps:$4 sm:$0xff]   ;;  %v9965_v13 = vld [vmem:[%s13669_s1 + $0xa24] ss:$40 sps:$4 sm:$0xff]  }
 0x258   : > { %13951 = vst [vmem:[#allocation25_spill] sm:$0xff] %v12862_v46  ;;  %v9968_v35 = vld [vmem:[%s13669_s1 + $0xa74] ss:$40 sps:$4 sm:$0xff]  }
 0x259   : > { %6323 = vmatmul.mubr.bf16.gmra.mrb[92].mxu1 %v13903_v15  ;;  %6549 = vmatmul.mubr.bf16.gmra.mrb[92].mxu0 %v13904_v63  ;;  %v13952_v63 = vld [vmem:[#allocation7_spill] sm:$0xff] }
 0x25a   : > { %6362 = vmatpush1.bf16.msra.mxu1 %v9951_v53  ;;  %6588 = vmatpush1.bf16.msra.mxu0 %v9954_v0 }
 0x25b   : > { %6363 = vmatprep.subr.bf16.mxu1 %v9959_v45  ;;  %6589 = vmatprep.subr.bf16.mxu0 %v9962_v4  ;;  %v9963_v45 = vld [vmem:[%s13669_s1 + $0xa20] ss:$40 sps:$4 sm:$0xff]  }
 0x25c   : > { %v12881_v46 = vpop.f32.mrb[52].mxu1  ;;  %6365 = vmatprep.mubr.bf16.mxu1 %v13905_v37  ;;  %6591 = vmatprep.mubr.bf16.mxu0 %v13952_v63  ;;  %v13957_v63 = vld [vmem:[#allocation8_spill] sm:$0xff] }
 0x25d   : > { %v12885_v53 = vpop.f32.mrb[53].mxu1 }
 0x25e   : > { %13953 = vst [vmem:[#allocation43_spill] sm:$0xff] %v12885_v53  ;;  %v12887_v0 = vpop.f32.mrb[54].mxu1  ;;  %6364 = vmatpush1.bf16.msra.mxu1 %v9957_v23  ;;  %6590 = vmatpush1.bf16.msra.mxu0 %v9960_v41  ;;  %v9966_v23 = vld [vmem:[%s13669_s1 + $0xa70] ss:$40 sps:$4 sm:$0xff]  }
 0x25f   : > { %13954 = vst [vmem:[#allocation26_spill] sm:$0xff] %v12887_v0  ;;  %v12892_v4 = vpop.f32.mrb[55].mxu1  ;;  %6672 = vmatprep.subr.bf16.mxu0 %v9965_v13  ;;  %v13956_v41 = vld [vmem:[#allocation38_spill] sm:$0xff]  ;;  %v9971_v13 = vld [vmem:[%s13669_s1 + $0xac4] ss:$40 sps:$4 sm:$0xff]  }
 0x260   : > { %13955 = vst [vmem:[#allocation29_spill] sm:$0xff] %v12892_v4 }
 0x261   : > { %6366 = vmatmul.mubr.bf16.vlgmr.msra.gmra.mrb[64].mxu1 %v13913_v56  ;;  %6592 = vmatmul.mubr.bf16.vlgmr.msra.gmra.mrb[64].mxu0 %v13914_v17  ;;  %v9969_v17 = vld [vmem:[%s13669_s1 + $0xac0] ss:$40 sps:$4 sm:$0xff]  }
 0x262   : > { %6673 = vmatpush1.bf16.msra.mxu0 %v9963_v45  ;;  %6375 = vmatprep.mubr.bf16.mxu1 %v13956_v41 }
 0x263   : > { %6674 = vmatprep.subr.bf16.mxu0 %v9968_v35  ;;  %6601 = vmatprep.mubr.bf16.mxu0 %v13957_v63  ;;  %v9974_v35 = vld [vmem:[%s13669_s1 + $0xb14] ss:$40 sps:$4 sm:$0xff]   ;;  %v13962_v63 = vld [vmem:[#allocation40_spill] sm:$0xff] }
 0x264   : > { %v12907_v4 = vpop.f32.mrb[56].mxu1 }
 0x265   : > { %13958 = vst [vmem:[#allocation9_spill] sm:$0xff] %v12907_v4  ;;  %v12909_v53 = vpop.f32.mrb[57].mxu1 }
 0x266   : > { %13959 = vst [vmem:[#allocation30_spill] sm:$0xff] %v12909_v53  ;;  %v12911_v0 = vpop.f32.mrb[58].mxu1  ;;  %6675 = vmatpush1.bf16.msra.mxu0 %v9966_v23  ;;  %v9972_v23 = vld [vmem:[%s13669_s1 + $0xb10] ss:$40 sps:$4 sm:$0xff]  }
 0x267   : > { %13960 = vst [vmem:[#allocation10_spill] sm:$0xff] %v12911_v0  ;;  %v12916_v45 = vpop.f32.mrb[59].mxu1  ;;  %6676 = vmatprep.subr.bf16.mxu0 %v9971_v13  ;;  %v13963_v53 = vld [vmem:[#allocation14_spill] sm:$0xff]  ;;  %v9977_v13 = vld [vmem:[%s13669_s1 + $0xb64] ss:$40 sps:$4 sm:$0xff]  }
 0x268   : > { %13961 = vst [vmem:[#allocation7_spill] sm:$0xff] %v12916_v45 }
 0x269   : > { %6376 = vmatmul.mubr.bf16.gmra.mrb[68].mxu1 %v13923_v51  ;;  %6602 = vmatmul.mubr.bf16.gmra.mrb[68].mxu0 %v13924_v30  ;;  %v9975_v30 = vld [vmem:[%s13669_s1 + $0xb60] ss:$40 sps:$4 sm:$0xff]  }
 0x26a   : > { %6677 = vmatpush1.bf16.msra.mxu0 %v9969_v17  ;;  %6385 = vmatprep.mubr.bf16.mxu1 %v13962_v63 }
 0x26b   : > { %6678 = vmatprep.subr.bf16.mxu0 %v9974_v35  ;;  %6611 = vmatprep.mubr.bf16.mxu0 %v13963_v53  ;;  %v9980_v53 = vld [vmem:[%s13669_s1 + $0xbb4] ss:$40 sps:$4 sm:$0xff]   ;;  %v9978_v35 = vld [vmem:[%s13669_s1 + $0xbb0] ss:$40 sps:$4 sm:$0xff]  }
 0x26c   : > { %v12931_v45 = vpop.f32.mrb[60].mxu1 }
 0x26d   : > { %v12933_v0 = vpop.f32.mrb[61].mxu1 }
 0x26e   : > { %13964 = vst [vmem:[#allocation38_spill] sm:$0xff] %v12933_v0  ;;  %v12935_v4 = vpop.f32.mrb[62].mxu1  ;;  %6679 = vmatpush1.bf16.msra.mxu0 %v9972_v23  ;;  %v9983_v23 = vld [vmem:[%s13669_s1 + $0xc04] ss:$40 sps:$4 sm:$0xff]  }
 0x26f   : > { %v12940_v17 = vpop.f32.mrb[63].mxu1  ;;  %6680 = vmatprep.subr.bf16.mxu0 %v9977_v13  ;;  %v9981_v13 = vld [vmem:[%s13669_s1 + $0xc00] ss:$40 sps:$4 sm:$0xff]  }
 0x270   : > { %13965 = vst [vmem:[#allocation8_spill] sm:$0xff] %v12940_v17 }
 0x271   : > { %6386 = vmatmul.mubr.bf16.gmra.mrb[72].mxu1 %v11338_v38  ;;  %6612 = vmatmul.mubr.bf16.gmra.mrb[72].mxu0 %v13859_v61  ;;  %v9986_v61 = vld [vmem:[%s13669_s1 + $0xc54] ss:$40 sps:$4 sm:$0xff]  }
 0x272   : > { %6681 = vmatpush1.bf16.msra.mxu0 %v9975_v30  ;;  %6395 = vmatprep.mubr.bf16.mxu1 %v13931_v54  ;;  %v9989_v30 = vld [vmem:[%s13669_s1 + $0xca4] ss:$40 sps:$4 sm:$0xff]  }
 0x273   : > { %6682 = vmatprep.subr.bf16.mxu0 %v9980_v53  ;;  %6621 = vmatprep.mubr.bf16.mxu0 %v13932_v55  ;;  %v9984_v55 = vld [vmem:[%s13669_s1 + $0xc50] ss:$40 sps:$4 sm:$0xff]   ;;  %v9987_v53 = vld [vmem:[%s13669_s1 + $0xca0] ss:$40 sps:$4 sm:$0xff]  }
 0x276   : > { %6683 = vmatpush1.bf16.msra.mxu0 %v9978_v35  ;;  %v9995_v35 = vld [vmem:[%s13669_s1 + $0xd44] ss:$40 sps:$4 sm:$0xff]  }
 0x277   : > { %6684 = vmatprep.subr.bf16.mxu0 %v9983_v23  ;;  %v9993_v23 = vld [vmem:[%s13669_s1 + $0xd40] ss:$40 sps:$4 sm:$0xff]  }
 0x279   : > { %6396 = vmatmul.mubr.bf16.gmra.mrb[76].mxu1 %v11380_v50  ;;  %6622 = vmatmul.mubr.bf16.gmra.mrb[76].mxu0 %v13861_v5  ;;  %v9992_v5 = vld [vmem:[%s13669_s1 + $0xcf4] ss:$40 sps:$4 sm:$0xff]  }
 0x27a   : > { %6685 = vmatpush1.bf16.msra.mxu0 %v9981_v13  ;;  %6405 = vmatprep.mubr.bf16.mxu1 %v13933_v32  ;;  %v10001_v13 = vld [vmem:[%s13669_s1 + $0xde4] ss:$40 sps:$4 sm:$0xff]  }
 0x27b   : > { %6686 = vmatprep.subr.bf16.mxu0 %v9986_v61  ;;  %6631 = vmatprep.mubr.bf16.mxu0 %v13934_v24  ;;  %v9990_v24 = vld [vmem:[%s13669_s1 + $0xcf0] ss:$40 sps:$4 sm:$0xff]   ;;  %v9999_v61 = vld [vmem:[%s13669_s1 + $0xde0] ss:$40 sps:$4 sm:$0xff]  }
 0x27e   : > { %6687 = vmatpush1.bf16.msra.mxu0 %v9984_v55  ;;  %v10007_v55 = vld [vmem:[%s13669_s1 + $0xe84] ss:$40 sps:$4 sm:$0xff]  }
 0x27f   : > { %6688 = vmatprep.subr.bf16.mxu0 %v9989_v30  ;;  %v10005_v30 = vld [vmem:[%s13669_s1 + $0xe80] ss:$40 sps:$4 sm:$0xff]  }
 0x281   : > { %6406 = vmatmul.mubr.bf16.gmra.mrb[80].mxu1 %v11422_v11  ;;  %6632 = vmatmul.mubr.bf16.gmra.mrb[80].mxu0 %v13935_v1  ;;  %v9998_v1 = vld [vmem:[%s13669_s1 + $0xd94] ss:$40 sps:$4 sm:$0xff]  }
 0x282   : > { %6689 = vmatpush1.bf16.msra.mxu0 %v9987_v53  ;;  %6415 = vmatprep.mubr.bf16.mxu1 %v13936_v44  ;;  %v10013_v53 = vld [vmem:[%s13669_s1 + $0xf24] ss:$40 sps:$4 sm:$0xff]  }
 0x283   : > { %6690 = vmatprep.subr.bf16.mxu0 %v9992_v5  ;;  %6641 = vmatprep.mubr.bf16.mxu0 %v13937_v48  ;;  %v9996_v48 = vld [vmem:[%s13669_s1 + $0xd90] ss:$40 sps:$4 sm:$0xff]   ;;  %v10011_v5 = vld [vmem:[%s13669_s1 + $0xf20] ss:$40 sps:$4 sm:$0xff]  }
 0x286   : > { %6691 = vmatpush1.bf16.msra.mxu0 %v9990_v24  ;;  %v10019_v24 = vld [vmem:[%s13669_s1 + $0xfc4] ss:$40 sps:$4 sm:$0xff]  }
 0x287   : > { %6692 = vmatprep.subr.bf16.mxu0 %v9995_v35  ;;  %v10017_v35 = vld [vmem:[%s13669_s1 + $0xfc0] ss:$40 sps:$4 sm:$0xff]  }
 0x289   : > { %6416 = vmatmul.mubr.bf16.gmra.mrb[84].mxu1 %v11465_v60  ;;  %6642 = vmatmul.mubr.bf16.gmra.mrb[84].mxu0 %v13866_v31  ;;  %v10004_v31 = vld [vmem:[%s13669_s1 + $0xe34] ss:$40 sps:$4 sm:$0xff]  }
 0x28a   : > { %6693 = vmatpush1.bf16.msra.mxu0 %v9993_v23  ;;  %6425 = vmatprep.mubr.bf16.mxu1 %v11486_v7  ;;  %v10025_v23 = vld [vmem:[%s13669_s1 + $0x1064] ss:$40 sps:$4 sm:$0xff]  }
 0x28b   : > { %6694 = vmatprep.subr.bf16.mxu0 %v9998_v1  ;;  %6651 = vmatprep.mubr.bf16.mxu0 %v10850_v27  ;;  %v10002_v27 = vld [vmem:[%s13669_s1 + $0xe30] ss:$40 sps:$4 sm:$0xff]   ;;  %v10023_v1 = vld [vmem:[%s13669_s1 + $0x1060] ss:$40 sps:$4 sm:$0xff]  }
 0x28e   : > { %6695 = vmatpush1.bf16.msra.mxu0 %v9996_v48  ;;  %v10031_v48 = vld [vmem:[%s13669_s1 + $0x1104] ss:$40 sps:$4 sm:$0xff]  }
 0x28f   : > { %6696 = vmatprep.subr.bf16.mxu0 %v10001_v13 }
 0x291   : > { %6426 = vmatmul.mubr.bf16.gmra.mrb[88].mxu1 %v11506_v62  ;;  %6652 = vmatmul.mubr.bf16.gmra.mrb[88].mxu0 %v10880_v29  ;;  %v10010_v29 = vld [vmem:[%s13669_s1 + $0xed4] ss:$40 sps:$4 sm:$0xff]  }
 0x292   : > { %6697 = vmatpush1.bf16.msra.mxu0 %v9999_v61  ;;  %6435 = vmatprep.mubr.bf16.mxu1 %v11525_v16 }
 0x293   : > { %6698 = vmatprep.subr.bf16.mxu0 %v10004_v31  ;;  %6661 = vmatprep.mubr.bf16.mxu0 %v10899_v47  ;;  %v10008_v47 = vld [vmem:[%s13669_s1 + $0xed0] ss:$40 sps:$4 sm:$0xff]  }
 0x294   : > { %v13966_v31 = vld [vmem:[#allocation17_spill] sm:$0xff] }
 0x296   : > { %6699 = vmatpush1.bf16.msra.mxu0 %v10002_v27  ;;  %v6898_v27 = vmul.f32 %v13966_v31, %v13966_v31  ;;  %v13969_v31 = vld [vmem:[#allocation57_spill] sm:$0xff] }
 0x297   : > { %6700 = vmatprep.subr.bf16.mxu0 %v10007_v55 }
 0x299   : > { %6436 = vmatmul.mubr.bf16.gmra.mrb[92].mxu1 %v11542_v39  ;;  %6662 = vmatmul.mubr.bf16.gmra.mrb[92].mxu0 %v10922_v28  ;;  %v10016_v28 = vld [vmem:[%s13669_s1 + $0xf74] ss:$40 sps:$4 sm:$0xff]  }
 0x29a   : > { %6701 = vmatpush1.bf16.msra.mxu0 %v10005_v30  ;;  %6704 = vmatprep.mubr.bf16.mxu0 %v10939_v18  ;;  %v10014_v18 = vld [vmem:[%s13669_s1 + $0xf70] ss:$40 sps:$4 sm:$0xff]   ;;  %v10029_v30 = vld [vmem:[%s13669_s1 + $0x1100] ss:$40 sps:$4 sm:$0xff]  }
 0x29b   : > { %6702 = vmatprep.subr.bf16.mxu0 %v10010_v29  ;;  %v10034_v29 = vld [vmem:[%s13669_s1 + $0x1154] ss:$40 sps:$4 sm:$0xff]  }
 0x29e   : > { %6703 = vmatpush1.bf16.msra.mxu0 %v10008_v47  ;;  %v13967_v47 = vld [vmem:[#allocation28_spill] sm:$0xff] }
 0x29f   : > { %6785 = vmatprep.subr.bf16.mxu0 %v10013_v53  ;;  %v6903_v53 = vmul.f32 %v13967_v47, %v13967_v47  ;;  %v10043_v47 = vld [vmem:[%s13669_s1 + $0x1244] ss:$40 sps:$4 sm:$0xff]  }
 0x2a1   : > { %6705 = vmatmul.mubr.bf16.vlgmr.msra.gmra.mrb[64].mxu0 %v10959_v33  ;;  %v10022_v33 = vld [vmem:[%s13669_s1 + $0x1014] ss:$40 sps:$4 sm:$0xff]  }
 0x2a2   : > { %6786 = vmatpush1.bf16.msra.mxu0 %v10011_v5  ;;  %6714 = vmatprep.mubr.bf16.mxu0 %v10976_v58  ;;  %v10020_v58 = vld [vmem:[%s13669_s1 + $0x1010] ss:$40 sps:$4 sm:$0xff]  }
 0x2a3   : > { %6787 = vmatprep.subr.bf16.mxu0 %v10016_v28 }
 0x2a6   : > { %6788 = vmatpush1.bf16.msra.mxu0 %v10014_v18 }
 0x2a7   : > { %6789 = vmatprep.subr.bf16.mxu0 %v10019_v24  ;;  %v10032_v24 = vld [vmem:[%s13669_s1 + $0x1150] ss:$40 sps:$4 sm:$0xff]  }
 0x2a9   : > { %6715 = vmatmul.mubr.bf16.gmra.mrb[68].mxu0 %v10995_v26  ;;  %v10028_v26 = vld [vmem:[%s13669_s1 + $0x10b4] ss:$40 sps:$4 sm:$0xff]  }
 0x2aa   : > { %6790 = vmatpush1.bf16.msra.mxu0 %v10017_v35  ;;  %6724 = vmatprep.mubr.bf16.mxu0 %v11012_v21  ;;  %v10026_v21 = vld [vmem:[%s13669_s1 + $0x10b0] ss:$40 sps:$4 sm:$0xff]   ;;  %v10037_v35 = vld [vmem:[%s13669_s1 + $0x11a4] ss:$40 sps:$4 sm:$0xff]  }
 0x2ab   : > { %6791 = vmatprep.subr.bf16.mxu0 %v10022_v33 }
 0x2ae   : > { %6792 = vmatpush1.bf16.msra.mxu0 %v10020_v58 }
 0x2af   : > { %6793 = vmatprep.subr.bf16.mxu0 %v10025_v23  ;;  %v13968_v23 = vld [vmem:[#allocation55_spill] sm:$0xff] }
 0x2b1   : > { %6725 = vmatmul.mubr.bf16.gmra.mrb[72].mxu0 %v13938_v52 }
 0x2b2   : > { %6794 = vmatpush1.bf16.msra.mxu0 %v10023_v1  ;;  %6734 = vmatprep.mubr.bf16.mxu0 %v13940_v34  ;;  %v6908_v1 = vmul.f32 %v13968_v23, %v13968_v23 }
 0x2b3   : > { %6795 = vmatprep.subr.bf16.mxu0 %v10028_v26 }
 0x2b4   : > { %v13076_v13 = vpop.f32.mrb[32].mxu0 }
 0x2b5   : > { %v5917_v61 = vpop.f32.mrb[33].mxu0 }
 0x2b6   : > { %v6978_v55 = vmul.f32 %v5917_v61, %v5917_v61  ;;  %v13080_v52 = vpop.f32.mrb[34].mxu0  ;;  %6796 = vmatpush1.bf16.msra.mxu0 %v10026_v21  ;;  %v10040_v61 = vld [vmem:[%s13669_s1 + $0x11f4] ss:$40 sps:$4 sm:$0xff]  }
 0x2b7   : > { %v5921_v34 = vpop.f32.mrb[35].mxu0  ;;  %6797 = vmatprep.subr.bf16.mxu0 %v10031_v48 }
 0x2b8   : > { %v13090_v5 = vadd.f32 %v6978_v55, %v6898_v27  ;;  %v6983_v28 = vmul.f32 %v5921_v34, %v5921_v34  ;;  %v6913_v27 = vmul.f32 %v13969_v31, %v13969_v31 }
 0x2b9   : > { %6735 = vmatmul.mubr.bf16.gmra.mrb[76].mxu0 %v11067_v59 }
 0x2ba   : > { %v13093_v18 = vadd.f32 %v6983_v28, %v6903_v53  ;;  %6798 = vmatpush1.bf16.msra.mxu0 %v10029_v30  ;;  %6744 = vmatprep.mubr.bf16.mxu0 %v11084_v22  ;;  %v10035_v22 = vld [vmem:[%s13669_s1 + $0x11a0] ss:$40 sps:$4 sm:$0xff]  }
 0x2bb   : > { %6799 = vmatprep.subr.bf16.mxu0 %v10034_v29  ;;  %v10038_v29 = vld [vmem:[%s13669_s1 + $0x11f0] ss:$40 sps:$4 sm:$0xff]  }
 0x2bc   : > { %v13104_v58 = vpop.f32.mrb[36].mxu0 }
 0x2bd   : > { %v5927_v59 = vpop.f32.mrb[37].mxu0 }
 0x2be   : > { %v6988_v26 = vmul.f32 %v5927_v59, %v5927_v59  ;;  %v13108_v21 = vpop.f32.mrb[38].mxu0  ;;  %6800 = vmatpush1.bf16.msra.mxu0 %v10032_v24  ;;  %v13970_v24 = vld [vmem:[#allocation15_spill] sm:$0xff] }
 0x2bf   : > { %v5931_v48 = vpop.f32.mrb[39].mxu0  ;;  %6801 = vmatprep.subr.bf16.mxu0 %v10037_v35  ;;  %v6918_v35 = vmul.f32 %v13970_v24, %v13970_v24  ;;  %v13972_v24 = vld [vmem:[#allocation45_spill] sm:$0xff] }
 0x2c0   : > { %v13118_v55 = vadd.f32 %v6988_v26, %v6908_v1  ;;  %v6993_v30 = vmul.f32 %v5931_v48, %v5931_v48  ;;  %v10046_v26 = vld [vmem:[%s13669_s1 + $0x1294] ss:$40 sps:$4 sm:$0xff]  }
 0x2c1   : > { %6745 = vmatmul.mubr.bf16.gmra.mrb[80].mxu0 %v11103_v19 }
 0x2c2   : > { %v13121_v34 = vadd.f32 %v6993_v30, %v6913_v27  ;;  %6802 = vmatpush1.bf16.msra.mxu0 %v10035_v22  ;;  %6754 = vmatprep.mubr.bf16.mxu0 %v13876_v40  ;;  %v10041_v40 = vld [vmem:[%s13669_s1 + $0x1240] ss:$40 sps:$4 sm:$0xff]   ;;  %v10044_v30 = vld [vmem:[%s13669_s1 + $0x1290] ss:$40 sps:$4 sm:$0xff]  }
 0x2c3   : > { %6803 = vmatprep.subr.bf16.mxu0 %v10040_v61  ;;  %v13971_v22 = vld [vmem:[#allocation16_spill] sm:$0xff] }
 0x2c4   : > { %v13132_v28 = vpop.f32.mrb[40].mxu0  ;;  %v6923_v48 = vmul.f32 %v13971_v22, %v13971_v22  ;;  %v13973_v22 = vld [vmem:[#allocation19_spill] sm:$0xff] }
 0x2c5   : > { %v5937_v19 = vpop.f32.mrb[41].mxu0 }
 0x2c6   : > { %v6998_v59 = vmul.f32 %v5937_v19, %v5937_v19  ;;  %v13136_v23 = vpop.f32.mrb[42].mxu0  ;;  %6804 = vmatpush1.bf16.msra.mxu0 %v10038_v29  ;;  %v10049_v29 = vld [vmem:[%s13669_s1 + $0x12e4] ss:$40 sps:$4 sm:$0xff]  }
 0x2c7   : > { %v5941_v1 = vpop.f32.mrb[43].mxu0  ;;  %6805 = vmatprep.subr.bf16.mxu0 %v10043_v47 }
 0x2c8   : > { %v13146_v61 = vadd.f32 %v6998_v59, %v6918_v35  ;;  %v7003_v31 = vmul.f32 %v5941_v1, %v5941_v1  ;;  %v6928_v35 = vmul.f32 %v13972_v24, %v13972_v24 }
 0x2c9   : > { %6755 = vmatmul.mubr.bf16.gmra.mrb[84].mxu0 %v13884_v10 }
 0x2ca   : > { %v13149_v27 = vadd.f32 %v7003_v31, %v6923_v48  ;;  %6806 = vmatpush1.bf16.msra.mxu0 %v10041_v40  ;;  %6764 = vmatprep.mubr.bf16.mxu0 %v13886_v6  ;;  %v10047_v6 = vld [vmem:[%s13669_s1 + $0x12e0] ss:$40 sps:$4 sm:$0xff]   ;;  %v6933_v48 = vmul.f32 %v13973_v22, %v13973_v22 }
 0x2cb   : > { %6807 = vmatprep.subr.bf16.mxu0 %v10046_v26  ;;  %v10052_v26 = vld [vmem:[%s13669_s1 + $0x1334] ss:$40 sps:$4 sm:$0xff]  }
 0x2cc   : > { %v13160_v19 = vpop.f32.mrb[44].mxu0 }
 0x2cd   : > { %v5947_v10 = vpop.f32.mrb[45].mxu0 }
 0x2ce   : > { %v7008_v59 = vmul.f32 %v5947_v10, %v5947_v10  ;;  %v13164_v40 = vpop.f32.mrb[46].mxu0  ;;  %6808 = vmatpush1.bf16.msra.mxu0 %v10044_v30  ;;  %v10050_v30 = vld [vmem:[%s13669_s1 + $0x1330] ss:$40 sps:$4 sm:$0xff]  }
 0x2cf   : > { %v5951_v1 = vpop.f32.mrb[47].mxu0  ;;  %6809 = vmatprep.subr.bf16.mxu0 %v10049_v29  ;;  %v10055_v29 = vld [vmem:[%s13669_s1 + $0x1384] ss:$40 sps:$4 sm:$0xff]  }
 0x2d0   : > { %v13174_v31 = vadd.f32 %v7008_v59, %v6928_v35  ;;  %v7013_v24 = vmul.f32 %v5951_v1, %v5951_v1  ;;  %v13974_v1 = vld [vmem:[#allocation20_spill] sm:$0xff]  ;;  %v13975_v35 = vld [vmem:[#allocation47_spill] sm:$0xff] }
 0x2d1   : > { %6765 = vmatmul.mubr.bf16.gmra.mrb[88].mxu0 %v13894_v57  ;;  %v6943_v47 = vmul.f32 %v13975_v35, %v13975_v35 }
 0x2d2   : > { %v13177_v10 = vadd.f32 %v7013_v24, %v6933_v48  ;;  %6810 = vmatpush1.bf16.msra.mxu0 %v10047_v6  ;;  %6774 = vmatprep.mubr.bf16.mxu0 %v13896_v42  ;;  %v6938_v6 = vmul.f32 %v13974_v1, %v13974_v1  ;;  %v10053_v42 = vld [vmem:[%s13669_s1 + $0x1380] ss:$40 sps:$4 sm:$0xff]   ;;  %v10058_v24 = vld [vmem:[%s13669_s1 + $0x13d4] ss:$40 sps:$4 sm:$0xff]  }
 0x2d3   : > { %6811 = vmatprep.subr.bf16.mxu0 %v10052_v26 }
 0x2d4   : > { %v13188_v59 = vpop.f32.mrb[48].mxu0 }
 0x2d5   : > { %v5957_v57 = vpop.f32.mrb[49].mxu0 }
 0x2d6   : > { %v7018_v22 = vmul.f32 %v5957_v57, %v5957_v57  ;;  %v13192_v48 = vpop.f32.mrb[50].mxu0  ;;  %6812 = vmatpush1.bf16.msra.mxu0 %v10050_v30  ;;  %v10056_v30 = vld [vmem:[%s13669_s1 + $0x13d0] ss:$40 sps:$4 sm:$0xff]  }
 0x2d7   : > { %v5961_v26 = vpop.f32.mrb[51].mxu0  ;;  %6813 = vmatprep.subr.bf16.mxu0 %v10055_v29 }
 0x2d8   : > { %v13202_v53 = vadd.f32 %v7018_v22, %v6938_v6  ;;  %v7023_v1 = vmul.f32 %v5961_v26, %v5961_v26  ;;  %v13976_v6 = vld [vmem:[#allocation23_spill] sm:$0xff]  ;;  %v13978_v26 = vld [vmem:[#allocation24_spill] sm:$0xff] }
 0x2d9   : > { %6775 = vmatmul.mubr.bf16.gmra.mrb[92].mxu0 %v13903_v15  ;;  %v6948_v22 = vmul.f32 %v13976_v6, %v13976_v6  ;;  %v6968_v6 = vmul.f32 %v12443_v8, %v12443_v8  ;;  %v13983_v8 = vld [vmem:[#allocation21_spill] sm:$0xff] }
 0x2da   : > { %v13205_v57 = vadd.f32 %v7023_v1, %v6943_v47  ;;  %6814 = vmatpush1.bf16.msra.mxu0 %v10053_v42  ;;  %6817 = vmatprep.mubr.bf16.mxu0 %v13905_v37  ;;  %v6953_v1 = vmul.f32 %v13978_v26, %v13978_v26 }
 0x2db   : > { %6815 = vmatprep.subr.bf16.mxu0 %v10058_v24 }
 0x2dc   : > { %v13213_v33 = vpop.f32.mrb[52].mxu0 }
 0x2dd   : > { %v5967_v35 = vpop.f32.mrb[53].mxu0 }
 0x2de   : > { %v7028_v15 = vmul.f32 %v5967_v35, %v5967_v35  ;;  %v13217_v47 = vpop.f32.mrb[54].mxu0  ;;  %6816 = vmatpush1.bf16.msra.mxu0 %v10056_v30  ;;  %v13979_v30 = vld [vmem:[#allocation36_spill] sm:$0xff] }
 0x2df   : > { %13977 = vst [vmem:[#allocation40_spill] sm:$0xff] %v13217_v47  ;;  %v5971_v42 = vpop.f32.mrb[55].mxu0  ;;  %v6958_v0 = vmul.f32 %v13979_v30, %v13979_v30 }
 0x2e0   : > { %v13221_v17 = vadd.f32 %v7028_v15, %v6948_v22  ;;  %v7033_v37 = vmul.f32 %v5971_v42, %v5971_v42  ;;  %v13981_v15 = vld [vmem:[#allocation12_spill] sm:$0xff] }
 0x2e1   : > { %6818 = vmatmul.mubr.bf16.vlgmr.msra.gmra.mrb[64].mxu0 %v13913_v56  ;;  %v6963_v56 = vmul.f32 %v13981_v15, %v13981_v15 }
 0x2e2   : > { %v13224_v24 = vadd.f32 %v7033_v37, %v6953_v1  ;;  %6827 = vmatprep.mubr.bf16.mxu0 %v13956_v41 }
 0x2e4   : > { %v13229_v35 = vpop.f32.mrb[56].mxu0 }
 0x2e5   : > { %v5977_v29 = vpop.f32.mrb[57].mxu0 }
 0x2e6   : > { %v7038_v47 = vmul.f32 %v5977_v29, %v5977_v29  ;;  %v13233_v26 = vpop.f32.mrb[58].mxu0 }
 0x2e7   : > { %13980 = vst [vmem:[#allocation14_spill] sm:$0xff] %v13233_v26  ;;  %v5981_v22 = vpop.f32.mrb[59].mxu0 }
 0x2e8   : > { %v13237_v42 = vadd.f32 %v7038_v47, %v6958_v0  ;;  %v7043_v1 = vmul.f32 %v5981_v22, %v5981_v22  ;;  %v13982_v47 = vld [vmem:[#allocation37_spill] sm:$0xff] }
 0x2e9   : > { %6828 = vmatmul.mubr.bf16.gmra.mrb[68].mxu0 %v13923_v51  ;;  %v6973_v51 = vmul.f32 %v13982_v47, %v13982_v47 }
 0x2ea   : > { %v13240_v41 = vadd.f32 %v7043_v1, %v6963_v56  ;;  %6837 = vmatprep.mubr.bf16.mxu0 %v13962_v63 }
 0x2ec   : > { %v7168_v37 = vpack.c.bf16 %v13240_v41, %v13237_v42  ;;  %v13245_v30 = vpop.f32.mrb[60].mxu0  ;;  %v10062_v41 = vld [vmem:[%s13670_s2 + $0x2c] ss:$20 sps:$4 sm:$0xff]  }
 0x2ed   : > { %v5987_v29 = vpop.f32.mrb[61].mxu0 }
 0x2ee   : > { %v7048_v26 = vmul.f32 %v5987_v29, %v5987_v29  ;;  %v13249_v15 = vpop.f32.mrb[62].mxu0 }
 0x2ef   : > { %v5991_v0 = vpop.f32.mrb[63].mxu0 }
 0x2f0   : > { %v13253_v22 = vadd.f32 %v7048_v26, %v6968_v6  ;;  %v7053_v56 = vmul.f32 %v5991_v0, %v5991_v0 }
 0x2f1   : > { %6838 = vmatmul.mubr.bf16.gmra.mrb[72].mxu0 %v11338_v38 }
 0x2f2   : > { %v13256_v63 = vadd.f32 %v7053_v56, %v6973_v51  ;;  %6847 = vmatprep.mubr.bf16.mxu0 %v13931_v54 }
 0x2f4   : > { %v7173_v1 = vpack.c.bf16 %v13256_v63, %v13253_v22  ;;  %v10065_v22 = vld [vmem:[%s13670_s2 + $0x54] ss:$20 sps:$4 sm:$0xff]   ;;  %v10067_v63 = vld [vmem:[%s13670_s2 + $0x50] ss:$20 sps:$4 sm:$0xff]  }
 0x2f9   : > { %6848 = vmatmul.mubr.bf16.gmra.mrb[76].mxu0 %v11380_v50  ;;  %v6899_v50 = vmul.f32 %v13983_v8, %v13983_v8 }
 0x2fa   : > { %6857 = vmatprep.mubr.bf16.mxu0 %v13933_v32 }
 0x301   : > { %6858 = vmatmul.mubr.bf16.gmra.mrb[80].mxu0 %v11422_v11  ;;  %v6900_v11 = vmul.f32 %v12704_v43, %v12704_v43  ;;  %v10061_v43 = vld [vmem:[%s13670_s2 + $0x4] ss:$20 sps:$4 sm:$0xff]  }
 0x302   : > { %6867 = vmatprep.mubr.bf16.mxu0 %v13936_v44  ;;  %7370 = vmatprep.mubr.bf16.mxu1 %v10061_v43 }
 0x309   : > { %6868 = vmatmul.mubr.bf16.gmra.mrb[84].mxu0 %v11465_v60  ;;  %v13984_v60 = vld [vmem:[#allocation54_spill] sm:$0xff] }
 0x30a   : > { %6877 = vmatprep.mubr.bf16.mxu0 %v11486_v7  ;;  %v6904_v7 = vmul.f32 %v13984_v60, %v13984_v60  ;;  %v13986_v60 = vpack.c.bf16 %v13093_v18, %v13090_v5 }
 0x311   : > { %6878 = vmatmul.mubr.bf16.gmra.mrb[88].mxu0 %v11506_v62 }
 0x312   : > { %6887 = vmatprep.mubr.bf16.mxu0 %v11525_v16  ;;  %v6905_v16 = vmul.f32 %v12710_v20, %v12710_v20 }
 0x319   : > { %6888 = vmatmul.mubr.bf16.gmra.mrb[92].mxu0 %v11542_v39 }
 0x334   : > { %v6367_v38 = vpop.f32.mrb[64].mxu1 }
 0x335   : > { %v6979_v54 = vmul.f32 %v6367_v38, %v6367_v38  ;;  %v6369_v32 = vpop.f32.mrb[65].mxu1 }
 0x336   : > { %v6980_v44 = vmul.f32 %v6369_v32, %v6369_v32  ;;  %v6371_v6 = vpop.f32.mrb[66].mxu1 }
 0x337   : > { %v7059_v26 = vadd.f32 %v6979_v54, %v6899_v50  ;;  %v6984_v62 = vmul.f32 %v6371_v6, %v6371_v6  ;;  %v6373_v29 = vpop.f32.mrb[67].mxu1  ;;  %v13985_v50 = vld [vmem:[#allocation56_spill] sm:$0xff] }
 0x338   : > { %v13278_v39 = vadd.f32 %v6980_v44, %v6900_v11  ;;  %v6985_v0 = vmul.f32 %v6373_v29, %v6373_v29  ;;  %v6909_v54 = vmul.f32 %v13985_v50, %v13985_v50  ;;  %v6910_v11 = vmul.f32 %v12740_v14, %v12740_v14 }
 0x339   : > { %v7064_v47 = vadd.f32 %v6984_v62, %v6904_v7  ;;  %v10140_v7 = vmov 0.0  }
 0x33a   : > { %v13280_v51 = vadd.f32 %v6985_v0, %v6905_v16  ;;  %8501 = vmatprep.subr.bf16.mxu0 %v10140_v7  ;;  %8517 = vmatprep.mubr.msk.bf16.mxu0 %vm10141_vm3, %v10140_v7 }
 0x33b   : > { %v7139_v56 = vpack.c.bf16 %v7064_v47, %v7059_v26  ;;  %v13987_v26 = vld [vmem:[#allocation58_spill] sm:$0xff]  ;;  %v6915_v47 = vmul.f32 %v12746_v49, %v12746_v49  ;;  %v6920_v49 = vmul.f32 %v12776_v2, %v12776_v2 }
 0x33c   : > { %v7140_v38 = vpack.c.bf16 %v13280_v51, %v13278_v39  ;;  %v6377_v8 = vpop.f32.mrb[68].mxu1  ;;  %v6914_v62 = vmul.f32 %v13987_v26, %v13987_v26  ;;  %v13990_v26 = vld [vmem:[#allocation44_spill] sm:$0xff] }
 0x33d   : > { %v6989_v32 = vmul.f32 %v6377_v8, %v6377_v8  ;;  %v6379_v20 = vpop.f32.mrb[69].mxu1  ;;  %7338 = vmatprep.subr.bf16.mxu1 %v7139_v56 }
 0x33e   : > { %v6990_v44 = vmul.f32 %v6379_v20, %v6379_v20  ;;  %v6381_v6 = vpop.f32.mrb[70].mxu1  ;;  %7339 = vmatpush1.bf16.xpose.msra.mxu1 %v13986_v60  ;;  %v13988_v20 = vld [vmem:[#allocation31_spill] sm:$0xff] }
 0x33f   : > { %v7069_v29 = vadd.f32 %v6989_v32, %v6909_v54  ;;  %v6994_v16 = vmul.f32 %v6381_v6, %v6381_v6  ;;  %v6383_v0 = vpop.f32.mrb[71].mxu1  ;;  %v6919_v60 = vmul.f32 %v13988_v20, %v13988_v20  ;;  %v13989_v6 = vpack.c.bf16 %v13121_v34, %v13118_v55  ;;  %v13991_v20 = vld [vmem:[#allocation32_spill] sm:$0xff] }
 0x340   : > { %v13299_v56 = vadd.f32 %v6990_v44, %v6910_v11  ;;  %v6995_v14 = vmul.f32 %v6383_v0, %v6383_v0 }
 0x341   : > { %v7074_v43 = vadd.f32 %v6994_v16, %v6914_v62  ;;  %v6924_v62 = vmul.f32 %v13990_v26, %v13990_v26 }
 0x342   : > { %v13301_v8 = vadd.f32 %v6995_v14, %v6915_v47  ;;  %v6925_v47 = vmul.f32 %v12782_v9, %v12782_v9  ;;  %v6930_v9 = vmul.f32 %v12812_v3, %v12812_v3 }
 0x343   : > { %v7144_v5 = vpack.c.bf16 %v7074_v43, %v7069_v29 }
 0x344   : > { %v7145_v18 = vpack.c.bf16 %v13301_v8, %v13299_v56  ;;  %v6387_v50 = vpop.f32.mrb[72].mxu1 }
 0x345   : > { %v6999_v54 = vmul.f32 %v6387_v50, %v6387_v50  ;;  %v6389_v32 = vpop.f32.mrb[73].mxu1  ;;  %7340 = vmatprep.subr.bf16.mxu1 %v7144_v5 }
 0x346   : > { %v7000_v11 = vmul.f32 %v6389_v32, %v6389_v32  ;;  %v6391_v44 = vpop.f32.mrb[74].mxu1  ;;  %7341 = vmatpush1.bf16.xpose.msra.mxu1 %v13989_v6  ;;  %v6929_v32 = vmul.f32 %v13991_v20, %v13991_v20  ;;  %v13993_v6 = vld [vmem:[#allocation33_spill] sm:$0xff] }
 0x347   : > { %v7079_v29 = vadd.f32 %v6999_v54, %v6919_v60  ;;  %v7004_v16 = vmul.f32 %v6391_v44, %v6391_v44  ;;  %v6393_v0 = vpop.f32.mrb[75].mxu1  ;;  %v13992_v44 = vpack.c.bf16 %v13149_v27, %v13146_v61  ;;  %v6934_v26 = vmul.f32 %v13993_v6, %v13993_v6 }
 0x348   : > { %v13316_v14 = vadd.f32 %v7000_v11, %v6920_v49  ;;  %v7005_v43 = vmul.f32 %v6393_v0, %v6393_v0  ;;  %v6935_v0 = vmul.f32 %v12818_v36, %v12818_v36  ;;  %v6940_v36 = vmul.f32 %v12848_v12, %v12848_v12 }
 0x349   : > { %v7084_v5 = vadd.f32 %v7004_v16, %v6924_v62 }
 0x34a   : > { %v13318_v2 = vadd.f32 %v7005_v43, %v6925_v47 }
 0x34b   : > { %v7149_v50 = vpack.c.bf16 %v7084_v5, %v7079_v29 }
 0x34c   : > { %v7150_v55 = vpack.c.bf16 %v13318_v2, %v13316_v14  ;;  %v6397_v34 = vpop.f32.mrb[76].mxu1  ;;  %v6937_v14 = vmul.f32 %v13164_v40, %v13164_v40  ;;  %v14016_v40 = vld [vmem:[#allocation22_spill] sm:$0xff] }
 0x34d   : > { %v7009_v60 = vmul.f32 %v6397_v34, %v6397_v34  ;;  %v6399_v54 = vpop.f32.mrb[77].mxu1  ;;  %7342 = vmatprep.subr.bf16.mxu1 %v7149_v50  ;;  %v13994_v34 = vld [vmem:[#allocation46_spill] sm:$0xff] }
 0x34e   : > { %v7010_v49 = vmul.f32 %v6399_v54, %v6399_v54  ;;  %v6401_v11 = vpop.f32.mrb[78].mxu1  ;;  %7343 = vmatpush1.bf16.xpose.msra.mxu1 %v13992_v44  ;;  %v6939_v20 = vmul.f32 %v13994_v34, %v13994_v34 }
 0x34f   : > { %v7089_v62 = vadd.f32 %v7009_v60, %v6929_v32  ;;  %v7014_v29 = vmul.f32 %v6401_v11, %v6401_v11  ;;  %v6403_v16 = vpop.f32.mrb[79].mxu1  ;;  %v13996_v11 = vld [vmem:[#allocation34_spill] sm:$0xff] }
 0x350   : > { %v13333_v47 = vadd.f32 %v7010_v49, %v6930_v9  ;;  %v7015_v43 = vmul.f32 %v6403_v16, %v6403_v16  ;;  %v13995_v49 = vpack.c.bf16 %v13177_v10, %v13174_v31  ;;  %v6944_v44 = vmul.f32 %v13996_v11, %v13996_v11 }
 0x351   : > { %v7094_v5 = vadd.f32 %v7014_v29, %v6934_v26  ;;  %v6945_v29 = vmul.f32 %v12854_v25, %v12854_v25  ;;  %v6950_v25 = vmul.f32 %v12881_v46, %v12881_v46 }
 0x352   : > { %v13335_v3 = vadd.f32 %v7015_v43, %v6935_v0 }
 0x353   : > { %v7154_v50 = vpack.c.bf16 %v7094_v5, %v7089_v62 }
 0x354   : > { %v7155_v61 = vpack.c.bf16 %v13335_v3, %v13333_v47  ;;  %v6407_v27 = vpop.f32.mrb[80].mxu1 }
 0x355   : > { %v7019_v32 = vmul.f32 %v6407_v27, %v6407_v27  ;;  %v6409_v60 = vpop.f32.mrb[81].mxu1  ;;  %7344 = vmatprep.subr.bf16.mxu1 %v7154_v50  ;;  %v13997_v50 = vld [vmem:[#allocation35_spill] sm:$0xff] }
 0x356   : > { %v7020_v54 = vmul.f32 %v6409_v60, %v6409_v60  ;;  %v6411_v9 = vpop.f32.mrb[82].mxu1  ;;  %7345 = vmatpush1.bf16.xpose.msra.mxu1 %v13995_v49  ;;  %v6949_v27 = vmul.f32 %v13997_v50, %v13997_v50 }
 0x357   : > { %v7099_v6 = vadd.f32 %v7019_v32, %v6939_v20  ;;  %v7024_v26 = vmul.f32 %v6411_v9, %v6411_v9  ;;  %v6413_v62 = vpop.f32.mrb[83].mxu1 }
 0x358   : > { %v13350_v16 = vadd.f32 %v7020_v54, %v6940_v36  ;;  %v7025_v0 = vmul.f32 %v6413_v62, %v6413_v62  ;;  %v13998_v36 = vpack.c.bf16 %v13205_v57, %v13202_v53  ;;  %v13999_v54 = vld [vmem:[#allocation48_spill] sm:$0xff] }
 0x359   : > { %v7104_v43 = vadd.f32 %v7024_v26, %v6944_v44  ;;  %v6954_v9 = vmul.f32 %v13999_v54, %v13999_v54 }
 0x35a   : > { %v13352_v12 = vadd.f32 %v7025_v0, %v6945_v29 }
 0x35b   : > { %v7159_v5 = vpack.c.bf16 %v7104_v43, %v7099_v6  ;;  %v14000_v6 = vld [vmem:[#allocation26_spill] sm:$0xff] }
 0x35c   : > { %v7160_v31 = vpack.c.bf16 %v13352_v12, %v13350_v16  ;;  %v6417_v10 = vpop.f32.mrb[84].mxu1  ;;  %v6955_v26 = vmul.f32 %v14000_v6, %v14000_v6 }
 0x35d   : > { %v7029_v34 = vmul.f32 %v6417_v10, %v6417_v10  ;;  %v6419_v20 = vpop.f32.mrb[85].mxu1  ;;  %7346 = vmatprep.subr.bf16.mxu1 %v7159_v5  ;;  %v14001_v5 = vld [vmem:[#allocation27_spill] sm:$0xff] }
 0x35e   : > { %v7030_v32 = vmul.f32 %v6419_v20, %v6419_v20  ;;  %v6421_v60 = vpop.f32.mrb[86].mxu1  ;;  %7347 = vmatpush1.bf16.xpose.msra.mxu1 %v13998_v36  ;;  %v6959_v10 = vmul.f32 %v14001_v5, %v14001_v5  ;;  %v14004_v36 = vld [vmem:[#allocation49_spill] sm:$0xff]  ;;  %v14006_v5 = vld [vmem:[#allocation50_spill] sm:$0xff] }
 0x35f   : > { %v7109_v49 = vadd.f32 %v7029_v34, %v6949_v27  ;;  %v7034_v11 = vmul.f32 %v6421_v60, %v6421_v60  ;;  %v6423_v44 = vpop.f32.mrb[87].mxu1  ;;  %v14002_v34 = vld [vmem:[#allocation9_spill] sm:$0xff]  ;;  %v14003_v60 = vpack.c.bf16 %v13224_v24, %v13221_v17  ;;  %v6964_v54 = vmul.f32 %v14004_v36, %v14004_v36 }
 0x360   : > { %v13367_v62 = vadd.f32 %v7030_v32, %v6950_v25  ;;  %v7035_v29 = vmul.f32 %v6423_v44, %v6423_v44  ;;  %v6960_v20 = vmul.f32 %v14002_v34, %v14002_v34  ;;  %v14005_v44 = vld [vmem:[#allocation10_spill] sm:$0xff]  ;;  %v6970_v34 = vmul.f32 %v12931_v45, %v12931_v45 }
 0x361   : > { %v7114_v0 = vadd.f32 %v7034_v11, %v6954_v9  ;;  %v6965_v6 = vmul.f32 %v14005_v44, %v14005_v44 }
 0x362   : > { %v13369_v46 = vadd.f32 %v7035_v29, %v6955_v26 }
 0x363   : > { %v7164_v43 = vpack.c.bf16 %v7114_v0, %v7109_v49 }
 0x364   : > { %v7165_v53 = vpack.c.bf16 %v13369_v46, %v13367_v62  ;;  %v6427_v57 = vpop.f32.mrb[88].mxu1 }
 0x365   : > { %v7039_v50 = vmul.f32 %v6427_v57, %v6427_v57  ;;  %v6429_v27 = vpop.f32.mrb[89].mxu1  ;;  %7348 = vmatprep.subr.bf16.mxu1 %v7164_v43 }
 0x366   : > { %v7040_v25 = vmul.f32 %v6429_v27, %v6429_v27  ;;  %v6431_v32 = vpop.f32.mrb[90].mxu1  ;;  %7349 = vmatpush1.bf16.xpose.msra.mxu1 %v14003_v60  ;;  %v6969_v27 = vmul.f32 %v14006_v5, %v14006_v5  ;;  %v10076_v5 = vld [vmem:[%s13670_s2 + $0xc] ss:$20 sps:$4 sm:$0xff]  }
 0x367   : > { %v7119_v9 = vadd.f32 %v7039_v50, %v6959_v10  ;;  %v7044_v49 = vmul.f32 %v6431_v32, %v6431_v32  ;;  %v6433_v11 = vpop.f32.mrb[91].mxu1  ;;  %v14007_v32 = vld [vmem:[#allocation11_spill] sm:$0xff] }
 0x368   : > { %v13384_v26 = vadd.f32 %v7040_v25, %v6960_v20  ;;  %v7045_v29 = vmul.f32 %v6433_v11, %v6433_v11  ;;  %v6974_v60 = vmul.f32 %v14007_v32, %v14007_v32 }
 0x369   : > { %v7124_v0 = vadd.f32 %v7044_v49, %v6964_v54  ;;  %v6975_v49 = vmul.f32 %v12935_v4, %v12935_v4  ;;  %v10059_v4 = vld [vmem:[%s13670_s2] ss:$20 sps:$4 sm:$0xff]  }
 0x36a   : > { %v13386_v43 = vadd.f32 %v7045_v29, %v6965_v6 }
 0x36b   : > { %v7169_v57 = vpack.c.bf16 %v7124_v0, %v7119_v9  ;;  %v10070_v0 = vld [vmem:[%s13670_s2 + $0x78] ss:$20 sps:$4 sm:$0xff]  }
 0x36c   : > { %v7170_v17 = vpack.c.bf16 %v13386_v43, %v13384_v26  ;;  %v6437_v24 = vpop.f32.mrb[92].mxu1  ;;  %v10074_v26 = vld [vmem:[%s13670_s2 + $0x8] ss:$20 sps:$4 sm:$0xff]  }
 0x36d   : > { %v7049_v10 = vmul.f32 %v6437_v24, %v6437_v24  ;;  %v6439_v50 = vpop.f32.mrb[93].mxu1  ;;  %7350 = vmatprep.subr.bf16.mxu1 %v7169_v57  ;;  %v10071_v57 = vld [vmem:[%s13670_s2 + $0xa4] ss:$20 sps:$4 sm:$0xff]   ;;  %v10073_v24 = vld [vmem:[%s13670_s2 + $0xa0] ss:$20 sps:$4 sm:$0xff]  }
 0x36e   : > { %v7050_v20 = vmul.f32 %v6439_v50, %v6439_v50  ;;  %v6441_v25 = vpop.f32.mrb[94].mxu1  ;;  %7351 = vmatpush1.bf16.xpose.msra.mxu1 %v7168_v37  ;;  %v10064_v37 = vld [vmem:[%s13670_s2 + $0x28] ss:$20 sps:$4 sm:$0xff]  }
 0x36f   : > { %v7129_v36 = vadd.f32 %v7049_v10, %v6969_v27  ;;  %v7054_v54 = vmul.f32 %v6441_v25, %v6441_v25  ;;  %v6443_v9 = vpop.f32.mrb[95].mxu1  ;;  %v14008_v10 = vld [vmem:[#allocation51_spill] sm:$0xff]  ;;  %v6902_v25 = vmul.f32 %v13076_v13, %v13076_v13  ;;  %v10078_v43 = vld [vmem:[%s13670_s2 + $0x34] ss:$20 sps:$4 sm:$0xff]  }
 0x370   : > { %v13401_v11 = vadd.f32 %v7050_v20, %v6970_v34  ;;  %v7055_v44 = vmul.f32 %v6443_v9, %v6443_v9  ;;  %v6901_v50 = vmul.f32 %v14008_v10, %v14008_v10  ;;  %v14010_v13 = vld [vmem:[#allocation39_spill] sm:$0xff] }
 0x371   : > { %v7134_v6 = vadd.f32 %v7054_v54, %v6974_v60 }
 0x372   : > { %v13403_v45 = vadd.f32 %v7055_v44, %v6975_v49 }
 0x373   : > { %v7174_v29 = vpack.c.bf16 %v7134_v6, %v7129_v36  ;;  %v14009_v36 = vld [vmem:[#allocation52_spill] sm:$0xff]  ;;  %v6907_v6 = vmul.f32 %v13080_v52, %v13080_v52  ;;  %v14011_v52 = vld [vmem:[#allocation13_spill] sm:$0xff] }
 0x374   : > { %v7175_v42 = vpack.c.bf16 %v13403_v45, %v13401_v11  ;;  %v6906_v54 = vmul.f32 %v14009_v36, %v14009_v36  ;;  %v10081_v11 = vld [vmem:[%s13670_s2 + $0x38] ss:$20 sps:$4 sm:$0xff]   ;;  %v10082_v45 = vld [vmem:[%s13670_s2 + $0x5c] ss:$20 sps:$4 sm:$0xff]  }
 0x375   : > { %7352 = vmatprep.subr.bf16.mxu1 %v7174_v29 }
 0x376   : > { %7353 = vmatpush1.bf16.xpose.msra.mxu1 %v7173_v1  ;;  %v10068_v1 = vld [vmem:[%s13670_s2 + $0x7c] ss:$20 sps:$4 sm:$0xff]  }
 0x37d   : > { %7371 = vmatmul.mubr.bf16.vlgmr.msra.gmra.mrb[96].mxu1 %v10059_v4 }
 0x37e   : > { %7378 = vmatprep.mubr.bf16.mxu1 %v10062_v41 }
 0x385   : > { %7379 = vmatmul.mubr.bf16.gmra.mrb[100].mxu1 %v10064_v37 }
 0x386   : > { %7386 = vmatprep.mubr.bf16.mxu1 %v10065_v22 }
 0x38d   : > { %7387 = vmatmul.mubr.bf16.gmra.mrb[104].mxu1 %v10067_v63 }
 0x38e   : > { %7394 = vmatprep.mubr.bf16.mxu1 %v10068_v1 }
 0x395   : > { %7395 = vmatmul.mubr.bf16.gmra.mrb[108].mxu1 %v10070_v0  ;;  %v6911_v0 = vmul.f32 %v14010_v13, %v14010_v13 }
 0x396   : > { %7402 = vmatprep.mubr.bf16.mxu1 %v10071_v57 }
 0x39d   : > { %7403 = vmatmul.mubr.bf16.gmra.mrb[112].mxu1 %v10073_v24 }
 0x39e   : > { %7443 = vmatprep.mubr.bf16.mxu1 %v10076_v5  ;;  %v6912_v5 = vmul.f32 %v13104_v58, %v13104_v58 }
 0x3b4   : > { %v6819_v27 = vpop.f32.mrb[64].mxu0 }
 0x3b5   : > { %v6981_v34 = vmul.f32 %v6819_v27, %v6819_v27  ;;  %v6821_v20 = vpop.f32.mrb[65].mxu0 }
 0x3b6   : > { %v6982_v32 = vmul.f32 %v6821_v20, %v6821_v20  ;;  %v6823_v60 = vpop.f32.mrb[66].mxu0 }
 0x3b7   : > { %v7061_v9 = vadd.f32 %v6981_v34, %v6901_v50  ;;  %v6986_v49 = vmul.f32 %v6823_v60, %v6823_v60  ;;  %v6825_v44 = vpop.f32.mrb[67].mxu0  ;;  %v6916_v50 = vmul.f32 %v14011_v52, %v14011_v52 }
 0x3b8   : > { %v7062_v29 = vadd.f32 %v6982_v32, %v6902_v25  ;;  %v6987_v4 = vmul.f32 %v6825_v44, %v6825_v44  ;;  %v6917_v32 = vmul.f32 %v13108_v21, %v13108_v21  ;;  %v14013_v21 = vld [vmem:[#allocation41_spill] sm:$0xff] }
 0x3b9   : > { %v7066_v41 = vadd.f32 %v6986_v49, %v6906_v54 }
 0x3ba   : > { %v7067_v37 = vadd.f32 %v6987_v4, %v6907_v6 }
 0x3bb   : > { %v7141_v22 = vpack.c.bf16 %v7066_v41, %v7061_v9 }
 0x3bc   : > { %v13450_v63 = vpack.c.bf16 %v7067_v37, %v7062_v29  ;;  %v6829_v1 = vpop.f32.mrb[68].mxu0  ;;  %v6922_v29 = vmul.f32 %v13132_v28, %v13132_v28  ;;  %v6926_v37 = vmul.f32 %v14013_v21, %v14013_v21 }
 0x3bd   : > { %v6991_v57 = vmul.f32 %v6829_v1, %v6829_v1  ;;  %v6831_v24 = vpop.f32.mrb[69].mxu0  ;;  %7411 = vmatprep.subr.bf16.mxu1 %v7141_v22 }
 0x3be   : > { %v6992_v27 = vmul.f32 %v6831_v24, %v6831_v24  ;;  %v6833_v10 = vpop.f32.mrb[70].mxu0  ;;  %7412 = vmatpush1.bf16.xpose.msra.mxu1 %v7140_v38  ;;  %8502 = vmatpush3.bf16.xpose.msra.mxu0 %v13450_v63  ;;  %v14012_v38 = vld [vmem:[#allocation53_spill] sm:$0xff] }
 0x3bf   : > { %v7071_v34 = vadd.f32 %v6991_v57, %v6911_v0  ;;  %v6996_v20 = vmul.f32 %v6833_v10, %v6833_v10  ;;  %v6835_v25 = vpop.f32.mrb[71].mxu0  ;;  %8503 = vmatprep.subr.bf16.mxu0 %v10140_v7  ;;  %v6921_v49 = vmul.f32 %v14012_v38, %v14012_v38  ;;  %v6927_v0 = vmul.f32 %v13136_v23, %v13136_v23  ;;  %v7588_v38 = vld [vmem:[%s13671_s3 + $0x8] sm:$0xff] }
 0x3c0   : > { %v7072_v58 = vadd.f32 %v6992_v27, %v6912_v5  ;;  %v6997_v60 = vmul.f32 %v6835_v25, %v6835_v25  ;;  %v6932_v23 = vmul.f32 %v13160_v19, %v13160_v19  ;;  %v10142_v19 = vmov 0  }
 0x3c1   : > { %v7076_v36 = vadd.f32 %v6996_v20, %v6916_v50  ;;  %9097 = vset.pattern.permute.xlu0 %v10142_v19  ;;  %9098 = vset.pattern.permute.xlu1 %v10142_v19  ;;  %v14019_v19 = vld [vmem:[#allocation29_spill] sm:$0xff] }
 0x3c2   : > { %v7077_v54 = vadd.f32 %v6997_v60, %v6917_v32  ;;  %v7589_v32 = vld [vmem:[%s13671_s3 + $0x10] sm:$0xff] }
 0x3c3   : > { %v7146_v9 = vpack.c.bf16 %v7076_v36, %v7071_v34  ;;  %v7587_v34 = vld [vmem:[%s13671_s3] sm:$0xff]  ;;  %7609 = vperm.xlu1 %9098, %v7589_v32  }
 0x3c4   : > { %v13465_v39 = vpack.c.bf16 %v7077_v54, %v7072_v58  ;;  %v6839_v51 = vpop.f32.mrb[72].mxu0  ;;  %v14015_v58 = vld [vmem:[#allocation42_spill] sm:$0xff]  ;;  %7599 = vperm.xlu0 %9097, %v7587_v34  }
 0x3c5   : > { %v7001_v44 = vmul.f32 %v6839_v51, %v6839_v51  ;;  %v6841_v6 = vpop.f32.mrb[73].mxu0  ;;  %7413 = vmatprep.subr.bf16.mxu1 %v7146_v9  ;;  %v6936_v60 = vmul.f32 %v14015_v58, %v14015_v58  ;;  %v7595_v58 = vld [vmem:[%s13671_s3 + $0x40] sm:$0xff] }
 0x3c6   : > { %v7002_v4 = vmul.f32 %v6841_v6, %v6841_v6  ;;  %v6843_v41 = vpop.f32.mrb[74].mxu0  ;;  %7414 = vmatpush1.bf16.xpose.msra.mxu1 %v7145_v18  ;;  %8504 = vmatpush3.bf16.xpose.msra.mxu0 %v13465_v39  ;;  %v14014_v18 = vld [vmem:[#allocation18_spill] sm:$0xff] }
 0x3c7   : > { %v7081_v22 = vadd.f32 %v7001_v44, %v6921_v49  ;;  %v7006_v1 = vmul.f32 %v6843_v41, %v6843_v41  ;;  %v6845_v13 = vpop.f32.mrb[75].mxu0  ;;  %8505 = vmatprep.subr.bf16.mxu0 %v10140_v7  ;;  %v6931_v10 = vmul.f32 %v14014_v18, %v14014_v18  ;;  %v7590_v44 = vld [vmem:[%s13671_s3 + $0x18] sm:$0xff]  ;;  %v6941_v41 = vmul.f32 %v14016_v40, %v14016_v40 }
 0x3c8   : > { %v7082_v28 = vadd.f32 %v7002_v4, %v6922_v29  ;;  %v7007_v57 = vmul.f32 %v6845_v13, %v6845_v13  ;;  %7604 = vperm.xlu0 %9097, %v7588_v38   ;;  %7614 = vperm.xlu1 %9098, %v7590_v44   ;;  %v14021_v40 = vld [vmem:[#allocation30_spill] sm:$0xff] }
 0x3c9   : > { %v7086_v24 = vadd.f32 %v7006_v1, %v6926_v37  ;;  %v6942_v1 = vmul.f32 %v13188_v59, %v13188_v59  ;;  %v6947_v59 = vmul.f32 %v13192_v48, %v13192_v48  ;;  %v14018_v48 = vld [vmem:[#allocation43_spill] sm:$0xff] }
 0x3ca   : > { %v7087_v5 = vadd.f32 %v7007_v57, %v6927_v0  ;;  %v14017_v57 = vld [vmem:[#allocation25_spill] sm:$0xff] }
 0x3cb   : > { %v7151_v27 = vpack.c.bf16 %v7086_v24, %v7081_v22  ;;  %v7591_v22 = vld [vmem:[%s13671_s3 + $0x20] sm:$0xff]  ;;  %v6946_v24 = vmul.f32 %v14017_v57, %v14017_v57 }
 0x3cc   : > { %v13480_v56 = vpack.c.bf16 %v7087_v5, %v7082_v28  ;;  %v6849_v8 = vpop.f32.mrb[76].mxu0  ;;  %v7592_v28 = vld [vmem:[%s13671_s3 + $0x28] sm:$0xff]  ;;  %7619 = vperm.xlu0 %9097, %v7591_v22   ;;  %v6962_v22 = vmul.f32 %v13229_v35, %v13229_v35 }
 0x3cd   : > { %v7011_v52 = vmul.f32 %v6849_v8, %v6849_v8  ;;  %v6851_v50 = vpop.f32.mrb[77].mxu0  ;;  %7415 = vmatprep.subr.bf16.mxu1 %v7151_v27  ;;  %7624 = vperm.xlu1 %9098, %v7592_v28  }
 0x3ce   : > { %v7012_v20 = vmul.f32 %v6851_v50, %v6851_v50  ;;  %v6853_v25 = vpop.f32.mrb[78].mxu0  ;;  %7416 = vmatpush1.bf16.xpose.msra.mxu1 %v7150_v55  ;;  %8506 = vmatpush3.bf16.xpose.msra.mxu0 %v13480_v56 }
 0x3cf   : > { %v7091_v36 = vadd.f32 %v7011_v52, %v6931_v10  ;;  %v7016_v54 = vmul.f32 %v6853_v25, %v6853_v25  ;;  %v6855_v9 = vpop.f32.mrb[79].mxu0  ;;  %8507 = vmatprep.subr.bf16.mxu0 %v10140_v7  ;;  %v7594_v52 = vld [vmem:[%s13671_s3 + $0x38] sm:$0xff] }
 0x3d0   : > { %v7092_v2 = vadd.f32 %v7012_v20, %v6932_v23  ;;  %v7017_v55 = vmul.f32 %v6855_v9, %v6855_v9  ;;  %v6951_v20 = vmul.f32 %v14018_v48, %v14018_v48  ;;  %v7596_v9 = vld [vmem:[%s13671_s3 + $0x48] sm:$0xff] }
 0x3d1   : > { %v7096_v51 = vadd.f32 %v7016_v54, %v6936_v60  ;;  %7634 = vperm.xlu1 %9098, %v7594_v52   ;;  %v6952_v60 = vmul.f32 %v13213_v33, %v13213_v33  ;;  %v14020_v33 = vld [vmem:[#allocation40_spill] sm:$0xff] }
 0x3d2   : > { %v7097_v49 = vadd.f32 %v7017_v55, %v6937_v14  ;;  %v6956_v14 = vmul.f32 %v14019_v19, %v14019_v19  ;;  %v6957_v38 = vmul.f32 %v14020_v33, %v14020_v33 }
 0x3d3   : > { %v7156_v6 = vpack.c.bf16 %v7096_v51, %v7091_v36 }
 0x3d4   : > { %v13507_v29 = vpack.c.bf16 %v7097_v49, %v7092_v2  ;;  %v6859_v4 = vpop.f32.mrb[80].mxu0 }
 0x3d5   : > { %v7021_v21 = vmul.f32 %v6859_v4, %v6859_v4  ;;  %v6861_v37 = vpop.f32.mrb[81].mxu0  ;;  %7417 = vmatprep.subr.bf16.mxu1 %v7156_v6  ;;  %7644 = vperm.xlu1 %9098, %v7596_v9  }
 0x3d6   : > { %v7022_v13 = vmul.f32 %v6861_v37, %v6861_v37  ;;  %v6863_v0 = vpop.f32.mrb[82].mxu0  ;;  %7418 = vmatpush1.bf16.xpose.msra.mxu1 %v7155_v61  ;;  %8508 = vmatpush3.bf16.xpose.msra.mxu0 %v13507_v29  ;;  %v7593_v61 = vld [vmem:[%s13671_s3 + $0x30] sm:$0xff] }
 0x3d7   : > { %v7101_v5 = vadd.f32 %v7021_v21, %v6941_v41  ;;  %v7026_v27 = vmul.f32 %v6863_v0, %v6863_v0  ;;  %v6865_v8 = vpop.f32.mrb[83].mxu0  ;;  %8509 = vmatprep.subr.bf16.mxu0 %v10140_v7  ;;  %7629 = vperm.xlu0 %9097, %v7593_v61   ;;  %v6961_v41 = vmul.f32 %v14021_v40, %v14021_v40  ;;  %v14022_v0 = vld [vmem:[#allocation7_spill] sm:$0xff] }
 0x3d8   : > { %v7102_v18 = vadd.f32 %v7022_v13, %v6942_v1  ;;  %v7027_v47 = vmul.f32 %v6865_v8, %v6865_v8  ;;  %v6966_v28 = vmul.f32 %v14022_v0, %v14022_v0 }
 0x3d9   : > { %v7106_v3 = vadd.f32 %v7026_v27, %v6946_v24  ;;  %v14023_v27 = vld [vmem:[#allocation14_spill] sm:$0xff] }
 0x3da   : > { %v7107_v10 = vadd.f32 %v7027_v47, %v6947_v59  ;;  %v6967_v8 = vmul.f32 %v14023_v27, %v14023_v27 }
 0x3db   : > { %v7161_v50 = vpack.c.bf16 %v7106_v3, %v7101_v5  ;;  %7639 = vperm.xlu0 %9097, %v7595_v58  }
 0x3dc   : > { %v13534_v34 = vpack.c.bf16 %v7107_v10, %v7102_v18  ;;  %v6869_v23 = vpop.f32.mrb[84].mxu0 }
 0x3dd   : > { %v7031_v25 = vmul.f32 %v6869_v23, %v6869_v23  ;;  %v6871_v32 = vpop.f32.mrb[85].mxu0  ;;  %7419 = vmatprep.subr.bf16.mxu1 %v7161_v50  ;;  %v6972_v50 = vmul.f32 %v13245_v30, %v13245_v30 }
 0x3de   : > { %v7032_v36 = vmul.f32 %v6871_v32, %v6871_v32  ;;  %v6873_v54 = vpop.f32.mrb[86].mxu0  ;;  %7420 = vmatpush1.bf16.xpose.msra.mxu1 %v7160_v31  ;;  %8510 = vmatpush3.bf16.xpose.msra.mxu0 %v13534_v34 }
 0x3df   : > { %v7111_v2 = vadd.f32 %v7031_v25, %v6951_v20  ;;  %v7036_v55 = vmul.f32 %v6873_v54, %v6873_v54  ;;  %v6875_v51 = vpop.f32.mrb[87].mxu0  ;;  %8511 = vmatprep.subr.bf16.mxu0 %v10140_v7  ;;  %v14025_v20 = vld [vmem:[#allocation8_spill] sm:$0xff] }
 0x3e0   : > { %v7112_v49 = vadd.f32 %v7032_v36, %v6952_v60  ;;  %v7037_v16 = vmul.f32 %v6875_v51, %v6875_v51  ;;  %v6976_v25 = vmul.f32 %v14025_v20, %v14025_v20  ;;  %v6977_v36 = vmul.f32 %v13249_v15, %v13249_v15  ;;  %v10077_v15 = vld [vmem:[%s13670_s2 + $0x10] ss:$20 sps:$4 sm:$0xff]  }
 0x3e1   : > { %v7116_v12 = vadd.f32 %v7036_v55, %v6956_v14  ;;  %v10088_v55 = vld [vmem:[%s13670_s2 + $0xac] ss:$20 sps:$4 sm:$0xff]   ;;  %v10093_v51 = vld [vmem:[%s13670_s2 + $0xb0] ss:$20 sps:$4 sm:$0xff]  }
 0x3e2   : > { %v7117_v31 = vadd.f32 %v7037_v16, %v6957_v38 }
 0x3e3   : > { %v7166_v44 = vpack.c.bf16 %v7116_v12, %v7111_v2 }
 0x3e4   : > { %v13555_v6 = vpack.c.bf16 %v7117_v31, %v7112_v49  ;;  %v6879_v4 = vpop.f32.mrb[88].mxu0 }
 0x3e5   : > { %v7041_v21 = vmul.f32 %v6879_v4, %v6879_v4  ;;  %v6881_v37 = vpop.f32.mrb[89].mxu0  ;;  %7421 = vmatprep.subr.bf16.mxu1 %v7166_v44 }
 0x3e6   : > { %v7042_v1 = vmul.f32 %v6881_v37, %v6881_v37  ;;  %v6883_v13 = vpop.f32.mrb[90].mxu0  ;;  %7422 = vmatpush1.bf16.xpose.msra.mxu1 %v7165_v53  ;;  %8512 = vmatpush3.bf16.xpose.msra.mxu0 %v13555_v6  ;;  %v14024_v53 = vld [vmem:[#allocation38_spill] sm:$0xff] }
 0x3e7   : > { %v7121_v57 = vadd.f32 %v7041_v21, %v6961_v41  ;;  %v7046_v24 = vmul.f32 %v6883_v13, %v6883_v13  ;;  %v6885_v5 = vpop.f32.mrb[91].mxu0  ;;  %8513 = vmatprep.subr.bf16.mxu0 %v10140_v7  ;;  %v6971_v61 = vmul.f32 %v14024_v53, %v14024_v53 }
 0x3e8   : > { %v7122_v35 = vadd.f32 %v7042_v1, %v6962_v22  ;;  %v7047_v59 = vmul.f32 %v6885_v5, %v6885_v5 }
 0x3e9   : > { %v7126_v18 = vadd.f32 %v7046_v24, %v6966_v28 }
 0x3ea   : > { %v7127_v47 = vadd.f32 %v7047_v59, %v6967_v8 }
 0x3eb   : > { %v7171_v3 = vpack.c.bf16 %v7126_v18, %v7121_v57 }
 0x3ec   : > { %v7172_v62 = vpack.c.bf16 %v7127_v47, %v7122_v35  ;;  %v6889_v46 = vpop.f32.mrb[92].mxu0 }
 0x3ed   : > { %v7051_v10 = vmul.f32 %v6889_v46, %v6889_v46  ;;  %v6891_v52 = vpop.f32.mrb[93].mxu0  ;;  %7423 = vmatprep.subr.bf16.mxu1 %v7171_v3 }
 0x3ee   : > { %v7052_v23 = vmul.f32 %v6891_v52, %v6891_v52  ;;  %v6893_v48 = vpop.f32.mrb[94].mxu0  ;;  %7424 = vmatpush1.bf16.xpose.msra.mxu1 %v7170_v17  ;;  %8514 = vmatpush3.bf16.xpose.msra.mxu0 %v7172_v62  ;;  %v10080_v17 = vld [vmem:[%s13670_s2 + $0x30] ss:$20 sps:$4 sm:$0xff]  }
 0x3ef   : > { %v7131_v32 = vadd.f32 %v7051_v10, %v6971_v61  ;;  %v7056_v58 = vmul.f32 %v6893_v48, %v6893_v48  ;;  %v6895_v60 = vpop.f32.mrb[95].mxu0  ;;  %8515 = vmatprep.subr.bf16.mxu0 %v10140_v7 }
 0x3f0   : > { %v7132_v54 = vadd.f32 %v7052_v23, %v6972_v50  ;;  %v7057_v30 = vmul.f32 %v6895_v60, %v6895_v60 }
 0x3f1   : > { %v7136_v9 = vadd.f32 %v7056_v58, %v6976_v25 }
 0x3f2   : > { %v7137_v19 = vadd.f32 %v7057_v30, %v6977_v36 }
 0x3f3   : > { %v7176_v14 = vpack.c.bf16 %v7136_v9, %v7131_v32 }
 0x3f4   : > { %v7177_v2 = vpack.c.bf16 %v7137_v19, %v7132_v54 }
 0x3f5   : > { %7425 = vmatprep.subr.bf16.mxu1 %v7176_v14 }
 0x3f6   : > { %7426 = vmatpush1.bf16.xpose.msra.mxu1 %v7175_v42  ;;  %8516 = vmatpush3.bf16.xpose.msra.mxu0 %v7177_v2  ;;  %v10084_v42 = vld [vmem:[%s13670_s2 + $0x58] ss:$20 sps:$4 sm:$0xff]  }
 0x3f7   : > { %8537 = vmatprep.subr.bf16.mxu1 %v10140_v7 }
 0x3fd   : > { %7444 = vmatmul.mubr.bf16.vlgmr.msra.gmra.mrb[96].mxu1 %v10074_v26  ;;  %8518 = vmatmul.mubr.bf16.vlgmr.msra.gmra.mrb[96].mxu0 %v10077_v15 }
 0x3fe   : > { %8545 = vmatpush3.bf16.xpose.msra.mxu1 %v13450_v63  ;;  %7451 = vmatprep.mubr.bf16.mxu1 %v10078_v43  ;;  %v10085_v63 = vld [vmem:[%s13670_s2 + $0x84] ss:$20 sps:$4 sm:$0xff]  }
 0x3ff   : > { %8521 = vmatprep.mubr.msk.bf16.mxu0 %vm10141_vm3, %v10140_v7  ;;  %8538 = vmatprep.subr.bf16.mxu1 %v10140_v7 }
 0x405   : > { %7452 = vmatmul.mubr.bf16.gmra.mrb[100].mxu1 %v10080_v17  ;;  %8522 = vmatmul.mubr.bf16.gmra.mrb[100].mxu0 %v10081_v11 }
 0x406   : > { %8546 = vmatpush3.bf16.xpose.msra.mxu1 %v13465_v39  ;;  %7459 = vmatprep.mubr.bf16.mxu1 %v10082_v45  ;;  %v10087_v39 = vld [vmem:[%s13670_s2 + $0x80] ss:$20 sps:$4 sm:$0xff]  }
 0x407   : > { %8539 = vmatprep.subr.bf16.mxu1 %v10140_v7 }
 0x40d   : > { %7460 = vmatmul.mubr.bf16.gmra.mrb[104].mxu1 %v10084_v42 }
 0x40e   : > { %8547 = vmatpush3.bf16.xpose.msra.mxu1 %v13480_v56  ;;  %7467 = vmatprep.mubr.bf16.mxu1 %v10085_v63  ;;  %v10090_v56 = vld [vmem:[%s13670_s2 + $0xa8] ss:$20 sps:$4 sm:$0xff]  }
 0x40f   : > { %8540 = vmatprep.subr.bf16.mxu1 %v10140_v7 }
 0x415   : > { %7468 = vmatmul.mubr.bf16.gmra.mrb[108].mxu1 %v10087_v39 }
 0x416   : > { %8548 = vmatpush3.bf16.xpose.msra.mxu1 %v13507_v29  ;;  %7475 = vmatprep.mubr.bf16.mxu1 %v10088_v55  ;;  %v10091_v29 = vld [vmem:[%s13670_s2 + $0x60] ss:$20 sps:$4 sm:$0xff]  }
 0x417   : > { %8541 = vmatprep.subr.bf16.mxu1 %v10140_v7 }
 0x41d   : > { %7476 = vmatmul.mubr.bf16.gmra.mrb[112].mxu1 %v10090_v56 }
 0x41e   : > { %8549 = vmatpush3.bf16.xpose.msra.mxu1 %v13534_v34  ;;  %8525 = vmatprep.mubr.msk.bf16.mxu1 %vm10141_vm3, %v10140_v7  ;;  %v10092_v34 = vld [vmem:[%s13670_s2 + $0x88] ss:$20 sps:$4 sm:$0xff]  }
 0x41f   : > { %8542 = vmatprep.subr.bf16.mxu1 %v10140_v7 }
 0x426   : > { %8550 = vmatpush3.bf16.xpose.msra.mxu1 %v13555_v6 }
 0x427   : > { %8543 = vmatprep.subr.bf16.mxu1 %v10140_v7 }
 0x42e   : > { %8551 = vmatpush3.bf16.xpose.msra.mxu1 %v7172_v62 }
 0x42f   : > { %8544 = vmatprep.subr.bf16.mxu1 %v10140_v7 }
 0x436   : > { %8552 = vmatpush3.bf16.xpose.msra.mxu1 %v7177_v2 }
 0x43d   : > { %8526 = vmatmul.mubr.bf16.vlgmr.msra.gmra.mrb[104].mxu1 %v10091_v29 }
 0x43e   : > { %8529 = vmatprep.mubr.msk.bf16.mxu1 %vm10141_vm3, %v10140_v7 }
 0x442   : > { %v7610_v53 = vpop.permute.xlu1 %7609 }
 0x445   : > { %8530 = vmatmul.mubr.bf16.gmra.mrb[108].mxu1 %v10092_v34 }
 0x446   : > { %8533 = vmatprep.mubr.msk.bf16.mxu1 %vm10141_vm3, %v10140_v7  ;;  %v7600_v7 = vpop.permute.xlu0 %7599 }
 0x447   : > { %v7615_v23 = vpop.permute.xlu1 %7614 }
 0x44a   : > { %v7605_v3 = vpop.permute.xlu0 %7604 }
 0x44c   : > { %v7625_v55 = vpop.permute.xlu1 %7624 }
 0x44d   : > { %8534 = vmatmul.mubr.bf16.gmra.mrb[112].mxu1 %v10093_v51 }
 0x44e   : > { %v7620_v45 = vpop.permute.xlu0 %7619 }
 0x4d0   : > { %v7445_v33 = vpop.f32.mrb[96].mxu1  ;;  %v7518_v38 = vpop.f32.mrb[96].mxu0 }
 0x4d1   : > { %v8585_v49 = vadd.f32 %v7518_v38, %v7445_v33  ;;  %v7447_v16 = vpop.f32.mrb[97].mxu1  ;;  %v8519_v12 = vpop.f32.mrb[97].mxu0 }
 0x4d2   : > { %v7448_v31 = vpop.f32.mrb[98].mxu1  ;;  %v7521_v44 = vpop.f32.mrb[98].mxu0 }
 0x4d3   : > { %v7557_v6 = vmax.f32 %v8585_v49, 1e-05  ;;  %v8586_v4 = vadd.f32 %v7521_v44, %v7448_v31  ;;  %v7450_v40 = vpop.f32.mrb[99].mxu1  ;;  %v8520_v41 = vpop.f32.mrb[99].mxu0 }
 0x4d4   : > { %v7630_v31 = vpop.permute.xlu0 %7629 }
 0x4d5   : > { %10094 = vlog2.f32 %v7557_v6  ;;  %v7558_v21 = vmax.f32 %v8586_v4, 1e-05  ;;  %v7635_v4 = vpop.permute.xlu1 %7634 }
 0x4d7   : > { %10096 = vlog2.f32 %v7558_v21 }
 0x4d8   : > { %v7453_v37 = vpop.f32.mrb[100].mxu1  ;;  %v7526_v22 = vpop.f32.mrb[100].mxu0 }
 0x4d9   : > { %v8587_v1 = vadd.f32 %v7526_v22, %v7453_v37  ;;  %v7455_v13 = vpop.f32.mrb[101].mxu1  ;;  %v8523_v0 = vpop.f32.mrb[101].mxu0 }
 0x4da   : > { %v7456_v28 = vpop.f32.mrb[102].mxu1  ;;  %v7529_v57 = vpop.f32.mrb[102].mxu0 }
 0x4db   : > { %v7559_v24 = vmax.f32 %v8587_v1, 1e-05  ;;  %v8588_v5 = vadd.f32 %v7529_v57, %v7456_v28  ;;  %v7458_v27 = vpop.f32.mrb[103].mxu1  ;;  %v8524_v8 = vpop.f32.mrb[103].mxu0 }
 0x4dc   : > { %v7640_v37 = vpop.permute.xlu0 %7639  ;;  %v7645_v13 = vpop.permute.xlu1 %7644 }
 0x4dd   : > { %10098 = vlog2.f32 %v7559_v24  ;;  %v7560_v35 = vmax.f32 %v8588_v5, 1e-05 }
 0x4df   : > { %v10095_v59 = vpop.eup %10094  ;;  %10100 = vlog2.f32 %v7560_v35 }
 0x4e0   : > { %v7568_v18 = vmul.f32 0.6931472, %v10095_v59 }
 0x4e1   : > { %v10097_v47 = vpop.eup %10096 }
 0x4e2   : > { %v7647_v62 = vmul.f32 %v7600_v7, %v7568_v18  ;;  %v7570_v46 = vmul.f32 0.6931472, %v10097_v47 }
 0x4e4   : > { %7657 = vst [vmem:[%s10206_s26] sm:$0xff] %v7647_v62  ;;  %v7648_v61 = vmul.f32 %v7605_v3, %v7570_v46 }
 0x4e6   : > { %7658 = vst [vmem:[%s10206_s26 + $0x8] sm:$0xff] %v7648_v61 }
 0x4e7   : > { %v10099_v10 = vpop.eup %10098 }
 0x4e8   : > { %v7572_v52 = vmul.f32 0.6931472, %v10099_v10 }
 0x4e9   : > { %v10101_v50 = vpop.eup %10100 }
 0x4ea   : > { %v7649_v48 = vmul.f32 %v7610_v53, %v7572_v52  ;;  %v7574_v20 = vmul.f32 0.6931472, %v10101_v50 }
 0x4ec   : > { %7659 = vst [vmem:[%s10206_s26 + $0x10] sm:$0xff] %v7649_v48  ;;  %v7650_v25 = vmul.f32 %v7615_v23, %v7574_v20 }
 0x4ee   : > { %7660 = vst [vmem:[%s10206_s26 + $0x18] sm:$0xff] %v7650_v25 }
 0x510   : > { %v7534_v32 = vpop.f32.mrb[104].mxu1 }
 0x511   : > { %v7561_v58 = vmax.f32 %v7534_v32, 1e-05  ;;  %v8527_v60 = vpop.f32.mrb[105].mxu1 }
 0x512   : > { %v7537_v36 = vpop.f32.mrb[106].mxu1 }
 0x513   : > { %10102 = vlog2.f32 %v7561_v58  ;;  %v7562_v54 = vmax.f32 %v7537_v36, 1e-05  ;;  %v8528_v30 = vpop.f32.mrb[107].mxu1 }
 0x515   : > { %10104 = vlog2.f32 %v7562_v54 }
 0x518   : > { %v7542_v9 = vpop.f32.mrb[108].mxu1 }
 0x519   : > { %v7563_v19 = vmax.f32 %v7542_v9, 1e-05  ;;  %v8531_v14 = vpop.f32.mrb[109].mxu1 }
 0x51a   : > { %v7545_v2 = vpop.f32.mrb[110].mxu1 }
 0x51b   : > { %10106 = vlog2.f32 %v7563_v19  ;;  %v7564_v26 = vmax.f32 %v7545_v2, 1e-05  ;;  %v8532_v15 = vpop.f32.mrb[111].mxu1 }
 0x51d   : > { %v10103_v43 = vpop.eup %10102  ;;  %10108 = vlog2.f32 %v7564_v26 }
 0x51e   : > { %v7576_v17 = vmul.f32 0.6931472, %v10103_v43 }
 0x51f   : > { %v10105_v11 = vpop.eup %10104 }
 0x520   : > { %v7578_v42 = vmul.f32 0.6931472, %v10105_v11  ;;  %v7651_v63 = vmul.f32 %v7620_v45, %v7576_v17  ;;  %v7550_v39 = vpop.f32.mrb[112].mxu1 }
 0x521   : > { %v7565_v56 = vmax.f32 %v7550_v39, 1e-05  ;;  %v8535_v29 = vpop.f32.mrb[113].mxu1 }
 0x522   : > { %v7652_v34 = vmul.f32 %v7625_v55, %v7578_v42  ;;  %7661 = vst [vmem:[%s10206_s26 + $0x20] sm:$0xff] %v7651_v63  ;;  %v7553_v51 = vpop.f32.mrb[114].mxu1 }
 0x523   : > { %10110 = vlog2.f32 %v7565_v56  ;;  %v7566_v33 = vmax.f32 %v7553_v51, 1e-05  ;;  %v8536_v38 = vpop.f32.mrb[115].mxu1 }
 0x524   : > { %7662 = vst [vmem:[%s10206_s26 + $0x28] sm:$0xff] %v7652_v34 }
 0x525   : > { %v10107_v49 = vpop.eup %10106  ;;  %10112 = vlog2.f32 %v7566_v33 }
 0x526   : > { %v7580_v16 = vmul.f32 0.6931472, %v10107_v49 }
 0x527   : > { %v10109_v12 = vpop.eup %10108 }
 0x528   : > { %v7582_v44 = vmul.f32 0.6931472, %v10109_v12  ;;  %v7653_v6 = vmul.f32 %v7630_v31, %v7580_v16 }
 0x52a   : > { %v7654_v40 = vmul.f32 %v7635_v4, %v7582_v44  ;;  %7663 = vst [vmem:[%s10206_s26 + $0x30] sm:$0xff] %v7653_v6 }
 0x52c   : > { %7664 = vst [vmem:[%s10206_s26 + $0x38] sm:$0xff] %v7654_v40 }
 0x52d   : > { %v10111_v41 = vpop.eup %10110 }
 0x52e   : > { %v7584_v21 = vmul.f32 0.6931472, %v10111_v41 }
 0x52f   : > { %v10113_v7 = vpop.eup %10112 }
 0x530   : > { %v7655_v22 = vmul.f32 %v7640_v37, %v7584_v21  ;;  %v7586_v1 = vmul.f32 0.6931472, %v10113_v7 }
 0x532   : > { %7665 = vst [vmem:[%s10206_s26 + $0x40] sm:$0xff] %v7655_v22  ;;  %v7656_v0 = vmul.f32 %v7645_v13, %v7586_v1 }
 0x534   : > { %7666 = vst [vmem:[%s10206_s26 + $0x48] sm:$0xff] %v7656_v0 }
 0x535 PF: > { %s14_s17 = sadd.s32 1, %s10138_s17   ;;  %s14026_s15 = smov %s10134_s16 }
 0x536   : > { %p11_p5 = scmp.ge.s32.totalorder %s14_s17, 4   ;;  %s14027_s16 = smov %s14029_s18 }
 0x538   :  { %13 = sbr.rel (!%p11_p5) target bundleno = 2 (0x2), region = 158 }
 0x53f   :  { %7694 = vsyncmov [#allocation3] }
 0x542   :  { %s7695_s9 = vpop.sfrf %7694 }
 0x543   :  { %p8483_p6 = scmp.ne.s32.totalorder %s7695_s9, 0 }
 0x545   :  { %7699 = shalt.err (%p8483_p6)  }
 0x546   :  { %7701 = vsyncmov [#allocation3 + $0x1] }
 0x549   :  { %s7702_s10 = vpop.sfrf %7701 }
 0x54a   :  { %p8484_p7 = scmp.ne.s32.totalorder %s7702_s10, 0 }
 0x54c   :  { %7706 = shalt.err (%p8484_p7)  }

</bundles_post_ra>
